<compile_context>
chip_gen: v6e
topology: v6e:2x2x1
jax: 0.10.0
libtpu: 0.0.40
codegen_flags: <defaults>
</compile_context>

<pallas_src>
import functools

import jax
import jax.numpy as jnp
from jax import lax
from jax.experimental import pallas as pl
from jax.experimental.pallas import tpu as pltpu


N_FEATS = 64                  # VDSR n_feats
N_BODY = 18                   # VDSR body layers
N_CONV_LAYERS = N_BODY + 2    # head + body + tail


# ----------------------------------------------------------------------------
# Fused Pallas kernel: the whole VDSR conv stack for one image.
#
#   x_ref   : (1, H, W, 64)    bf16  upsampled input, channels zero-padded 3->64
#   w_ref   : (L, 3, 192, 64)  bf16  per-layer/per-dh im2col weight slabs,
#                                     contraction order (dw, cin); head Cin and
#                                     tail Cout zero-padded to 64, BN folded in
#   b_ref   : (L, 1, 64)       f32   folded biases (tail padded with zeros)
#   o_ref   : (1, H, W, 64)    f32   tail conv output slab (channels 3..63 == 0)
#   lhs_ref : (H+2, W, 192)    bf16  persistent im2col scratch:
#                                     lhs[i, j, dw*64 + c] = a[i-1, j+dw-1, c]
#                                     (zero outside the image).
# ----------------------------------------------------------------------------
def _vdsr_fused_kernel(x_ref, w_ref, b_ref, o_ref, lhs_ref, *, H, W, n_layers):
    F = N_FEATS
    HW = H * W
    K3 = 3 * F

    # Zero once: rows 0 / H+1 provide the top/bottom SAME padding forever; the
    # left/right border columns are re-zeroed every layer by the zcol concat.
    lhs_ref[...] = jnp.zeros_like(lhs_ref)

    zcol = jnp.zeros((H, 1, F), jnp.bfloat16)

    def write_shifted(a):
        """Scatter activation a (H, W, 64) bf16 into the im2col scratch."""
        aw = jnp.concatenate([zcol, a, zcol], axis=1)          # (H, W+2, F)
        lhs_ref[1:H + 1, :, F:2 * F] = a                       # dw = 1 (center)
        lhs_ref[1:H + 1, :, 0:F] = aw[:, 0:W, :]               # dw = 0 (left)
        lhs_ref[1:H + 1, :, 2 * F:3 * F] = aw[:, 2:W + 2, :]   # dw = 2 (right)

    def conv_from_lhs(w_l, b_l):
        """3 row-shifted K=192 MXU matmuls, accumulated as values (no VMEM RMW)."""
        acc = None
        for dh in range(3):                                    # static, tiny
            rows = lhs_ref[dh:dh + H].reshape(HW, K3)          # aligned slice
            part = lax.dot_general(
                rows, w_l[dh],
                (((1,), (0,)), ((), ())),
                preferred_element_type=jnp.float32)
            acc = part if acc is None else acc + part
        return acc + b_l                                       # (HW, 64) f32

    # Layer 0 input: channel-padded (3 -> 64) bicubic image.
    write_shifted(x_ref[0])

    # Head + 18 body layers: conv + folded-BN bias + ReLU, rolled loop.
    def body(l, carry):
        h = conv_from_lhs(w_ref[l], b_ref[l])
        a = jnp.maximum(h, 0.0).astype(jnp.bfloat16).reshape(H, W, F)
        write_shifted(a)
        return carry

    lax.fori_loop(0, n_layers - 1, body, 0)

    # Tail conv (no ReLU).  Padded output channels 3..63 are exactly zero
    # (zero-padded tail weights/bias); the residual add happens in XLA in f32.
    y = conv_from_lhs(w_ref[n_layers - 1], b_ref[n_layers - 1])
    o_ref[0] = y.reshape(H, W, F).astype(o_ref.dtype)


def vdsr_pallas_call(x0, w_all, b_all):
    """Run the fused VDSR conv stack.  x0: (N,H,W,64) bf16 -> (N,H,W,64) f32."""
    N, H, W, _ = x0.shape
    n_layers = w_all.shape[0]
    kernel = functools.partial(_vdsr_fused_kernel, H=H, W=W, n_layers=n_layers)

    flops = 2 * N * n_layers * H * W * (3 * 3 * N_FEATS) * N_FEATS
    bytes_accessed = (x0.size * 2 + w_all.size * 2 + b_all.size * 4 +
                      N * H * W * N_FEATS * 4)

    # Footprint-derived VMEM budget (lane-padded sizes), capped for v7x (64 MiB).
    est = ((H + 2) * W * 256 * 2            # lhs scratch (192 -> 256 lanes) bf16
           + 2 * H * W * 128 * 2            # x0 block, double buffered, bf16
           + 2 * H * W * 128 * 4            # out block, double buffered, f32
           + n_layers * 3 * 192 * 128 * 2   # weights (single copy)
           + 4 * H * W * N_FEATS * 4)       # headroom for in-flight f32 values
    vmem_limit = int(min(64 * 2**20, max(32 * 2**20, 2 * est)))

    return pl.pallas_call(
        kernel,
        out_shape=jax.ShapeDtypeStruct((N, H, W, N_FEATS), jnp.float32),
        grid=(N,),
        in_specs=[
            pl.BlockSpec((1, H, W, N_FEATS), lambda n: (n, 0, 0, 0)),
            # Constant across the grid: whole-array VMEM operands, no
            # per-step double buffering of the weight/bias slabs.
            pl.BlockSpec(memory_space=pltpu.MemorySpace.VMEM),
            pl.BlockSpec(memory_space=pltpu.MemorySpace.VMEM),
        ],
        out_specs=pl.BlockSpec((1, H, W, N_FEATS), lambda n: (n, 0, 0, 0)),
        scratch_shapes=[
            pltpu.VMEM((H + 2, W, 3 * N_FEATS), jnp.bfloat16),
        ],
        compiler_params=pltpu.CompilerParams(
            dimension_semantics=("parallel",),
            vmem_limit_bytes=vmem_limit),
        cost_estimate=pl.CostEstimate(
            flops=int(flops), transcendentals=0,
            bytes_accessed=int(bytes_accessed)),
    )(x0, w_all, b_all)


# ----------------------------------------------------------------------------
# Bicubic interpolation (PyTorch F.interpolate(mode='bicubic'),
# align_corners=False, a=-0.75, half-pixel centers, clamped indices).
# Plain-JAX glue (gather-based, not the conv hot path).
# ----------------------------------------------------------------------------
def _cubic(t, a=-0.75):
    t = jnp.abs(t)
    t2, t3 = t * t, t * t * t
    w1 = (a + 2.0) * t3 - (a + 3.0) * t2 + 1.0
    w2 = a * t3 - 5.0 * a * t2 + 8.0 * a * t - 4.0 * a
    return jnp.where(t <= 1.0, w1, jnp.where(t < 2.0, w2, 0.0))


def _resize_axis_bicubic(x, axis, out_len):
    in_len = x.shape[axis]
    scale = in_len / out_len
    dst = jnp.arange(out_len, dtype=jnp.float32)
    src = (dst + 0.5) * scale - 0.5
    fl = jnp.floor(src)
    t = src - fl
    idx = jnp.stack([fl - 1, fl, fl + 1, fl + 2], 0).astype(jnp.int32)
    idx = jnp.clip(idx, 0, in_len - 1)                      # (4, out_len)
    wts = jnp.stack([_cubic(t + 1.0), _cubic(t),
                     _cubic(1.0 - t), _cubic(2.0 - t)], 0)  # (4, out_len)
    xm = jnp.moveaxis(x, axis, 0)                           # (in_len, ...)
    g = xm[idx]                                             # (4, out_len, ...)
    wts = wts.reshape(wts.shape + (1,) * (g.ndim - 2))
    out = jnp.sum(wts * g, axis=0)
    return jnp.moveaxis(out, 0, axis)


def bicubic_resize_nchw(x, out_size):
    oh, ow = out_size
    x = _resize_axis_bicubic(x, 2, oh)
    x = _resize_axis_bicubic(x, 3, ow)
    return x


# ----------------------------------------------------------------------------
# Deterministic parameter init (shapes from VDSR.__init__):
#   head: Conv(n_colors->64,3) + BN(64) + ReLU
#   body: 18 x [Conv(64->64,3) + BN(64) + ReLU]
#   tail: Conv(64->n_colors,3)
# BN (eval mode, running stats) is folded into conv weight/bias.
# ----------------------------------------------------------------------------
def init_params(key, n_colors=3, n_feats=N_FEATS, n_body=N_BODY):
    eps = 1e-5
    blocks = []
    dims = [(n_colors, n_feats)] + [(n_feats, n_feats)] * n_body
    for cin, cout in dims:
        key, k1, k2, k3, k4, k5, k6 = jax.random.split(key, 7)
        w = jax.random.normal(k1, (cout, cin, 3, 3), jnp.float32) * jnp.sqrt(
            2.0 / (cin * 9))
        b = 0.01 * jax.random.normal(k2, (cout,), jnp.float32)
        gamma = 1.0 + 0.1 * jax.random.normal(k3, (cout,), jnp.float32)
        beta = 0.1 * jax.random.normal(k4, (cout,), jnp.float32)
        mean = 0.01 * jax.random.normal(k5, (cout,), jnp.float32)
        var = jnp.abs(1.0 + 0.1 * jax.random.normal(k6, (cout,), jnp.float32))
        scale = gamma / jnp.sqrt(var + eps)
        w_hwio = jnp.transpose(w, (2, 3, 1, 0)) * scale[None, None, None, :]
        b_fold = (b - mean) * scale + beta
        blocks.append((w_hwio, b_fold))
    key, k1, k2 = jax.random.split(key, 3)
    wt = jax.random.normal(k1, (n_colors, n_feats, 3, 3), jnp.float32) * jnp.sqrt(
        2.0 / (n_feats * 9))
    bt = 0.01 * jax.random.normal(k2, (n_colors,), jnp.float32)
    tail = (jnp.transpose(wt, (2, 3, 1, 0)), bt)
    return {"blocks": blocks, "tail": tail}


def pack_params(params, n_feats=N_FEATS):
    """Stack all 20 layers into (L,3,3F,F) bf16 slabs + (L,1,F) f32 biases."""
    slabs, biases = [], []
    for w, b in params["blocks"]:                   # head + 18 body (with ReLU)
        cin = w.shape[2]
        if cin < n_feats:                           # head: pad Cin 3 -> 64
            w = jnp.pad(w, ((0, 0), (0, 0), (0, n_feats - cin), (0, 0)))
        slabs.append(w.reshape(3, 3 * n_feats, n_feats))
        biases.append(b.reshape(1, n_feats))
    wt, bt = params["tail"]                         # tail: pad Cout 3 -> 64
    n_colors = wt.shape[-1]
    wt_p = jnp.pad(wt, ((0, 0), (0, 0), (0, 0), (0, n_feats - n_colors)))
    bt_p = jnp.pad(bt, ((0, n_feats - n_colors),))
    slabs.append(wt_p.reshape(3, 3 * n_feats, n_feats))
    biases.append(bt_p.reshape(1, n_feats))
    w_all = jnp.stack(slabs).astype(jnp.bfloat16)   # (20, 3, 192, 64)
    b_all = jnp.stack(biases).astype(jnp.float32)   # (20, 1, 64)
    return w_all, b_all


# ----------------------------------------------------------------------------
# VDSR forward.  Input/output are NCHW (PyTorch convention).
# NOTE: W should be a multiple of 8 (true for real SR sizes) so the in-kernel
# (H, W, 3F) -> (H*W, 3F) reshapes are copy-free.
# ----------------------------------------------------------------------------
def vdsr_forward_pallas(x_nchw, out_size, params):
    x_up = bicubic_resize_nchw(x_nchw, out_size)          # (N, C, H, W) f32
    res = jnp.transpose(x_up, (0, 2, 3, 1))               # (N, H, W, C) f32
    N, H, W, C = res.shape
    x0 = jnp.pad(res, ((0, 0), (0, 0), (0, 0), (0, N_FEATS - C))
                 ).astype(jnp.bfloat16)                   # (N, H, W, 64) bf16
    w_all, b_all = pack_params(params)
    y_slab = vdsr_pallas_call(x0, w_all, b_all)           # (N, H, W, 64) f32
    out_nhwc = y_slab[..., :C] + res                      # residual add, f32
    return jnp.transpose(out_nhwc, (0, 3, 1, 2))          # -> NCHW


# Pure-JAX reference mirroring the kernel's numerics (bf16 conv operands,
# f32 accumulation / bias / ReLU, bf16 inter-layer activations, f32 residual).
def vdsr_forward_ref(x_nchw, out_size, params):
    x = bicubic_resize_nchw(x_nchw, out_size)
    res = jnp.transpose(x, (0, 2, 3, 1))                  # NHWC f32
    h = res.astype(jnp.bfloat16)
    for w, b in params["blocks"]:
        y = lax.conv_general_dilated(
            h, w.astype(jnp.bfloat16), (1, 1), "SAME",
            dimension_numbers=("NHWC", "HWIO", "NHWC"),
            preferred_element_type=jnp.float32) + b.reshape(1, 1, 1, -1)
        h = jnp.maximum(y, 0.0).astype(jnp.bfloat16)
    wt, bt = params["tail"]
    y = lax.conv_general_dilated(
        h, wt.astype(jnp.bfloat16), (1, 1), "SAME",
        dimension_numbers=("NHWC", "HWIO", "NHWC"),
        preferred_element_type=jnp.float32) + bt.reshape(1, 1, 1, -1)
    out = y + res
    return jnp.transpose(out, (0, 3, 1, 2))


if __name__ == "__main__":
    key = jax.random.PRNGKey(0)
    k_in, k_par = jax.random.split(key)

    n_colors = 3
    x = jax.random.normal(k_in, (2, n_colors, 8, 8), jnp.float32)  # NCHW input
    out_size = (16, 16)

    params = init_params(k_par, n_colors=n_colors)

    out = jax.block_until_ready(vdsr_forward_pallas(x, out_size, params))
    assert out.shape == (2, n_colors, 16, 16), out.shape

    ref = jax.block_until_ready(vdsr_forward_ref(x, out_size, params))
    max_err = float(jnp.max(jnp.abs(out - ref)))
    assert jnp.allclose(out, ref, rtol=2e-2, atol=2e-2), max_err

    print("KERNEL_OK")
</pallas_src>

<mosaic_0001>
module attributes {stable_mosaic.version = 11 : i64} {
  func.func @_vdsr_fused_kernel(%arg0: i32, %arg1: memref<1x16x16x64xbf16, #tpu.memory_space<vmem>>, %arg2: memref<20x3x192x64xbf16, #tpu.memory_space<vmem>>, %arg3: memref<20x1x64xf32, #tpu.memory_space<vmem>>, %arg4: memref<1x16x16x64xf32, #tpu.memory_space<vmem>>, %arg5: memref<18x16x192xbf16, #tpu.memory_space<vmem>>) attributes {dimension_semantics = [#tpu.dimension_semantics<parallel>], iteration_bounds = array<i64: 2>, scalar_prefetch = 0 : i64, scratch_operands = 1 : i64, tpu.core_type = #tpu.core_type<tc>, window_params = [{transform_indices = @transform_0, window_bounds = array<i64: 1, 16, 16, 64>}, {pipeline_mode = #tpu.pipeline_mode<synchronous>, transform_indices = @transform_1, window_bounds = array<i64: 20, 3, 192, 64>}, {pipeline_mode = #tpu.pipeline_mode<synchronous>, transform_indices = @transform_2, window_bounds = array<i64: 20, 1, 64>}, {transform_indices = @transform_3, window_bounds = array<i64: 1, 16, 16, 64>}]} {
    %cst = arith.constant 0.000000e+00 : bf16
    %0 = vector.broadcast %cst : bf16 to vector<18x16x192xbf16>
    %c0 = arith.constant 0 : index
    %c0_0 = arith.constant 0 : index
    %c0_1 = arith.constant 0 : index
    %1 = vector.load %arg5[%c0, %c0_0, %c0_1] : memref<18x16x192xbf16, #tpu.memory_space<vmem>>, vector<18x16x192xbf16>
    tpu.vector_store %arg5[%c0, %c0_0, %c0_1], %0 {strides = array<i32>} : memref<18x16x192xbf16, #tpu.memory_space<vmem>>, vector<18x16x192xbf16>,
    %cst_2 = arith.constant 0.000000e+00 : bf16
    %2 = vector.broadcast %cst_2 : bf16 to vector<16x1x64xbf16>
    %c0_3 = arith.constant 0 : index
    %c0_4 = arith.constant 0 : index
    %c0_5 = arith.constant 0 : index
    %c0_6 = arith.constant 0 : index
    %3 = vector.load %arg1[%c0_3, %c0_4, %c0_5, %c0_6] : memref<1x16x16x64xbf16, #tpu.memory_space<vmem>>, vector<1x16x16x64xbf16>
    %4 = vector.shape_cast %3 : vector<1x16x16x64xbf16> to vector<16x16x64xbf16>
    %5 = tpu.concatenate %2, %4, %2 in 1 : vector<16x1x64xbf16>, vector<16x16x64xbf16>, vector<16x1x64xbf16> -> vector<16x18x64xbf16>
    %c1 = arith.constant 1 : index
    %c0_7 = arith.constant 0 : index
    %c64 = arith.constant 64 : index
    %6 = vector.load %arg5[%c1, %c0_7, %c64] : memref<18x16x192xbf16, #tpu.memory_space<vmem>>, vector<16x16x64xbf16>
    tpu.vector_store %arg5[%c1, %c0_7, %c64], %4 {strides = array<i32>} : memref<18x16x192xbf16, #tpu.memory_space<vmem>>, vector<16x16x64xbf16>,
    %7 = vector.extract_strided_slice %5 {offsets = [0, 0, 0], sizes = [16, 16, 64], strides = [1, 1, 1]} : vector<16x18x64xbf16> to vector<16x16x64xbf16>
    %c1_8 = arith.constant 1 : index
    %c0_9 = arith.constant 0 : index
    %c0_10 = arith.constant 0 : index
    %8 = vector.load %arg5[%c1_8, %c0_9, %c0_10] : memref<18x16x192xbf16, #tpu.memory_space<vmem>>, vector<16x16x64xbf16>
    tpu.vector_store %arg5[%c1_8, %c0_9, %c0_10], %7 {strides = array<i32>} : memref<18x16x192xbf16, #tpu.memory_space<vmem>>, vector<16x16x64xbf16>,
    %9 = vector.extract_strided_slice %5 {offsets = [0, 2, 0], sizes = [16, 16, 64], strides = [1, 1, 1]} : vector<16x18x64xbf16> to vector<16x16x64xbf16>
    %c1_11 = arith.constant 1 : index
    %c0_12 = arith.constant 0 : index
    %c128 = arith.constant 128 : index
    %10 = vector.load %arg5[%c1_11, %c0_12, %c128] : memref<18x16x192xbf16, #tpu.memory_space<vmem>>, vector<16x16x64xbf16>
    tpu.vector_store %arg5[%c1_11, %c0_12, %c128], %9 {strides = array<i32>} : memref<18x16x192xbf16, #tpu.memory_space<vmem>>, vector<16x16x64xbf16>,
    %c0_i32 = arith.constant 0 : i32
    %c19_i32 = arith.constant 19 : i32
    %11 = arith.addi %c0_i32, %c19_i32 : i32
    %c1_i32 = arith.constant 1 : i32
    scf.for %arg6 = %c0_i32 to %11 step %c1_i32  : i32 {
      %39 = arith.index_cast %arg6 : i32 to index
      %c0_35 = arith.constant 0 : index
      %c0_36 = arith.constant 0 : index
      %c0_37 = arith.constant 0 : index
      %40 = vector.load %arg2[%39, %c0_35, %c0_36, %c0_37] : memref<20x3x192x64xbf16, #tpu.memory_space<vmem>>, vector<1x3x192x64xbf16>
      %41 = vector.shape_cast %40 : vector<1x3x192x64xbf16> to vector<3x192x64xbf16>
      %42 = arith.index_cast %arg6 : i32 to index
      %c0_38 = arith.constant 0 : index
      %c0_39 = arith.constant 0 : index
      %43 = vector.load %arg3[%42, %c0_38, %c0_39] : memref<20x1x64xf32, #tpu.memory_space<vmem>>, vector<1x1x64xf32>
      %44 = vector.shape_cast %43 : vector<1x1x64xf32> to vector<1x64xf32>
      %c0_40 = arith.constant 0 : index
      %c0_41 = arith.constant 0 : index
      %c0_42 = arith.constant 0 : index
      %45 = vector.load %arg5[%c0_40, %c0_41, %c0_42] : memref<18x16x192xbf16, #tpu.memory_space<vmem>>, vector<16x16x192xbf16>
      %46 = vector.shape_cast %45 : vector<16x16x192xbf16> to vector<256x192xbf16>
      %47 = vector.extract_strided_slice %41 {offsets = [0, 0, 0], sizes = [1, 192, 64], strides = [1, 1, 1]} : vector<3x192x64xbf16> to vector<1x192x64xbf16>
      %48 = vector.shape_cast %47 : vector<1x192x64xbf16> to vector<192x64xbf16>
      %cst_43 = arith.constant dense<0.000000e+00> : vector<256x64xf32>
      %49 = tpu.matmul %46, %48, %cst_43 {dimension_numbers = #tpu.dot_dimension_numbers<[1], [0], [0], [1], [0, 0, 1, 1], [], []>} : vector<256x192xbf16>, vector<192x64xbf16>, vector<256x64xf32> -> vector<256x64xf32>
      %c1_44 = arith.constant 1 : index
      %c0_45 = arith.constant 0 : index
      %c0_46 = arith.constant 0 : index
      %50 = vector.load %arg5[%c1_44, %c0_45, %c0_46] : memref<18x16x192xbf16, #tpu.memory_space<vmem>>, vector<16x16x192xbf16>
      %51 = vector.shape_cast %50 : vector<16x16x192xbf16> to vector<256x192xbf16>
      %52 = vector.extract_strided_slice %41 {offsets = [1, 0, 0], sizes = [1, 192, 64], strides = [1, 1, 1]} : vector<3x192x64xbf16> to vector<1x192x64xbf16>
      %53 = vector.shape_cast %52 : vector<1x192x64xbf16> to vector<192x64xbf16>
      %cst_47 = arith.constant dense<0.000000e+00> : vector<256x64xf32>
      %54 = tpu.matmul %51, %53, %cst_47 {dimension_numbers = #tpu.dot_dimension_numbers<[1], [0], [0], [1], [0, 0, 1, 1], [], []>} : vector<256x192xbf16>, vector<192x64xbf16>, vector<256x64xf32> -> vector<256x64xf32>
      %55 = arith.addf %49, %54 : vector<256x64xf32>
      %c2_48 = arith.constant 2 : index
      %c0_49 = arith.constant 0 : index
      %c0_50 = arith.constant 0 : index
      %56 = vector.load %arg5[%c2_48, %c0_49, %c0_50] : memref<18x16x192xbf16, #tpu.memory_space<vmem>>, vector<16x16x192xbf16>
      %57 = vector.shape_cast %56 : vector<16x16x192xbf16> to vector<256x192xbf16>
      %58 = vector.extract_strided_slice %41 {offsets = [2, 0, 0], sizes = [1, 192, 64], strides = [1, 1, 1]} : vector<3x192x64xbf16> to vector<1x192x64xbf16>
      %59 = vector.shape_cast %58 : vector<1x192x64xbf16> to vector<192x64xbf16>
      %cst_51 = arith.constant dense<0.000000e+00> : vector<256x64xf32>
      %60 = tpu.matmul %57, %59, %cst_51 {dimension_numbers = #tpu.dot_dimension_numbers<[1], [0], [0], [1], [0, 0, 1, 1], [], []>} : vector<256x192xbf16>, vector<192x64xbf16>, vector<256x64xf32> -> vector<256x64xf32>
      %61 = arith.addf %55, %60 : vector<256x64xf32>
      %62 = vector.broadcast %44 : vector<1x64xf32> to vector<256x64xf32>
      %63 = arith.addf %61, %62 : vector<256x64xf32>
      %cst_52 = arith.constant 0.000000e+00 : f32
      %64 = vector.broadcast %cst_52 : f32 to vector<256x64xf32>
      %65 = arith.maximumf %63, %64 : vector<256x64xf32>
      %66 = arith.truncf %65 : vector<256x64xf32> to vector<256x64xbf16>
      %67 = vector.shape_cast %66 : vector<256x64xbf16> to vector<16x16x64xbf16>
      %68 = tpu.concatenate %2, %67, %2 in 1 : vector<16x1x64xbf16>, vector<16x16x64xbf16>, vector<16x1x64xbf16> -> vector<16x18x64xbf16>
      %c1_53 = arith.constant 1 : index
      %c0_54 = arith.constant 0 : index
      %c64_55 = arith.constant 64 : index
      %69 = vector.load %arg5[%c1_53, %c0_54, %c64_55] : memref<18x16x192xbf16, #tpu.memory_space<vmem>>, vector<16x16x64xbf16>
      tpu.vector_store %arg5[%c1_53, %c0_54, %c64_55], %67 {strides = array<i32>} : memref<18x16x192xbf16, #tpu.memory_space<vmem>>, vector<16x16x64xbf16>,
      %70 = vector.extract_strided_slice %68 {offsets = [0, 0, 0], sizes = [16, 16, 64], strides = [1, 1, 1]} : vector<16x18x64xbf16> to vector<16x16x64xbf16>
      %c1_56 = arith.constant 1 : index
      %c0_57 = arith.constant 0 : index
      %c0_58 = arith.constant 0 : index
      %71 = vector.load %arg5[%c1_56, %c0_57, %c0_58] : memref<18x16x192xbf16, #tpu.memory_space<vmem>>, vector<16x16x64xbf16>
      tpu.vector_store %arg5[%c1_56, %c0_57, %c0_58], %70 {strides = array<i32>} : memref<18x16x192xbf16, #tpu.memory_space<vmem>>, vector<16x16x64xbf16>,
      %72 = vector.extract_strided_slice %68 {offsets = [0, 2, 0], sizes = [16, 16, 64], strides = [1, 1, 1]} : vector<16x18x64xbf16> to vector<16x16x64xbf16>
      %c1_59 = arith.constant 1 : index
      %c0_60 = arith.constant 0 : index
      %c128_61 = arith.constant 128 : index
      %73 = vector.load %arg5[%c1_59, %c0_60, %c128_61] : memref<18x16x192xbf16, #tpu.memory_space<vmem>>, vector<16x16x64xbf16>
      tpu.vector_store %arg5[%c1_59, %c0_60, %c128_61], %72 {strides = array<i32>} : memref<18x16x192xbf16, #tpu.memory_space<vmem>>, vector<16x16x64xbf16>,
    }
    %c19_i32_13 = arith.constant 19 : i32
    %c19 = arith.constant 19 : index
    %c0_14 = arith.constant 0 : index
    %c0_15 = arith.constant 0 : index
    %c0_16 = arith.constant 0 : index
    %12 = vector.load %arg2[%c19, %c0_14, %c0_15, %c0_16] : memref<20x3x192x64xbf16, #tpu.memory_space<vmem>>, vector<1x3x192x64xbf16>
    %13 = vector.shape_cast %12 : vector<1x3x192x64xbf16> to vector<3x192x64xbf16>
    %c19_17 = arith.constant 19 : index
    %c0_18 = arith.constant 0 : index
    %c0_19 = arith.constant 0 : index
    %14 = vector.load %arg3[%c19_17, %c0_18, %c0_19] : memref<20x1x64xf32, #tpu.memory_space<vmem>>, vector<1x1x64xf32>
    %15 = vector.shape_cast %14 : vector<1x1x64xf32> to vector<1x64xf32>
    %c0_20 = arith.constant 0 : index
    %c0_21 = arith.constant 0 : index
    %c0_22 = arith.constant 0 : index
    %16 = vector.load %arg5[%c0_20, %c0_21, %c0_22] : memref<18x16x192xbf16, #tpu.memory_space<vmem>>, vector<16x16x192xbf16>
    %17 = vector.shape_cast %16 : vector<16x16x192xbf16> to vector<256x192xbf16>
    %18 = vector.extract_strided_slice %13 {offsets = [0, 0, 0], sizes = [1, 192, 64], strides = [1, 1, 1]} : vector<3x192x64xbf16> to vector<1x192x64xbf16>
    %19 = vector.shape_cast %18 : vector<1x192x64xbf16> to vector<192x64xbf16>
    %cst_23 = arith.constant dense<0.000000e+00> : vector<256x64xf32>
    %20 = tpu.matmul %17, %19, %cst_23 {dimension_numbers = #tpu.dot_dimension_numbers<[1], [0], [0], [1], [0, 0, 1, 1], [], []>} : vector<256x192xbf16>, vector<192x64xbf16>, vector<256x64xf32> -> vector<256x64xf32>
    %c1_24 = arith.constant 1 : index
    %c0_25 = arith.constant 0 : index
    %c0_26 = arith.constant 0 : index
    %21 = vector.load %arg5[%c1_24, %c0_25, %c0_26] : memref<18x16x192xbf16, #tpu.memory_space<vmem>>, vector<16x16x192xbf16>
    %22 = vector.shape_cast %21 : vector<16x16x192xbf16> to vector<256x192xbf16>
    %23 = vector.extract_strided_slice %13 {offsets = [1, 0, 0], sizes = [1, 192, 64], strides = [1, 1, 1]} : vector<3x192x64xbf16> to vector<1x192x64xbf16>
    %24 = vector.shape_cast %23 : vector<1x192x64xbf16> to vector<192x64xbf16>
    %cst_27 = arith.constant dense<0.000000e+00> : vector<256x64xf32>
    %25 = tpu.matmul %22, %24, %cst_27 {dimension_numbers = #tpu.dot_dimension_numbers<[1], [0], [0], [1], [0, 0, 1, 1], [], []>} : vector<256x192xbf16>, vector<192x64xbf16>, vector<256x64xf32> -> vector<256x64xf32>
    %26 = arith.addf %20, %25 : vector<256x64xf32>
    %c2 = arith.constant 2 : index
    %c0_28 = arith.constant 0 : index
    %c0_29 = arith.constant 0 : index
    %27 = vector.load %arg5[%c2, %c0_28, %c0_29] : memref<18x16x192xbf16, #tpu.memory_space<vmem>>, vector<16x16x192xbf16>
    %28 = vector.shape_cast %27 : vector<16x16x192xbf16> to vector<256x192xbf16>
    %29 = vector.extract_strided_slice %13 {offsets = [2, 0, 0], sizes = [1, 192, 64], strides = [1, 1, 1]} : vector<3x192x64xbf16> to vector<1x192x64xbf16>
    %30 = vector.shape_cast %29 : vector<1x192x64xbf16> to vector<192x64xbf16>
    %cst_30 = arith.constant dense<0.000000e+00> : vector<256x64xf32>
    %31 = tpu.matmul %28, %30, %cst_30 {dimension_numbers = #tpu.dot_dimension_numbers<[1], [0], [0], [1], [0, 0, 1, 1], [], []>} : vector<256x192xbf16>, vector<192x64xbf16>, vector<256x64xf32> -> vector<256x64xf32>
    %32 = arith.addf %26, %31 : vector<256x64xf32>
    %33 = vector.broadcast %15 : vector<1x64xf32> to vector<256x64xf32>
    %34 = arith.addf %32, %33 : vector<256x64xf32>
    %35 = vector.shape_cast %34 : vector<256x64xf32> to vector<16x16x64xf32>
    %c0_31 = arith.constant 0 : index
    %c0_32 = arith.constant 0 : index
    %c0_33 = arith.constant 0 : index
    %c0_34 = arith.constant 0 : index
    %36 = vector.load %arg4[%c0_31, %c0_32, %c0_33, %c0_34] : memref<1x16x16x64xf32, #tpu.memory_space<vmem>>, vector<1x16x16x64xf32>
    %37 = vector.shape_cast %36 : vector<1x16x16x64xf32> to vector<16x16x64xf32>
    %38 = vector.shape_cast %35 : vector<16x16x64xf32> to vector<1x16x16x64xf32>
    tpu.vector_store %arg4[%c0_31, %c0_32, %c0_33, %c0_34], %38 {strides = array<i32>} : memref<1x16x16x64xf32, #tpu.memory_space<vmem>>, vector<1x16x16x64xf32>,
    return
  }
  func.func @transform_0(%arg0: i32) -> (i32, i32, i32, i32) {
    %c0_i32 = arith.constant 0 : i32
    %c0_i32_0 = arith.constant 0 : i32
    %c0_i32_1 = arith.constant 0 : i32
    %c0_i32_2 = arith.constant 0 : i32
    return %arg0, %c0_i32, %c0_i32_0, %c0_i32_1 : i32, i32, i32, i32
  }
  func.func @transform_1(%arg0: i32) -> (i32, i32, i32, i32) {
    %c0_i32 = arith.constant 0 : i32
    %c0_i32_0 = arith.constant 0 : i32
    %c0_i32_1 = arith.constant 0 : i32
    %c0_i32_2 = arith.constant 0 : i32
    %c0_i32_3 = arith.constant 0 : i32
    return %c0_i32, %c0_i32_0, %c0_i32_1, %c0_i32_2 : i32, i32, i32, i32
  }
  func.func @transform_2(%arg0: i32) -> (i32, i32, i32) {
    %c0_i32 = arith.constant 0 : i32
    %c0_i32_0 = arith.constant 0 : i32
    %c0_i32_1 = arith.constant 0 : i32
    %c0_i32_2 = arith.constant 0 : i32
    return %c0_i32, %c0_i32_0, %c0_i32_1 : i32, i32, i32
  }
  func.func @transform_3(%arg0: i32) -> (i32, i32, i32, i32) {
    %c0_i32 = arith.constant 0 : i32
    %c0_i32_0 = arith.constant 0 : i32
    %c0_i32_1 = arith.constant 0 : i32
    %c0_i32_2 = arith.constant 0 : i32
    return %arg0, %c0_i32, %c0_i32_0, %c0_i32_1 : i32, i32, i32, i32
  }
}

</mosaic_0001>

<bundles_post_ra>
// kernel: tpu_custom_call.1
= control target key start
LH: loop header
LB: loop body
LE: loop exit
PB: predicated region body
PF: predicated region fallthrough
CT: control target
= control target key end

     0   :  { %8 = vsyncpa [#allocation4], 0  ;;  %s8251_s0 = inlined_call_operand.vmem [shape: bf16[2,16,16,64], index: 0, kind: input, shape index: {}]   ;;  %s8252_s1 = inlined_call_operand.vmem [shape: bf16[20,3,192,64], index: 1, kind: input, shape index: {}]   ;;  %s8253_s2 = inlined_call_operand.vmem [shape: f32[20,1,64], index: 2, kind: input, shape index: {}]   ;;  %s8254_s3 = inlined_call_operand.hbm [shape: f32[2,16,16,64], index: 3, kind: output, shape index: {}]  }
   0x1   :  { %10 = vsyncpa [#allocation4 + $0x1], 0  ;;  %s6016_s12 = smov 0   ;;  %s6018_s13 = smov 0  }
   0x2   :  { %s6020_s14 = smov 0   ;;  %s6022_s15 = smov 0  }
   0x3 LB: > { %s6037_s16 = sadd.s32 4294967295, %s5983_s15   ;;  %s4962_s17 = sadd.s32 4294967294, %s5983_s15   ;;  %s5983_s15 = sphi %s6022_s15, %s8266_s15   ;;  %s5979_s14 = sphi %s6020_s14, %s8265_s14   ;;  %s5975_s13 = sphi %s6018_s13, %s8264_s13   ;;  %s5971_s12 = sphi %s6016_s12, %s8263_s12  }
   0x4   : > { %s6041_s18 = sadd.s32 1, %s5983_s15   ;;  %s91_s19 = sadd.s32 1, %s5979_s14 }
   0x5   : > { %s88_s20 = ssub.s32 %s5983_s15, %s6041_s18  ;;  %p101_p0 = scmp.ne.s32.totalorder %s5979_s14, %s5975_s13 }
   0x6   : > { %p89_p1 = scmp.eq.s32.totalorder %s88_s20, 0  ;;  %p102_p2 = scmp.eq.s32.totalorder %s6037_s16, 1 }
   0x7   : > { %p107_p3 = scmp.ne.s32.totalorder %s5975_s13, %s5971_s12  ;;  %p108_p4 = scmp.eq.s32.totalorder %s4962_s17, 1 }
   0x8   : > { %s6052_s21 = scalar_select %p89_p1, %s5979_s14, %s91_s19  }
   0x9   : > { %p6054_p5 = por %p102_p2, %p101_p0  ;;  %p6058_p6 = por %p108_p4, %p107_p3 }
   0xa   : > { %p4965_p7 = scmp.ge.s32.totalorder %s5983_s15, 1  ;;  %p140_p8 = scmp.lt.s32.totalorder %s5983_s15, 3 }
   0xc   : > { %p141_p9 = pnand %p4965_p7, %p140_p8 }
   0xd   : > { %p164_p10 = scmp.lt.s32.totalorder (!%p141_p9), %s6037_s16, 1  ;;  %s5990_s29 = smov (!%p141_p9), 64  }
   0xe   : > { %144 = sbr.rel (%p141_p9) target bundleno = 1196 (0x4ac), region = 32  ;;  %s161_s30 = sand.u32 (!%p141_p9), 1, %s5975_s13  }
   0xf   : > { %s6581_s4 = sshll.u32 (!%p141_p9), %s161_s30, 8  ;;  %s6872_s6 = smov (!%p141_p9), 0  }
  0x10   : > { %s6870_s5 = scalar_lea.vmem (!%p141_p9), [#allocation3], %s6581_s4 }
  0x13   : > { %vm170_vm0 = vcmask 1043456   ;;  %vm171_vm1 = vcmask 523268   ;;  %s6066_s24 = scalar_select %p164_p10, %s6037_s16, 1  ;;  %v5989_v1 = vmov 0   ;;  %vm465_vm3 = vcmask 1040384  }
  0x14   : > { %vm6068_vm2 = vmor %vm171_vm1, %vm170_vm0  ;;  %vm466_vm4 = vsmask.f32 256  ;;  %vm823_vm6 = vcmask 1042432   ;;  %vm824_vm7 = vcmask 1046532   ;;  %vm742_vm8 = vcmask 519168  }
  0x15   : > { %177 = vst.msk [vmem:[#allocation2 + $0x20] sm:$0xff] %vm6068_vm2, %v5989_v1  ;;  %173 = vst.msk [vmem:[#allocation2] sm:$0xff] %vm6068_vm2, %v5989_v1  ;;  %s5586_s25 = sshll.u32 %s6066_s24, 7  ;;  %vm597_vm10 = vcmask 1043968  }
  0x16   : > { %174 = vst.msk [vmem:[#allocation2 + $0x8] sm:$0xff] %vm6068_vm2, %v5989_v1  ;;  %175 = vst.msk [vmem:[#allocation2 + $0x10] sm:$0xff] %vm6068_vm2, %v5989_v1  ;;  %s6184_s28 = scalar_lea.vmem %s8251_s0, %s5586_s25 }
  0x17   : > { %176 = vst.msk [vmem:[#allocation2 + $0x18] sm:$0xff] %vm6068_vm2, %v5989_v1  ;;  %178 = vst.msk [vmem:[#allocation2 + $0x28] sm:$0xff] %vm6068_vm2, %v5989_v1  ;;  %v211_v2 = vld [vmem:[%s6184_s28 + $0x8] sm:$0xf]  ;;  %v212_v3 = vld [vmem:[%s6184_s28 + $0xc] sm:$0xf] }
  0x18   : > { %179 = vst.msk [vmem:[#allocation2 + $0x30] sm:$0xff] %vm6068_vm2, %v5989_v1  ;;  %180 = vst.msk [vmem:[#allocation2 + $0x38] sm:$0xff] %vm6068_vm2, %v5989_v1  ;;  %v209_v4 = vld [vmem:[%s6184_s28] sm:$0xf]  ;;  %504 = vrot.lane.b32.xlu1 %v211_v2, %s5990_s29  ;;  %v4970_v5 = vcombine.low %v211_v2, %v212_v3  ;;  %v210_v6 = vld [vmem:[%s6184_s28 + $0x4] sm:$0xf] }
  0x19   : > { %181 = vst.msk [vmem:[#allocation2 + $0x40] sm:$0xff] %vm6068_vm2, %v5989_v1  ;;  %182 = vst.msk [vmem:[#allocation2 + $0x48] sm:$0xff] %vm6068_vm2, %v5989_v1  ;;  %500 = vrot.lane.b32.xlu0 %v209_v4, %s5990_s29  ;;  %v214_v7 = vld [vmem:[%s6184_s28 + $0x14] sm:$0xf]  ;;  %v4969_v8 = vcombine.low %v209_v4, %v210_v6  ;;  %v213_v9 = vld [vmem:[%s6184_s28 + $0x10] sm:$0xf] }
  0x1a   : > { %183 = vst.msk [vmem:[#allocation2 + $0x50] sm:$0xff] %vm6068_vm2, %v5989_v1  ;;  %184 = vst.msk [vmem:[#allocation2 + $0x58] sm:$0xff] %vm6068_vm2, %v5989_v1  ;;  %v216_v10 = vld [vmem:[%s6184_s28 + $0x1c] sm:$0xf]  ;;  %v215_v11 = vld [vmem:[%s6184_s28 + $0x18] sm:$0xf]  ;;  %v4971_v14 = vcombine.low %v213_v9, %v214_v7 }
  0x1b   : > { %185 = vst.msk [vmem:[#allocation2 + $0x60] sm:$0xff] %vm6068_vm2, %v5989_v1  ;;  %186 = vst.msk [vmem:[#allocation2 + $0x68] sm:$0xff] %vm6068_vm2, %v5989_v1  ;;  %v329_v12 = vshrl.u32 %v4970_v5, 16  ;;  %v332_v13 = vshll.u32 %v4970_v5, 16  ;;  %v4972_v15 = vcombine.low %v215_v11, %v216_v10  ;;  %v6197_v16 = vld [vmem:[%s6184_s28 + $0x24] sm:$0xf] }
  0x1c   : > { %187 = vst.msk [vmem:[#allocation2 + $0x70] sm:$0xff] %vm6068_vm2, %v5989_v1  ;;  %188 = vst.msk [vmem:[#allocation2 + $0x78] sm:$0xff] %vm6068_vm2, %v5989_v1  ;;  %v6200_v17 = vld [vmem:[%s6184_s28 + $0x20] sm:$0xf]  ;;  %v322_v18 = vshrl.u32 %v4969_v8, 16  ;;  %v325_v19 = vshll.u32 %v4969_v8, 16  ;;  %506 = vrot.lane.b32.xlu1 %v212_v3, %s5990_s29 }
  0x1d   : > { %189 = vst.msk [vmem:[#allocation2 + $0x80] sm:$0xff] %vm6068_vm2, %v5989_v1  ;;  %190 = vst.msk [vmem:[#allocation2 + $0x88] sm:$0xff] %vm6068_vm2, %v5989_v1  ;;  %v4973_v20 = vcombine.low %v6200_v17, %v6197_v16  ;;  %v331_v21 = vrot.slane %v329_v12, 7  ;;  %502 = vrot.lane.b32.xlu0 %v210_v6, %s5990_s29  ;;  %v336_v22 = vshrl.u32 %v4971_v14, 16  ;;  %v339_v23 = vshll.u32 %v4971_v14, 16 }
  0x1e   : > { %191 = vst.msk [vmem:[#allocation2 + $0x90] sm:$0xff] %vm6068_vm2, %v5989_v1  ;;  %192 = vst.msk [vmem:[#allocation2 + $0x98] sm:$0xff] %vm6068_vm2, %v5989_v1  ;;  %v343_v24 = vshrl.u32 %v4972_v15, 16  ;;  %v324_v26 = vrot.slane %v322_v18, 7  ;;  %v346_v27 = vshll.u32 %v4972_v15, 16 }
  0x1f   : > { %193 = vst.msk [vmem:[#allocation2 + $0xa0] sm:$0xff] %vm6068_vm2, %v5989_v1  ;;  %194 = vst.msk [vmem:[#allocation2 + $0xa8] sm:$0xff] %vm6068_vm2, %v5989_v1  ;;  %v350_v28 = vshrl.u32 %v4973_v20, 16  ;;  %v353_v29 = vshll.u32 %v4973_v20, 16  ;;  %v334_v30 = vor.u32 %v332_v13, %v331_v21  ;;  %v338_v32 = vrot.slane %v336_v22, 7 }
  0x20   : > { %195 = vst.msk [vmem:[#allocation2 + $0xb0] sm:$0xff] %vm6068_vm2, %v5989_v1  ;;  %196 = vst.msk [vmem:[#allocation2 + $0xb8] sm:$0xff] %vm6068_vm2, %v5989_v1  ;;  %v345_v33 = vrot.slane %v343_v24, 7  ;;  %v327_v35 = vor.u32 %v325_v19, %v324_v26  ;;  %510 = vrot.lane.b32.xlu1 %v214_v7, %s5990_s29  ;;  %v220_v49 = vld [vmem:[%s6184_s28 + $0x2c] sm:$0xf] }
  0x21   : > { %197 = vst.msk [vmem:[#allocation2 + $0xc0] sm:$0xff] %vm6068_vm2, %v5989_v1  ;;  %198 = vst.msk [vmem:[#allocation2 + $0xc8] sm:$0xff] %vm6068_vm2, %v5989_v1  ;;  %v352_v37 = vrot.slane %v350_v28, 7  ;;  %v341_v40 = vor.u32 %v339_v23, %v338_v32  ;;  %508 = vrot.lane.b32.xlu0 %v213_v9, %s5990_s29  ;;  %v219_v50 = vld [vmem:[%s6184_s28 + $0x28] sm:$0xf] }
  0x22   : > { %199 = vst.msk [vmem:[#allocation2 + $0xd0] sm:$0xff] %vm6068_vm2, %v5989_v1  ;;  %200 = vst.msk [vmem:[#allocation2 + $0xd8] sm:$0xff] %vm6068_vm2, %v5989_v1  ;;  %v348_v48 = vor.u32 %v346_v27, %v345_v33  ;;  %v6250_v55 = vld [vmem:[%s6184_s28 + $0x34] sm:$0xf]  ;;  %v6253_v56 = vld [vmem:[%s6184_s28 + $0x30] sm:$0xf]  ;;  %v4974_v3 = vcombine.low %v219_v50, %v220_v49 }
  0x23   : > { %201 = vst.msk [vmem:[#allocation2 + $0xe0] sm:$0xff] %vm6068_vm2, %v5989_v1  ;;  %202 = vst.msk [vmem:[#allocation2 + $0xe8] sm:$0xff] %vm6068_vm2, %v5989_v1  ;;  %v355_v54 = vor.u32 %v353_v29, %v352_v37  ;;  %v6256_v57 = vld [vmem:[%s6184_s28 + $0x3c] sm:$0xf]  ;;  %v6266_v62 = vld [vmem:[%s6184_s28 + $0x38] sm:$0xf]  ;;  %v4975_v7 = vcombine.low %v6253_v56, %v6250_v55 }
  0x24   : > { %203 = vst.msk [vmem:[#allocation2 + $0xf0] sm:$0xff] %vm6068_vm2, %v5989_v1  ;;  %204 = vst.msk [vmem:[#allocation2 + $0xf8] sm:$0xff] %vm6068_vm2, %v5989_v1  ;;  %514 = vrot.lane.b32.xlu1 %v216_v10, %s5990_s29  ;;  %v6281_v4 = vld [vmem:[%s6184_s28 + $0x44] sm:$0xf]  ;;  %v4976_v8 = vcombine.low %v6266_v62, %v6256_v57  ;;  %v6292_v9 = vld [vmem:[%s6184_s28 + $0x40] sm:$0xf] }
  0x25   : > { %205 = vst.msk [vmem:[#allocation2 + $0x100] sm:$0xff] %vm6068_vm2, %v5989_v1  ;;  %206 = vst.msk [vmem:[#allocation2 + $0x108] sm:$0xff] %vm6068_vm2, %v5989_v1  ;;  %512 = vrot.lane.b32.xlu0 %v215_v11, %s5990_s29  ;;  %v6295_v10 = vld [vmem:[%s6184_s28 + $0x4c] sm:$0xf]  ;;  %v357_v12 = vshrl.u32 %v4974_v3, 16  ;;  %v360_v13 = vshll.u32 %v4974_v3, 16  ;;  %v4977_v14 = vcombine.low %v6292_v9, %v6281_v4 }
  0x26   : > { %207 = vst.msk [vmem:[#allocation2 + $0x110] sm:$0xff] %vm6068_vm2, %v5989_v1  ;;  %208 = vst.msk [vmem:[#allocation2 + $0x118] sm:$0xff] %vm6068_vm2, %v5989_v1  ;;  %v6302_v15 = vld [vmem:[%s6184_s28 + $0x48] sm:$0xf]  ;;  %v364_v18 = vshrl.u32 %v4975_v7, 16  ;;  %v367_v19 = vshll.u32 %v4975_v7, 16 }
  0x27   : > { %vm6208_vm5 = vmand %vm465_vm3, %vm466_vm4  ;;  %v371_v20 = vshrl.u32 %v4976_v8, 16  ;;  %v6309_v22 = vld [vmem:[%s6184_s28 + $0x54] sm:$0xf]  ;;  %v359_v23 = vrot.slane %v357_v12, 7  ;;  %v378_v24 = vshrl.u32 %v4977_v14, 16  ;;  %v4978_v27 = vcombine.low %v6302_v15, %v6295_v10 }
  0x28   : > { %v485_v31 = vsel %vm6208_vm5, %v331_v21, 0  ;;  %v484_v36 = vsel %vm6208_vm5, %v324_v26, 0  ;;  %v6218_v38 = vsel %vm6208_vm5, 0, %v334_v30  ;;  %v486_v41 = vsel %vm6208_vm5, %v338_v32, 0  ;;  %518 = vrot.lane.b32.xlu1 %v6197_v16, %s5990_s29  ;;  %v6314_v28 = vld [vmem:[%s6184_s28 + $0x50] sm:$0xf]  ;;  %vm6440_vm9 = vmor %vm823_vm6, %vm824_vm7 }
  0x29   : > { %v5018_v34 = vcombine.low %v485_v31, %v485_v31  ;;  %v5017_v39 = vcombine.low %v484_v36, %v484_v36  ;;  %v6226_v42 = vcombine.high %v6218_v38, %v6218_v38  ;;  %v6230_v43 = vsel %vm6208_vm5, 0, %v327_v35  ;;  %516 = vrot.lane.b32.xlu0 %v6200_v17, %s5990_s29 }
  0x2a   : > { %v5019_v44 = vcombine.low %v486_v41, %v486_v41  ;;  %v6236_v46 = vcombine.high %v6230_v43, %v6230_v43  ;;  %v6245_v52 = vsel %vm6208_vm5, 0, %v341_v40  ;;  %v487_v53 = vsel %vm6208_vm5, %v345_v33, 0  ;;  %v6327_v40 = vld [vmem:[%s6184_s28 + $0x5c] sm:$0xf]  ;;  %v6330_v41 = vld [vmem:[%s6184_s28 + $0x58] sm:$0xf] }
  0x2b   : > { %v6232_v45 = vrot.slane %v5018_v34, 5  ;;  %v6238_v47 = vrot.slane %v5017_v39, 5  ;;  %v835_v51 = vrot.slane %v6226_v42, 5  ;;  %v5020_v60 = vcombine.low %v487_v53, %v487_v53 }
  0x2c   : > { %v828_v58 = vrot.slane %v6236_v46, 5  ;;  %v6259_v59 = vrot.slane %v5019_v44, 5  ;;  %v488_v61 = vsel %vm6208_vm5, %v352_v37, 0  ;;  %v6274_v0 = vsel %vm6208_vm5, 0, %v348_v48  ;;  %522 = vrot.lane.b32.xlu1 %v220_v49, %s5990_s29 }
  0x2d   : > { %v6270_v63 = vrot.slane %v835_v51, 4  ;;  %v6278_v2 = vsel %vm6208_vm5, 0, %v355_v54  ;;  %v5021_v6 = vcombine.low %v488_v61, %v488_v61  ;;  %v6297_v11 = vrot.slane %v5020_v60, 5  ;;  %520 = vrot.lane.b32.xlu0 %v219_v50, %s5990_s29 }
  0x2e   : > { %v6285_v5 = vrot.slane %v828_v58, 4  ;;  %v374_v21 = vshll.u32 %v4976_v8, 16  ;;  %v381_v26 = vshll.u32 %v4977_v14, 16  ;;  %v366_v29 = vrot.slane %v364_v18, 7 }
  0x2f   : > { %v6316_v16 = vrot.slane %v5021_v6, 5  ;;  %v373_v17 = vrot.slane %v371_v20, 7  ;;  %v4979_v30 = vcombine.low %v6314_v28, %v6309_v22  ;;  %v362_v31 = vor.u32 %v360_v13, %v359_v23 }
  0x30   : > { %v489_v32 = vsel %vm6208_vm5, %v359_v23, 0  ;;  %v380_v33 = vrot.slane %v378_v24, 7  ;;  %v385_v34 = vshrl.u32 %v4978_v27, 16  ;;  %v369_v36 = vor.u32 %v367_v19, %v366_v29  ;;  %526 = vrot.lane.b32.xlu1 %v6250_v55, %s5990_s29  ;;  %v6363_v19 = vld [vmem:[%s6184_s28 + $0x64] sm:$0xf] }
  0x31   : > { %v5022_v35 = vcombine.low %v489_v32, %v489_v32  ;;  %v490_v37 = vsel %vm6208_vm5, %v366_v29, 0  ;;  %v376_v39 = vor.u32 %v374_v21, %v373_v17  ;;  %v491_v48 = vsel %vm6208_vm5, %v373_v17, 0  ;;  %524 = vrot.lane.b32.xlu0 %v6253_v56, %s5990_s29  ;;  %v6368_v23 = vld [vmem:[%s6184_s28 + $0x60] sm:$0xf]  ;;  %v6373_v17 = vld [vmem:[%s6184_s28 + $0x6c] sm:$0xf] }
  0x32   : > { %v5023_v44 = vcombine.low %v490_v37, %v490_v37  ;;  %v383_v53 = vor.u32 %v381_v26, %v380_v33  ;;  %v4980_v49 = vcombine.low %v6330_v41, %v6327_v40  ;;  %v6338_v50 = vsel %vm6208_vm5, 0, %v362_v31  ;;  %v6376_v31 = vld [vmem:[%s6184_s28 + $0x68] sm:$0xf] }
  0x33   : > { %v6340_v54 = vrot.slane %v5022_v35, 5  ;;  %v6344_v60 = vsel %vm6208_vm5, 0, %v369_v36  ;;  %v5024_v61 = vcombine.low %v491_v48, %v491_v48  ;;  %v6350_v6 = vsel %vm6208_vm5, 0, %v376_v39  ;;  %v6385_v35 = vld [vmem:[%s6184_s28 + $0x74] sm:$0xf] }
  0x34   : > { %v6346_v3 = vrot.slane %v5023_v44, 5  ;;  %v492_v7 = vsel %vm6208_vm5, %v380_v33, 0  ;;  %v387_v8 = vrot.slane %v385_v34, 7  ;;  %v6360_v12 = vsel %vm6208_vm5, 0, %v383_v53  ;;  %v6388_v36 = vld [vmem:[%s6184_s28 + $0x70] sm:$0xf]  ;;  %530 = vrot.lane.b32.xlu1 %v6256_v57, %s5990_s29 }
  0x35   : > { %v5025_v13 = vcombine.low %v492_v7, %v492_v7  ;;  %v388_v14 = vshll.u32 %v4978_v27, 16  ;;  %v392_v18 = vshrl.u32 %v4979_v30, 16  ;;  %v395_v20 = vshll.u32 %v4979_v30, 16  ;;  %528 = vrot.lane.b32.xlu0 %v6266_v62, %s5990_s29 }
  0x36   : > { %v493_v55 = vsel %vm6208_vm5, %v387_v8, 0  ;;  %v399_v56 = vshrl.u32 %v4980_v49, 16  ;;  %v402_v21 = vshll.u32 %v4980_v49, 16  ;;  %v6370_v24 = vrot.slane %v5024_v61, 5 }
  0x37   : > { %v390_v26 = vor.u32 %v388_v14, %v387_v8  ;;  %v5026_v29 = vcombine.low %v493_v55, %v493_v55  ;;  %v394_v27 = vrot.slane %v392_v18, 7  ;;  %v6378_v32 = vrot.slane %v5025_v13, 5 }
  0x38   : > { %v401_v33 = vrot.slane %v399_v56, 7  ;;  %v4981_v34 = vcombine.low %v6368_v23, %v6363_v19  ;;  %v4982_v30 = vcombine.low %v6376_v31, %v6373_v17  ;;  %v4983_v48 = vcombine.low %v6388_v36, %v6385_v35  ;;  %v6413_v56 = vld [vmem:[%s6184_s28 + $0x7c] sm:$0xf]  ;;  %534 = vrot.lane.b32.xlu1 %v6281_v4, %s5990_s29 }
  0x39   : > { %v6396_v37 = vsel %vm6208_vm5, 0, %v390_v26  ;;  %v397_v39 = vor.u32 %v395_v20, %v394_v27  ;;  %v494_v44 = vsel %vm6208_vm5, %v394_v27, 0  ;;  %v6404_v62 = vrot.slane %v5026_v29, 5  ;;  %532 = vrot.lane.b32.xlu0 %v6292_v9, %s5990_s29 }
  0x3a   : > { %v5027_v53 = vcombine.low %v494_v44, %v494_v44  ;;  %v404_v49 = vor.u32 %v402_v21, %v401_v33  ;;  %v495_v57 = vsel %vm6208_vm5, %v401_v33, 0  ;;  %v406_v61 = vshrl.u32 %v4981_v34, 16  ;;  %v6424_v33 = vld [vmem:[%s6184_s28 + $0x78] sm:$0xf] }
  0x3b   : > { %v6408_v7 = vsel %vm6208_vm5, 0, %v397_v39  ;;  %v409_v8 = vshll.u32 %v4981_v34, 16  ;;  %v413_v13 = vshrl.u32 %v4982_v30, 16  ;;  %v5028_v18 = vcombine.low %v495_v57, %v495_v57 }
  0x3c   : > { %v6410_v14 = vrot.slane %v5027_v53, 5  ;;  %v408_v55 = vrot.slane %v406_v61, 7  ;;  %v416_v20 = vshll.u32 %v4982_v30, 16  ;;  %v6421_v21 = vsel %vm6208_vm5, 0, %v404_v49  ;;  %538 = vrot.lane.b32.xlu1 %v6295_v10, %s5990_s29 }
  0x3d   : > { %v415_v26 = vrot.slane %v413_v13, 7  ;;  %v420_v29 = vshrl.u32 %v4983_v48, 16  ;;  %v423_v27 = vshll.u32 %v4983_v48, 16  ;;  %v4984_v39 = vcombine.low %v6424_v33, %v6413_v56  ;;  %536 = vrot.lane.b32.xlu0 %v6302_v15, %s5990_s29 }
  0x3e   : > { %v411_v34 = vor.u32 %v409_v8, %v408_v55  ;;  %v496_v30 = vsel %vm6208_vm5, %v408_v55, 0  ;;  %v6432_v4 = vcombine.low %v6218_v38, %v6218_v38  ;;  %v6436_v48 = vrot.slane %v5028_v18, 5 }
  0x3f   : > { %v5029_v9 = vcombine.low %v496_v30, %v496_v30  ;;  %v418_v44 = vor.u32 %v416_v20, %v415_v26  ;;  %v497_v53 = vsel %vm6208_vm5, %v415_v26, 0  ;;  %v422_v49 = vrot.slane %v420_v29, 7 }
  0x40   : > { %v5030_v57 = vcombine.low %v497_v53, %v497_v53  ;;  %v427_v61 = vshrl.u32 %v4984_v39, 16  ;;  %v430_v8 = vshll.u32 %v4984_v39, 16  ;;  %v6450_v38 = vsel %vm6208_vm5, 0, %v411_v34  ;;  %542 = vrot.lane.b32.xlu1 %v6309_v22, %s5990_s29 }
  0x41   : > { %v6452_v18 = vrot.slane %v5029_v9, 5  ;;  %v425_v55 = vor.u32 %v423_v27, %v422_v49  ;;  %v498_v20 = vsel %vm6208_vm5, %v422_v49, 0  ;;  %v6458_v26 = vsel %vm6208_vm5, 0, %v418_v44  ;;  %540 = vrot.lane.b32.xlu0 %v6314_v28, %s5990_s29 }
  0x42   : > { %v5031_v29 = vcombine.low %v498_v20, %v498_v20  ;;  %v429_v30 = vrot.slane %v427_v61, 7  ;;  %v5034_v10 = vrot.slane %v6432_v4, 9  ;;  %v6461_v39 = vrot.slane %v5030_v57, 5 }
  0x43   : > { %v6465_v15 = vcombine.low %v6230_v43, %v6230_v43  ;;  %v839_v27 = vsel %vm6440_vm9, %v6270_v63, %v6232_v45  ;;  %v832_v34 = vsel %vm6440_vm9, %v6285_v5, %v6238_v47  ;;  %v6477_v9 = vsel %vm6208_vm5, 0, %v425_v55 }
  0x44   : > { %v432_v44 = vor.u32 %v430_v8, %v429_v30  ;;  %v6481_v53 = vsel %vm6208_vm5, %v429_v30, 0  ;;  %v836_v43 = vsel %vm6440_vm9, %v5034_v10, %v835_v51  ;;  %973 = vst.msk [vmem:[#allocation2 + $0x2c] sm:$0xf] %vm742_vm8, %v839_v27  ;;  %971 = vst.msk [vmem:[#allocation2 + $0x1c] sm:$0xf] %vm742_vm8, %v832_v34  ;;  %v6493_v45 = vrot.slane %v5031_v29, 5  ;;  %546 = vrot.lane.b32.xlu1 %v6327_v40, %s5990_s29 }
  0x45   : > { %972 = vst.msk [vmem:[#allocation2 + $0x24] sm:$0xf] %vm742_vm8, %v836_v43  ;;  %v5033_v47 = vrot.slane %v6465_v15, 9  ;;  %v6499_v63 = vcombine.high %v6245_v52, %v6245_v52  ;;  %v6503_v51 = vcombine.low %v6245_v52, %v6245_v52  ;;  %v5032_v5 = vcombine.low %v6481_v53, %v6481_v53  ;;  %544 = vrot.lane.b32.xlu0 %v6330_v41, %s5990_s29 }
  0x46   : > { %v6509_v22 = vcombine.high %v6274_v0, %v6274_v0  ;;  %v6513_v28 = vcombine.low %v6274_v0, %v6274_v0  ;;  %v6517_v49 = vcombine.high %v6278_v2, %v6278_v2  ;;  %v6521_v57 = vsel %vm6208_vm5, 0, %v432_v44 }
  0x47   : > { %v829_v52 = vsel %vm6440_vm9, %v5033_v47, %v828_v58  ;;  %v842_v61 = vrot.slane %v6499_v63, 5  ;;  %v5035_v8 = vrot.slane %v6503_v51, 9  ;;  %v6535_v29 = vcombine.low %v6278_v2, %v6278_v2 }
  0x48   : > { %970 = vst.msk [vmem:[#allocation2 + $0x14] sm:$0xf] %vm742_vm8, %v829_v52  ;;  %v849_v0 = vrot.slane %v6509_v22, 5  ;;  %v5036_v55 = vrot.slane %v6513_v28, 9  ;;  %v856_v20 = vrot.slane %v6517_v49, 5  ;;  %v6545_v10 = vcombine.high %v6338_v50, %v6338_v50  ;;  %550 = vrot.lane.b32.xlu1 %v6363_v19, %s5990_s29 }
  0x49   : > { %v844_v58 = vrot.slane %v842_v61, 4  ;;  %v843_v30 = vsel %vm6440_vm9, %v5035_v8, %v842_v61  ;;  %v6549_v27 = vcombine.low %v6338_v50, %v6338_v50  ;;  %v5037_v34 = vrot.slane %v6535_v29, 9  ;;  %548 = vrot.lane.b32.xlu0 %v6368_v23, %s5990_s29 }
  0x4a   : > { %974 = vst.msk [vmem:[#allocation2 + $0x34] sm:$0xf] %vm742_vm8, %v843_v30  ;;  %v851_v2 = vrot.slane %v849_v0, 4  ;;  %v850_v40 = vsel %vm6440_vm9, %v5036_v55, %v849_v0  ;;  %v858_v41 = vrot.slane %v856_v20, 4  ;;  %v863_v43 = vrot.slane %v6545_v10, 5 }
  0x4b   : > { %v846_v44 = vsel %vm6440_vm9, %v844_v58, %v6259_v59  ;;  %976 = vst.msk [vmem:[#allocation2 + $0x44] sm:$0xf] %vm742_vm8, %v850_v40  ;;  %v5038_v50 = vrot.slane %v6549_v27, 9  ;;  %v6563_v47 = vcombine.high %v6344_v60, %v6344_v60  ;;  %v857_v61 = vsel %vm6440_vm9, %v5037_v34, %v856_v20 }
  0x4c   : > { %975 = vst.msk [vmem:[#allocation2 + $0x3c] sm:$0xf] %vm742_vm8, %v846_v44  ;;  %v853_v52 = vsel %vm6440_vm9, %v851_v2, %v6297_v11  ;;  %v860_v59 = vsel %vm6440_vm9, %v858_v41, %v6316_v16  ;;  %v6577_v8 = vcombine.low %v6344_v60, %v6344_v60  ;;  %978 = vst.msk [vmem:[#allocation2 + $0x54] sm:$0xf] %vm742_vm8, %v857_v61  ;;  %v865_v11 = vrot.slane %v863_v43, 4 }
  0x4d   : > { %977 = vst.msk [vmem:[#allocation2 + $0x4c] sm:$0xf] %vm742_vm8, %v853_v52  ;;  %979 = vst.msk [vmem:[#allocation2 + $0x5c] sm:$0xf] %vm742_vm8, %v860_v59  ;;  %v864_v16 = vsel %vm6440_vm9, %v5038_v50, %v863_v43  ;;  %v870_v60 = vrot.slane %v6563_v47, 5  ;;  %v6595_v0 = vcombine.high %v6350_v6, %v6350_v6  ;;  %v6601_v23 = vcombine.low %v6350_v6, %v6350_v6 }
  0x4e   : > { %980 = vst.msk [vmem:[#allocation2 + $0x64] sm:$0xf] %vm742_vm8, %v864_v16  ;;  %v5039_v19 = vrot.slane %v6577_v8, 9  ;;  %v6605_v55 = vcombine.high %v6360_v12, %v6360_v12  ;;  %v6609_v20 = vcombine.low %v6360_v12, %v6360_v12  ;;  %v867_v58 = vsel %vm6440_vm9, %v865_v11, %v6340_v54  ;;  %554 = vrot.lane.b32.xlu1 %v6373_v17, %s5990_s29 }
  0x4f   : > { %v872_v30 = vrot.slane %v870_v60, 4  ;;  %v877_v2 = vrot.slane %v6595_v0, 5  ;;  %v6617_v40 = vcombine.high %v6396_v37, %v6396_v37  ;;  %981 = vst.msk [vmem:[#allocation2 + $0x6c] sm:$0xf] %vm742_vm8, %v867_v58  ;;  %v5040_v41 = vrot.slane %v6601_v23, 9  ;;  %552 = vrot.lane.b32.xlu0 %v6376_v31, %s5990_s29 }
  0x50   : > { %v871_v6 = vsel %vm6440_vm9, %v5039_v19, %v870_v60  ;;  %v884_v12 = vrot.slane %v6605_v55, 5  ;;  %v5041_v34 = vrot.slane %v6609_v20, 9  ;;  %v6636_v50 = vcombine.low %v6396_v37, %v6396_v37 }
  0x51   : > { %v874_v54 = vsel %vm6440_vm9, %v872_v30, %v6346_v3  ;;  %982 = vst.msk [vmem:[#allocation2 + $0x74] sm:$0xf] %vm742_vm8, %v871_v6  ;;  %v879_v44 = vrot.slane %v877_v2, 4  ;;  %v891_v43 = vrot.slane %v6617_v40, 5  ;;  %v878_v17 = vsel %vm6440_vm9, %v5040_v41, %v877_v2 }
  0x52   : > { %983 = vst.msk [vmem:[#allocation2 + $0x7c] sm:$0xf] %vm742_vm8, %v874_v54  ;;  %v886_v52 = vrot.slane %v884_v12, 4  ;;  %v885_v31 = vsel %vm6440_vm9, %v5041_v34, %v884_v12  ;;  %v6645_v3 = vcombine.high %v6408_v7, %v6408_v7  ;;  %984 = vst.msk [vmem:[#allocation2 + $0x84] sm:$0xf] %vm742_vm8, %v878_v17  ;;  %v5042_v61 = vrot.slane %v6636_v50, 9  ;;  %558 = vrot.lane.b32.xlu1 %v6385_v35, %s5990_s29 }
  0x53   : > { %v881_v59 = vsel %vm6440_vm9, %v879_v44, %v6370_v24  ;;  %986 = vst.msk [vmem:[#allocation2 + $0x94] sm:$0xf] %vm742_vm8, %v885_v31  ;;  %v893_v37 = vrot.slane %v891_v43, 4  ;;  %v6655_v11 = vcombine.low %v6408_v7, %v6408_v7  ;;  %v6664_v24 = vcombine.high %v6421_v21, %v6421_v21  ;;  %556 = vrot.lane.b32.xlu0 %v6388_v36, %s5990_s29 }
  0x54   : > { %985 = vst.msk [vmem:[#allocation2 + $0x8c] sm:$0xf] %vm742_vm8, %v881_v59  ;;  %v888_v16 = vsel %vm6440_vm9, %v886_v52, %v6378_v32  ;;  %v898_v60 = vrot.slane %v6645_v3, 5  ;;  %v6668_v19 = vcombine.low %v6421_v21, %v6421_v21  ;;  %v892_v7 = vsel %vm6440_vm9, %v5042_v61, %v891_v43 }
  0x55   : > { %987 = vst.msk [vmem:[#allocation2 + $0x9c] sm:$0xf] %vm742_vm8, %v888_v16  ;;  %v895_v32 = vsel %vm6440_vm9, %v893_v37, %v6404_v62  ;;  %v5043_v58 = vrot.slane %v6655_v11, 9  ;;  %v6683_v21 = vcombine.high %v6450_v38, %v6450_v38  ;;  %988 = vst.msk [vmem:[#allocation2 + $0xa4] sm:$0xf] %vm742_vm8, %v892_v7  ;;  %v905_v36 = vrot.slane %v6664_v24, 5 }
  0x56   : > { %989 = vst.msk [vmem:[#allocation2 + $0xac] sm:$0xf] %vm742_vm8, %v895_v32  ;;  %v900_v35 = vrot.slane %v898_v60, 4  ;;  %v5044_v30 = vrot.slane %v6668_v19, 9  ;;  %v6691_v62 = vcombine.low %v6450_v38, %v6450_v38  ;;  %v6698_v41 = vcombine.high %v6458_v26, %v6458_v26  ;;  %562 = vrot.lane.b32.xlu1 %v6413_v56, %s5990_s29 }
  0x57   : > { %v899_v2 = vsel %vm6440_vm9, %v5043_v58, %v898_v60  ;;  %v912_v6 = vrot.slane %v6683_v21, 5  ;;  %v6702_v12 = vcombine.low %v6458_v26, %v6458_v26  ;;  %v907_v38 = vrot.slane %v905_v36, 4  ;;  %560 = vrot.lane.b32.xlu0 %v6424_v33, %s5990_s29 }
  0x58   : > { %v902_v34 = vsel %vm6440_vm9, %v900_v35, %v6410_v14  ;;  %990 = vst.msk [vmem:[#allocation2 + $0xb4] sm:$0xf] %vm742_vm8, %v899_v2  ;;  %v906_v54 = vsel %vm6440_vm9, %v5044_v30, %v905_v36  ;;  %v5045_v44 = vrot.slane %v6691_v62, 9  ;;  %v919_v14 = vrot.slane %v6698_v41, 5 }
  0x59   : > { %991 = vst.msk [vmem:[#allocation2 + $0xbc] sm:$0xf] %vm742_vm8, %v902_v34  ;;  %992 = vst.msk [vmem:[#allocation2 + $0xc4] sm:$0xf] %vm742_vm8, %v906_v54  ;;  %v914_v26 = vrot.slane %v912_v6, 4  ;;  %v5046_v43 = vrot.slane %v6702_v12, 9  ;;  %v6721_v17 = vcombine.high %v6477_v9, %v6477_v9  ;;  %v909_v56 = vsel %vm6440_vm9, %v907_v38, %v6436_v48 }
  0x5a   : > { %v913_v33 = vsel %vm6440_vm9, %v5045_v44, %v912_v6  ;;  %v6730_v52 = vcombine.low %v6477_v9, %v6477_v9  ;;  %v6734_v31 = vcombine.high %v6521_v57, %v6521_v57  ;;  %993 = vst.msk [vmem:[#allocation2 + $0xcc] sm:$0xf] %vm742_vm8, %v909_v56  ;;  %v921_v48 = vrot.slane %v919_v14, 4 }
  0x5b   : > { %v916_v59 = vsel %vm6440_vm9, %v914_v26, %v6452_v18  ;;  %994 = vst.msk [vmem:[#allocation2 + $0xd4] sm:$0xf] %vm742_vm8, %v913_v33  ;;  %v920_v37 = vsel %vm6440_vm9, %v5046_v43, %v919_v14  ;;  %v926_v61 = vrot.slane %v6721_v17, 5  ;;  %v936_v9 = vrot.slane %v5032_v5, 5 }
  0x5c   : > { %995 = vst.msk [vmem:[#allocation2 + $0xdc] sm:$0xf] %vm742_vm8, %v916_v59  ;;  %996 = vst.msk [vmem:[#allocation2 + $0xe4] sm:$0xf] %vm742_vm8, %v920_v37  ;;  %v5047_v16 = vrot.slane %v6730_v52, 9  ;;  %v933_v18 = vrot.slane %v6734_v31, 5  ;;  %v6753_v60 = vcombine.low %v6521_v57, %v6521_v57  ;;  %v923_v32 = vsel %vm6440_vm9, %v921_v48, %v6461_v39 }
  0x5d   : > { %v928_v7 = vrot.slane %v926_v61, 4  ;;  %997 = vst.msk [vmem:[#allocation2 + $0xec] sm:$0xf] %vm742_vm8, %v923_v32 }
  0x5e   : > { %v927_v53 = vsel %vm6440_vm9, %v5047_v16, %v926_v61  ;;  %v935_v5 = vrot.slane %v933_v18, 4  ;;  %v5048_v58 = vrot.slane %v6753_v60, 9 }
  0x5f   : > { %v930_v35 = vsel %vm6440_vm9, %v928_v7, %v6493_v45  ;;  %998 = vst.msk [vmem:[#allocation2 + $0xf4] sm:$0xf] %vm742_vm8, %v927_v53 }
  0x60   : > { %999 = vst.msk [vmem:[#allocation2 + $0xfc] sm:$0xf] %vm742_vm8, %v930_v35  ;;  %v937_v39 = vsel %vm6440_vm9, %v935_v5, %v936_v9  ;;  %v934_v57 = vsel %vm6440_vm9, %v5048_v58, %v933_v18 }
  0x61   : > { %1001 = vst.msk [vmem:[#allocation2 + $0x10c] sm:$0xf] %vm742_vm8, %v937_v39  ;;  %1000 = vst.msk [vmem:[#allocation2 + $0x104] sm:$0xf] %vm742_vm8, %v934_v57 }
  0x8a   : > { %v505_v36 = vpop.permute.xlu1 %504 }
  0x8b   : > { %v501_v30 = vpop.permute.xlu0 %500  ;;  %600 = vst.msk [vmem:[#allocation2 + $0x20] sm:$0xf] %vm597_vm10, %v505_v36 }
  0x8c   : > { %598 = vst.msk [vmem:[#allocation2 + $0x10] sm:$0xf] %vm597_vm10, %v501_v30 }
  0x8d   : > { %745 = vst.msk [vmem:[#allocation2 + $0x20] sm:$0xf] %vm742_vm8, %v6432_v4  ;;  %743 = vst.msk [vmem:[#allocation2 + $0x10] sm:$0xf] %vm742_vm8, %v6465_v15 }
  0x8e   : > { %v507_v45 = vpop.permute.xlu1 %506 }
  0x8f   : > { %v503_v2 = vpop.permute.xlu0 %502  ;;  %601 = vst.msk [vmem:[#allocation2 + $0x28] sm:$0xf] %vm597_vm10, %v507_v45 }
  0x90   : > { %599 = vst.msk [vmem:[#allocation2 + $0x18] sm:$0xf] %vm597_vm10, %v503_v2 }
  0x91   : > { %746 = vst.msk [vmem:[#allocation2 + $0x28] sm:$0xf] %vm742_vm8, %v6226_v42  ;;  %744 = vst.msk [vmem:[#allocation2 + $0x18] sm:$0xf] %vm742_vm8, %v6236_v46 }
  0x92   : > { %v511_v6 = vpop.permute.xlu1 %510 }
  0x93   : > { %v509_v34 = vpop.permute.xlu0 %508  ;;  %603 = vst.msk [vmem:[#allocation2 + $0x38] sm:$0xf] %vm597_vm10, %v511_v6 }
  0x94   : > { %602 = vst.msk [vmem:[#allocation2 + $0x30] sm:$0xf] %vm597_vm10, %v509_v34 }
  0x95   : > { %748 = vst.msk [vmem:[#allocation2 + $0x38] sm:$0xf] %vm742_vm8, %v6499_v63  ;;  %747 = vst.msk [vmem:[#allocation2 + $0x30] sm:$0xf] %vm742_vm8, %v6503_v51 }
  0x96   : > { %v515_v4 = vpop.permute.xlu1 %514 }
  0x97   : > { %v513_v15 = vpop.permute.xlu0 %512  ;;  %605 = vst.msk [vmem:[#allocation2 + $0x48] sm:$0xf] %vm597_vm10, %v515_v4 }
  0x98   : > { %604 = vst.msk [vmem:[#allocation2 + $0x40] sm:$0xf] %vm597_vm10, %v513_v15 }
  0x99   : > { %750 = vst.msk [vmem:[#allocation2 + $0x48] sm:$0xf] %vm742_vm8, %v6509_v22  ;;  %749 = vst.msk [vmem:[#allocation2 + $0x40] sm:$0xf] %vm742_vm8, %v6513_v28 }
  0x9a   : > { %v519_v42 = vpop.permute.xlu1 %518 }
  0x9b   : > { %v517_v46 = vpop.permute.xlu0 %516  ;;  %607 = vst.msk [vmem:[#allocation2 + $0x58] sm:$0xf] %vm597_vm10, %v519_v42 }
  0x9c   : > { %606 = vst.msk [vmem:[#allocation2 + $0x50] sm:$0xf] %vm597_vm10, %v517_v46 }
  0x9d   : > { %752 = vst.msk [vmem:[#allocation2 + $0x58] sm:$0xf] %vm742_vm8, %v6517_v49  ;;  %751 = vst.msk [vmem:[#allocation2 + $0x50] sm:$0xf] %vm742_vm8, %v6535_v29 }
  0x9e   : > { %v523_v63 = vpop.permute.xlu1 %522 }
  0x9f   : > { %v521_v51 = vpop.permute.xlu0 %520  ;;  %609 = vst.msk [vmem:[#allocation2 + $0x68] sm:$0xf] %vm597_vm10, %v523_v63 }
  0xa0   : > { %608 = vst.msk [vmem:[#allocation2 + $0x60] sm:$0xf] %vm597_vm10, %v521_v51 }
  0xa1   : > { %754 = vst.msk [vmem:[#allocation2 + $0x68] sm:$0xf] %vm742_vm8, %v6545_v10  ;;  %753 = vst.msk [vmem:[#allocation2 + $0x60] sm:$0xf] %vm742_vm8, %v6549_v27 }
  0xa2   : > { %v527_v22 = vpop.permute.xlu1 %526 }
  0xa3   : > { %v525_v28 = vpop.permute.xlu0 %524  ;;  %611 = vst.msk [vmem:[#allocation2 + $0x78] sm:$0xf] %vm597_vm10, %v527_v22 }
  0xa4   : > { %610 = vst.msk [vmem:[#allocation2 + $0x70] sm:$0xf] %vm597_vm10, %v525_v28 }
  0xa5   : > { %756 = vst.msk [vmem:[#allocation2 + $0x78] sm:$0xf] %vm742_vm8, %v6563_v47  ;;  %755 = vst.msk [vmem:[#allocation2 + $0x70] sm:$0xf] %vm742_vm8, %v6577_v8 }
  0xa6   : > { %v531_v49 = vpop.permute.xlu1 %530 }
  0xa7   : > { %v529_v29 = vpop.permute.xlu0 %528  ;;  %613 = vst.msk [vmem:[#allocation2 + $0x88] sm:$0xf] %vm597_vm10, %v531_v49 }
  0xa8   : > { %612 = vst.msk [vmem:[#allocation2 + $0x80] sm:$0xf] %vm597_vm10, %v529_v29 }
  0xa9   : > { %758 = vst.msk [vmem:[#allocation2 + $0x88] sm:$0xf] %vm742_vm8, %v6595_v0  ;;  %757 = vst.msk [vmem:[#allocation2 + $0x80] sm:$0xf] %vm742_vm8, %v6601_v23 }
  0xaa   : > { %v535_v10 = vpop.permute.xlu1 %534 }
  0xab   : > { %v533_v27 = vpop.permute.xlu0 %532  ;;  %615 = vst.msk [vmem:[#allocation2 + $0x98] sm:$0xf] %vm597_vm10, %v535_v10 }
  0xac   : > { %614 = vst.msk [vmem:[#allocation2 + $0x90] sm:$0xf] %vm597_vm10, %v533_v27 }
  0xad   : > { %760 = vst.msk [vmem:[#allocation2 + $0x98] sm:$0xf] %vm742_vm8, %v6605_v55  ;;  %759 = vst.msk [vmem:[#allocation2 + $0x90] sm:$0xf] %vm742_vm8, %v6609_v20 }
  0xae   : > { %v539_v47 = vpop.permute.xlu1 %538 }
  0xaf   : > { %v537_v8 = vpop.permute.xlu0 %536  ;;  %617 = vst.msk [vmem:[#allocation2 + $0xa8] sm:$0xf] %vm597_vm10, %v539_v47 }
  0xb0   : > { %616 = vst.msk [vmem:[#allocation2 + $0xa0] sm:$0xf] %vm597_vm10, %v537_v8 }
  0xb1   : > { %762 = vst.msk [vmem:[#allocation2 + $0xa8] sm:$0xf] %vm742_vm8, %v6617_v40  ;;  %761 = vst.msk [vmem:[#allocation2 + $0xa0] sm:$0xf] %vm742_vm8, %v6636_v50 }
  0xb2   : > { %v543_v0 = vpop.permute.xlu1 %542 }
  0xb3   : > { %v541_v23 = vpop.permute.xlu0 %540  ;;  %619 = vst.msk [vmem:[#allocation2 + $0xb8] sm:$0xf] %vm597_vm10, %v543_v0 }
  0xb4   : > { %618 = vst.msk [vmem:[#allocation2 + $0xb0] sm:$0xf] %vm597_vm10, %v541_v23 }
  0xb5   : > { %764 = vst.msk [vmem:[#allocation2 + $0xb8] sm:$0xf] %vm742_vm8, %v6645_v3  ;;  %763 = vst.msk [vmem:[#allocation2 + $0xb0] sm:$0xf] %vm742_vm8, %v6655_v11 }
  0xb6   : > { %v547_v55 = vpop.permute.xlu1 %546 }
  0xb7   : > { %v545_v20 = vpop.permute.xlu0 %544  ;;  %621 = vst.msk [vmem:[#allocation2 + $0xc8] sm:$0xf] %vm597_vm10, %v547_v55 }
  0xb8   : > { %620 = vst.msk [vmem:[#allocation2 + $0xc0] sm:$0xf] %vm597_vm10, %v545_v20 }
  0xb9   : > { %766 = vst.msk [vmem:[#allocation2 + $0xc8] sm:$0xf] %vm742_vm8, %v6664_v24  ;;  %765 = vst.msk [vmem:[#allocation2 + $0xc0] sm:$0xf] %vm742_vm8, %v6668_v19 }
  0xba   : > { %v551_v40 = vpop.permute.xlu1 %550 }
  0xbb   : > { %v549_v50 = vpop.permute.xlu0 %548  ;;  %623 = vst.msk [vmem:[#allocation2 + $0xd8] sm:$0xf] %vm597_vm10, %v551_v40 }
  0xbc   : > { %622 = vst.msk [vmem:[#allocation2 + $0xd0] sm:$0xf] %vm597_vm10, %v549_v50 }
  0xbd   : > { %768 = vst.msk [vmem:[#allocation2 + $0xd8] sm:$0xf] %vm742_vm8, %v6683_v21  ;;  %767 = vst.msk [vmem:[#allocation2 + $0xd0] sm:$0xf] %vm742_vm8, %v6691_v62 }
  0xc0   : > { %v555_v3 = vpop.permute.xlu1 %554 }
  0xc1   : > { %v553_v11 = vpop.permute.xlu0 %552  ;;  %625 = vst.msk [vmem:[#allocation2 + $0xe8] sm:$0xf] %vm597_vm10, %v555_v3 }
  0xc2   : > { %624 = vst.msk [vmem:[#allocation2 + $0xe0] sm:$0xf] %vm597_vm10, %v553_v11 }
  0xc3   : > { %770 = vst.msk [vmem:[#allocation2 + $0xe8] sm:$0xf] %vm742_vm8, %v6698_v41  ;;  %769 = vst.msk [vmem:[#allocation2 + $0xe0] sm:$0xf] %vm742_vm8, %v6702_v12 }
  0xc4   : > { %v559_v24 = vpop.permute.xlu1 %558 }
  0xc5   : > { %v557_v19 = vpop.permute.xlu0 %556  ;;  %627 = vst.msk [vmem:[#allocation2 + $0xf8] sm:$0xf] %vm597_vm10, %v559_v24 }
  0xc6   : > { %626 = vst.msk [vmem:[#allocation2 + $0xf0] sm:$0xf] %vm597_vm10, %v557_v19 }
  0xc7   : > { %772 = vst.msk [vmem:[#allocation2 + $0xf8] sm:$0xf] %vm742_vm8, %v6721_v17  ;;  %771 = vst.msk [vmem:[#allocation2 + $0xf0] sm:$0xf] %vm742_vm8, %v6730_v52 }
  0xc8   : > { %v563_v21 = vpop.permute.xlu1 %562 }
  0xc9   : > { %v561_v62 = vpop.permute.xlu0 %560  ;;  %629 = vst.msk [vmem:[#allocation2 + $0x108] sm:$0xf] %vm597_vm10, %v563_v21 }
  0xca   : > { %628 = vst.msk [vmem:[#allocation2 + $0x100] sm:$0xf] %vm597_vm10, %v561_v62 }
  0xcb   : > { %774 = vst.msk [vmem:[#allocation2 + $0x108] sm:$0xf] %vm742_vm8, %v6734_v31  ;;  %773 = vst.msk [vmem:[#allocation2 + $0x100] sm:$0xf] %vm742_vm8, %v6753_v60 }
  0xcc LB: >> { %v6877_v41 = vld [vmem:[#allocation2 + $0x14] ss:$8 sps:$4 sm:$0xff]   ;;  %vm1365_vm11 = vcmask 523264   ;;  %v5991_v12 = vmov 0   ;;  %s5587_s7 = smul.u32 288, %s5987_s6  ;;  %s7214_s19 = scalar_lea.vmem %s8253_s2, %s5987_s6  ;;  %s5987_s6 = sphi %s6872_s6, %s1007_s6  }
  0xcd   : >> { %1414 = vmatprep.subr.bf16.mxu0 %v5991_v12  ;;  %5621 = vmatprep.subr.bf16.mxu1 %v5991_v12  ;;  %v6881_v38 = vld [vmem:[#allocation2 + $0x94] ss:$8 sps:$4 sm:$0xff]   ;;  %v6927_v37 = vld [vmem:[#allocation2 + $0x10] ss:$8 sps:$4 sm:$0xff]   ;;  %v6935_v18 = vld [vmem:[#allocation2 + $0x24] ss:$8 sps:$4 sm:$0xff]  }
  0xce   : >> { %5094 = vmatprep.mubr.msk.bf16.mxu0 %vm1365_vm11, %v6877_v41  ;;  %5102 = vmatprep.mubr.msk.bf16.mxu1 %vm1365_vm11, %v6881_v38  ;;  %s6891_s10 = scalar_lea.vmem %s8252_s1, %s5587_s7  ;;  %v6929_v61 = vld [vmem:[#allocation2 + $0x90] ss:$8 sps:$4 sm:$0xff]   ;;  %v6937_v60 = vld [vmem:[#allocation2 + $0xa4] ss:$8 sps:$4 sm:$0xff]   ;;  %v6949_v53 = vld [vmem:[#allocation2 + $0x20] ss:$8 sps:$4 sm:$0xff]  }
  0xcf   : >> { %v5738_v54 = vld [vmem:[%s6891_s10 + $0x98] sm:$0xff]   ;;  %v5739_v44 = vld [vmem:[%s6891_s10 + $0x90] sm:$0xff]   ;;  %v5740_v26 = vld [vmem:[%s6891_s10 + $0x88] sm:$0xff]   ;;  %s5992_s20 = smov 64   ;;  %s1007_s6 = sadd.s32 1, %s5987_s6  }
  0xd0   : >> { %1415 = vmatpush1.bf16.msra.mxu0 %v5738_v54  ;;  %5633 = vmatpush1.bf16.msra.mxu1 %v5738_v54  ;;  %v5741_v14 = vld [vmem:[%s6891_s10 + $0x80] sm:$0xff]   ;;  %v5742_v43 = vld [vmem:[%s6891_s10 + $0x78] sm:$0xff]   ;;  %v5743_v17 = vld [vmem:[%s6891_s10 + $0x70] sm:$0xff]   ;;  %p1004_p11 = scmp.ge.s32.totalorder %s1007_s6, 19  }
  0xd1   : >> { %1416 = vmatprep.subr.bf16.mxu0 %v5991_v12  ;;  %5622 = vmatprep.subr.bf16.mxu1 %v5991_v12  ;;  %v5744_v56 = vld [vmem:[%s6891_s10 + $0x68] sm:$0xff]   ;;  %v5745_v33 = vld [vmem:[%s6891_s10 + $0x60] sm:$0xff]   ;;  %v5746_v52 = vld [vmem:[%s6891_s10 + $0xb8] sm:$0xff]   ;;  %s5620_s9 = sshll.u32 (%p1004_p11), %s6037_s16, 12  ;;  %s8211_s16 = scalar_lea.sflag (%p1004_p11), [#allocation4], %s161_s30 }
  0xd2   : >> { %v5747_v31 = vld [vmem:[%s6891_s10 + $0xb0] sm:$0xff]   ;;  %v5748_v59 = vld [vmem:[%s6891_s10 + $0xa8] sm:$0xff]   ;;  %v5749_v48 = vld [vmem:[%s6891_s10 + $0xa0] sm:$0xff]   ;;  %s5993_s24 = smov (%p1004_p11), [#allocation3]  }
  0xd3   : >> { %v5756_v9 = vld [vmem:[%s6891_s10 + $0x38] sm:$0xff]   ;;  %v5762_v32 = vld [vmem:[%s6891_s10 + $0x30] sm:$0xff]   ;;  %v6951_v5 = vld [vmem:[#allocation2 + $0xa0] ss:$8 sps:$4 sm:$0xff]   ;;  %s5923_s25 = sshll.u32 (%p1004_p11), %s5993_s24, 4  ;;  %s5924_s25 = int_to_ptr.vmem [resolvable:$false] %s5923_s25 }
  0xd4   : >> { %1417 = vmatpush1.bf16.msra.mxu0 %v5739_v44  ;;  %5634 = vmatpush1.bf16.msra.mxu1 %v5739_v44  ;;  %v5757_v16 = vld [vmem:[%s6891_s10 + $0xf8] sm:$0xff]   ;;  %v5765_v7 = vld [vmem:[%s6891_s10 + $0xf0] sm:$0xff]   ;;  %v5766_v58 = vld [vmem:[%s6891_s10 + $0x28] sm:$0xff]   ;;  %s5925_s26 = scalar_lea.vmem (%p1004_p11), %s5924_s25, 8192 }
  0xd5   : >> { %1418 = vmatprep.subr.bf16.mxu0 %v5991_v12  ;;  %5623 = vmatprep.subr.bf16.mxu1 %v5991_v12  ;;  %v5767_v35 = vld [vmem:[%s6891_s10 + $0xe8] sm:$0xff]   ;;  %v6957_v39 = vld [vmem:[#allocation2 + $0x34] ss:$8 sps:$4 sm:$0xff]   ;;  %v5774_v36 = vld [vmem:[%s6891_s10 + $0x20] sm:$0xff]  }
  0xd6   : >> { %v6959_v57 = vld [vmem:[#allocation2 + $0xb4] ss:$8 sps:$4 sm:$0xff]   ;;  %v5775_v30 = vld [vmem:[%s6891_s10 + $0xe0] sm:$0xff]   ;;  %v6971_v45 = vld [vmem:[#allocation2 + $0x30] ss:$8 sps:$4 sm:$0xff]  }
  0xd7   : >> { %v6973_v2 = vld [vmem:[#allocation2 + $0xb0] ss:$8 sps:$4 sm:$0xff]   ;;  %v6975_v6 = vld [vmem:[#allocation2 + $0x44] ss:$8 sps:$4 sm:$0xff]   ;;  %v6993_v63 = vld [vmem:[#allocation2 + $0x40] ss:$8 sps:$4 sm:$0xff]  }
  0xd8   : >> { %1419 = vmatpush1.bf16.msra.mxu0 %v5740_v26  ;;  %5635 = vmatpush1.bf16.msra.mxu1 %v5740_v26  ;;  %v6977_v34 = vld [vmem:[#allocation2 + $0xc4] ss:$8 sps:$4 sm:$0xff]   ;;  %v5780_v4 = vld [vmem:[%s6891_s10 + $0x18] sm:$0xff]   ;;  %v5784_v42 = vld [vmem:[%s6891_s10 + $0x10] sm:$0xff]  }
  0xd9   : >> { %1420 = vmatprep.subr.bf16.mxu0 %v5991_v12  ;;  %5624 = vmatprep.subr.bf16.mxu1 %v5991_v12  ;;  %v5783_v15 = vld [vmem:[%s6891_s10 + $0xd8] sm:$0xff]   ;;  %v5785_v46 = vld [vmem:[%s6891_s10 + $0xd0] sm:$0xff]   ;;  %v6995_v51 = vld [vmem:[#allocation2 + $0xc0] ss:$8 sps:$4 sm:$0xff]  }
  0xda   : >> { %v6997_v22 = vld [vmem:[#allocation2 + $0x54] ss:$8 sps:$4 sm:$0xff]   ;;  %v5792_v49 = vld [vmem:[%s6891_s10 + $0x8] sm:$0xff]   ;;  %v5798_v10 = vld [vmem:[%s6891_s10] sm:$0xff]  }
  0xdb   : >> { %v6999_v28 = vld [vmem:[#allocation2 + $0xd4] ss:$8 sps:$4 sm:$0xff]   ;;  %v5793_v29 = vld [vmem:[%s6891_s10 + $0xc8] sm:$0xff]   ;;  %v5801_v27 = vld [vmem:[%s6891_s10 + $0xc0] sm:$0xff]  }
  0xdc   : >> { %1421 = vmatpush1.bf16.msra.mxu0 %v5741_v14  ;;  %5636 = vmatpush1.bf16.msra.mxu1 %v5741_v14  ;;  %v7015_v47 = vld [vmem:[#allocation2 + $0x50] ss:$8 sps:$4 sm:$0xff]   ;;  %v7019_v0 = vld [vmem:[#allocation2 + $0x64] ss:$8 sps:$4 sm:$0xff]   ;;  %v5799_v3 = vld [vmem:[#allocation2 + $0x60] ss:$8 sps:$4 sm:$0xff]  }
  0xdd   : >> { %1422 = vmatprep.subr.bf16.mxu0 %v5991_v12  ;;  %5625 = vmatprep.subr.bf16.mxu1 %v5991_v12  ;;  %v7017_v8 = vld [vmem:[#allocation2 + $0xd0] ss:$8 sps:$4 sm:$0xff]   ;;  %v7021_v23 = vld [vmem:[#allocation2 + $0xe4] ss:$8 sps:$4 sm:$0xff]   ;;  %v7037_v11 = vld [vmem:[#allocation2 + $0xe0] ss:$8 sps:$4 sm:$0xff]  }
  0xde   : >> { %v5802_v55 = vld [vmem:[%s6891_s10 + $0x58] sm:$0xff]   ;;  %v5810_v40 = vld [vmem:[%s6891_s10 + $0x50] sm:$0xff]   ;;  %v5816_v21 = vld [vmem:[%s6891_s10 + $0x48] sm:$0xff]  }
  0xdf   : >> { %v5803_v20 = vld [vmem:[%s6891_s10 + $0x118] sm:$0xff]   ;;  %v5811_v50 = vld [vmem:[%s6891_s10 + $0x110] sm:$0xff]   ;;  %v5819_v62 = vld [vmem:[%s6891_s10 + $0x108] sm:$0xff]  }
  0xe0   : >> { %1423 = vmatpush1.bf16.msra.mxu0 %v5742_v43  ;;  %5637 = vmatpush1.bf16.msra.mxu1 %v5742_v43  ;;  %v5804_v24 = vld [vmem:[#allocation2 + $0x74] ss:$8 sps:$4 sm:$0xff]   ;;  %v5820_v54 = vld [vmem:[%s6891_s10 + $0x40] sm:$0xff]   ;;  %v5808_v26 = vld [vmem:[#allocation2 + $0x70] ss:$8 sps:$4 sm:$0xff]  }
  0xe1   : >> { %1424 = vmatprep.subr.bf16.mxu0 %v5991_v12  ;;  %5626 = vmatprep.subr.bf16.mxu1 %v5991_v12  ;;  %v7039_v19 = vld [vmem:[#allocation2 + $0xf4] ss:$8 sps:$4 sm:$0xff]   ;;  %v5821_v44 = vld [vmem:[%s6891_s10 + $0x100] sm:$0xff]   ;;  %v7053_v14 = vld [vmem:[#allocation2 + $0xf0] ss:$8 sps:$4 sm:$0xff]   ;;  %s4892_s10 = sshll.u32 (%p1004_p11), %s6870_s5, 4  ;;  %s8204_s10 = int_to_ptr.vmem [resolvable:$true] %s4892_s10 }
  0xe2   : >> { %v5812_v43 = vld [vmem:[#allocation2 + $0x84] ss:$8 sps:$4 sm:$0xff]   ;;  %p5926_p1 = scmp.lt.s32.totalorder (%p1004_p11), %s8204_s10, %s5924_s25 }
  0xe3   : > { %v5831_v25 = vld [vmem:[%s8252_s1 + $0x15e8] sm:$0xff] (%p1004_p11)   ;;  %v5832_v13 = vld [vmem:[%s8252_s1 + $0x15e0] sm:$0xff] (%p1004_p11)  }
  0xe4   : >> { %1425 = vmatpush1.bf16.msra.mxu0 %v5743_v17  ;;  %5638 = vmatpush1.bf16.msra.mxu1 %v5743_v17  ;;  %v7055_v17 = vld [vmem:[#allocation2 + $0x104] ss:$8 sps:$4 sm:$0xff]  }
  0xe5   : >> { %1426 = vmatprep.subr.bf16.mxu0 %v5991_v12  ;;  %5627 = vmatprep.subr.bf16.mxu1 %v5991_v12 }
  0xe8   : >> { %1427 = vmatpush1.bf16.msra.mxu0 %v5744_v56  ;;  %5639 = vmatpush1.bf16.msra.mxu1 %v5744_v56  ;;  %v5817_v56 = vld [vmem:[#allocation2 + $0x80] ss:$8 sps:$4 sm:$0xff]  }
  0xe9   : >> { %1428 = vmatprep.subr.bf16.mxu0 %v5991_v12  ;;  %5628 = vmatprep.subr.bf16.mxu1 %v5991_v12 }
  0xec   : >> { %1429 = vmatpush1.bf16.msra.mxu0 %v5745_v33  ;;  %5640 = vmatpush1.bf16.msra.mxu1 %v5745_v33  ;;  %v7061_v33 = vld [vmem:[#allocation2 + $0x100] ss:$8 sps:$4 sm:$0xff]  }
  0xed   : >> { %1438 = vmatprep.subr.bf16.mxu0 %v5991_v12  ;;  %5629 = vmatprep.subr.bf16.mxu1 %v5991_v12 }
  0xf0   : >> { %1439 = vmatpush2.bf16.msra.mxu0 %v5746_v52  ;;  %5641 = vmatpush2.bf16.msra.mxu1 %v5746_v52  ;;  %v5822_v52 = vld [vmem:[#allocation2] ss:$8 sps:$4 sm:$0xff]  }
  0xf1   : >> { %1440 = vmatprep.subr.bf16.mxu0 %v5991_v12  ;;  %5630 = vmatprep.subr.bf16.mxu1 %v5991_v12 }
  0xf4   : >> { %1441 = vmatpush2.bf16.msra.mxu0 %v5747_v31  ;;  %5642 = vmatpush2.bf16.msra.mxu1 %v5747_v31 }
  0xf5   : >> { %1442 = vmatprep.subr.bf16.mxu0 %v5991_v12  ;;  %5631 = vmatprep.subr.bf16.mxu1 %v5991_v12 }
  0xf8   : >> { %1443 = vmatpush2.bf16.msra.mxu0 %v5748_v59  ;;  %5643 = vmatpush2.bf16.msra.mxu1 %v5748_v59 }
  0xf9   : >> { %1444 = vmatprep.subr.bf16.mxu0 %v5991_v12  ;;  %5632 = vmatprep.subr.bf16.mxu1 %v5991_v12 }
  0xfc   : >> { %1445 = vmatpush2.bf16.msra.mxu0 %v5749_v48  ;;  %5644 = vmatpush2.bf16.msra.mxu1 %v5749_v48 }
  0xfd   : >> { %1839 = vmatprep.subr.bf16.mxu1 %v5991_v12  ;;  %2297 = vmatprep.subr.bf16.mxu0 %v5991_v12 }
  0xff   : >> { %1447 = vmatmul.mubr.bf16.vlgmr.msra.gmra.mxu0 %v6927_v37  ;;  %1511 = vmatmul.mubr.bf16.vlgmr.msra.gmra.mxu1 %v6929_v61 }
 0x100   : >> { %1840 = vmatpush1.bf16.msra.mxu1 %v5756_v9  ;;  %2298 = vmatpush1.bf16.msra.mxu0 %v5757_v16 }
 0x101   : >> { %1841 = vmatprep.subr.bf16.mxu1 %v5991_v12  ;;  %5095 = vmatprep.mubr.msk.bf16.mxu0 %vm1365_vm11, %v6935_v18 }
 0x102   : >> { %5103 = vmatprep.mubr.msk.bf16.mxu1 %vm1365_vm11, %v6937_v60  ;;  %2299 = vmatprep.subr.bf16.mxu0 %v5991_v12 }
 0x104   : >> { %1842 = vmatpush1.bf16.msra.mxu1 %v5762_v32  ;;  %2300 = vmatpush1.bf16.msra.mxu0 %v5765_v7 }
 0x105   : >> { %1843 = vmatprep.subr.bf16.mxu1 %v5991_v12  ;;  %2301 = vmatprep.subr.bf16.mxu0 %v5991_v12 }
 0x107   : >> { %1455 = vmatmul.mubr.bf16.gmra.mxu0 %v6949_v53  ;;  %1519 = vmatmul.mubr.bf16.gmra.mxu1 %v6951_v5 }
 0x108   : >> { %1844 = vmatpush1.bf16.msra.mxu1 %v5766_v58  ;;  %2302 = vmatpush1.bf16.msra.mxu0 %v5767_v35 }
 0x109   : >> { %5096 = vmatprep.mubr.msk.bf16.mxu0 %vm1365_vm11, %v6957_v39  ;;  %5104 = vmatprep.mubr.msk.bf16.mxu1 %vm1365_vm11, %v6959_v57 }
 0x10a   : >> { %1845 = vmatprep.subr.bf16.mxu1 %v5991_v12  ;;  %2303 = vmatprep.subr.bf16.mxu0 %v5991_v12 }
 0x10c   : >> { %1846 = vmatpush1.bf16.msra.mxu1 %v5774_v36  ;;  %2304 = vmatpush1.bf16.msra.mxu0 %v5775_v30 }
 0x10d   : >> { %1847 = vmatprep.subr.bf16.mxu1 %v5991_v12  ;;  %2305 = vmatprep.subr.bf16.mxu0 %v5991_v12 }
 0x10f   : >> { %1463 = vmatmul.mubr.bf16.gmra.mxu0 %v6971_v45  ;;  %1527 = vmatmul.mubr.bf16.gmra.mxu1 %v6973_v2 }
 0x110   : >> { %5097 = vmatprep.mubr.msk.bf16.mxu0 %vm1365_vm11, %v6975_v6  ;;  %5105 = vmatprep.mubr.msk.bf16.mxu1 %vm1365_vm11, %v6977_v34 }
 0x111   : >> { %1848 = vmatpush1.bf16.msra.mxu1 %v5780_v4  ;;  %2306 = vmatpush1.bf16.msra.mxu0 %v5783_v15 }
 0x112   : >> { %1849 = vmatprep.subr.bf16.mxu1 %v5991_v12  ;;  %2307 = vmatprep.subr.bf16.mxu0 %v5991_v12 }
 0x115   : >> { %1850 = vmatpush1.bf16.msra.mxu1 %v5784_v42  ;;  %2308 = vmatpush1.bf16.msra.mxu0 %v5785_v46 }
 0x116   : >> { %1851 = vmatprep.subr.bf16.mxu1 %v5991_v12  ;;  %2309 = vmatprep.subr.bf16.mxu0 %v5991_v12 }
 0x117   : >> { %1471 = vmatmul.mubr.bf16.gmra.mxu0 %v6993_v63  ;;  %1535 = vmatmul.mubr.bf16.gmra.mxu1 %v6995_v51 }
 0x118   : >> { %5098 = vmatprep.mubr.msk.bf16.mxu0 %vm1365_vm11, %v6997_v22  ;;  %5106 = vmatprep.mubr.msk.bf16.mxu1 %vm1365_vm11, %v6999_v28 }
 0x119   : >> { %1852 = vmatpush1.bf16.msra.mxu1 %v5792_v49  ;;  %2310 = vmatpush1.bf16.msra.mxu0 %v5793_v29 }
 0x11a   : >> { %1853 = vmatprep.subr.bf16.mxu1 %v5991_v12  ;;  %2311 = vmatprep.subr.bf16.mxu0 %v5991_v12 }
 0x11d   : >> { %1854 = vmatpush1.bf16.msra.mxu1 %v5798_v10  ;;  %2312 = vmatpush1.bf16.msra.mxu0 %v5801_v27 }
 0x11e   : >> { %1863 = vmatprep.subr.bf16.mxu1 %v5991_v12  ;;  %2321 = vmatprep.subr.bf16.mxu0 %v5991_v12 }
 0x11f   : >> { %1479 = vmatmul.mubr.bf16.gmra.mxu0 %v7015_v47  ;;  %1543 = vmatmul.mubr.bf16.gmra.mxu1 %v7017_v8 }
 0x120   : >> { %5099 = vmatprep.mubr.msk.bf16.mxu0 %vm1365_vm11, %v7019_v0  ;;  %5107 = vmatprep.mubr.msk.bf16.mxu1 %vm1365_vm11, %v7021_v23 }
 0x121   : >> { %1864 = vmatpush2.bf16.msra.mxu1 %v5802_v55  ;;  %2322 = vmatpush2.bf16.msra.mxu0 %v5803_v20 }
 0x122   : >> { %1865 = vmatprep.subr.bf16.mxu1 %v5991_v12  ;;  %2323 = vmatprep.subr.bf16.mxu0 %v5991_v12 }
 0x125   : >> { %1866 = vmatpush2.bf16.msra.mxu1 %v5810_v40  ;;  %2324 = vmatpush2.bf16.msra.mxu0 %v5811_v50 }
 0x126   : >> { %1867 = vmatprep.subr.bf16.mxu1 %v5991_v12  ;;  %2325 = vmatprep.subr.bf16.mxu0 %v5991_v12 }
 0x127   : >> { %1487 = vmatmul.mubr.bf16.gmra.mxu0 %v5799_v3  ;;  %1551 = vmatmul.mubr.bf16.gmra.mxu1 %v7037_v11 }
 0x128   : >> { %5100 = vmatprep.mubr.msk.bf16.mxu0 %vm1365_vm11, %v5804_v24  ;;  %5108 = vmatprep.mubr.msk.bf16.mxu1 %vm1365_vm11, %v7039_v19 }
 0x129   : >> { %1868 = vmatpush2.bf16.msra.mxu1 %v5816_v21  ;;  %2326 = vmatpush2.bf16.msra.mxu0 %v5819_v62 }
 0x12a   : >> { %1869 = vmatprep.subr.bf16.mxu1 %v5991_v12  ;;  %2327 = vmatprep.subr.bf16.mxu0 %v5991_v12  ;;  %v5824_v12 = vld [vmem:[#allocation2 + $0x4] ss:$8 sps:$4 sm:$0xff]  }
 0x12d   : >> { %1870 = vmatpush2.bf16.msra.mxu1 %v5820_v54  ;;  %2328 = vmatpush2.bf16.msra.mxu0 %v5821_v44 }
 0x12e   : > { %3732 = vmatprep.subr.bf16.mxu0 (%p1004_p11), %v5989_v1  ;;  %5645 = vmatprep.subr.bf16.mxu1 (%p1004_p11), %v5989_v1 }
 0x12f   : >> { %1495 = vmatmul.mubr.bf16.gmra.mxu0 %v5808_v26  ;;  %1559 = vmatmul.mubr.bf16.gmra.mxu1 %v7053_v14 }
 0x130   : >> { %5101 = vmatprep.mubr.msk.bf16.mxu0 %vm1365_vm11, %v5812_v43  ;;  %5109 = vmatprep.mubr.msk.bf16.mxu1 %vm1365_vm11, %v7055_v17 }
 0x137   : >> { %1503 = vmatmul.mubr.bf16.gmra.mxu0 %v5817_v56  ;;  %1567 = vmatmul.mubr.bf16.gmra.mxu1 %v7061_v33 }
 0x138   : >> { %5154 = vmatprep.mubr.msk.bf16.mxu1 %vm1365_vm11, %v5824_v12  ;;  %5214 = vmatprep.mubr.msk.bf16.mxu0 %vm1365_vm11, %v6935_v18 }
 0x13f   : >> { %1872 = vmatmul.mubr.bf16.vlgmr.msra.gmra.mxu1 %v5822_v52  ;;  %2330 = vmatmul.mubr.bf16.vlgmr.msra.gmra.mxu0 %v6949_v53 }
 0x140   : >> { %5155 = vmatprep.mubr.msk.bf16.mxu1 %vm1365_vm11, %v6877_v41  ;;  %5215 = vmatprep.mubr.msk.bf16.mxu0 %vm1365_vm11, %v6957_v39  ;;  %v5825_v41 = vld [vmem:[#allocation2 + $0x114] ss:$8 sps:$4 sm:$0xff]  }
 0x147   : >> { %1880 = vmatmul.mubr.bf16.gmra.mxu1 %v6927_v37  ;;  %2338 = vmatmul.mubr.bf16.gmra.mxu0 %v6971_v45 }
 0x148   : >> { %5156 = vmatprep.mubr.msk.bf16.mxu1 %vm1365_vm11, %v6935_v18  ;;  %5216 = vmatprep.mubr.msk.bf16.mxu0 %vm1365_vm11, %v6975_v6 }
 0x14f   : >> { %1888 = vmatmul.mubr.bf16.gmra.mxu1 %v6949_v53  ;;  %2346 = vmatmul.mubr.bf16.gmra.mxu0 %v6993_v63 }
 0x150   : >> { %5157 = vmatprep.mubr.msk.bf16.mxu1 %vm1365_vm11, %v6957_v39  ;;  %5217 = vmatprep.mubr.msk.bf16.mxu0 %vm1365_vm11, %v6997_v22 }
 0x157   : >> { %1896 = vmatmul.mubr.bf16.gmra.mxu1 %v6971_v45  ;;  %2354 = vmatmul.mubr.bf16.gmra.mxu0 %v7015_v47 }
 0x158   : >> { %5158 = vmatprep.mubr.msk.bf16.mxu1 %vm1365_vm11, %v6975_v6  ;;  %5218 = vmatprep.mubr.msk.bf16.mxu0 %vm1365_vm11, %v7019_v0 }
 0x15f   : >> { %1904 = vmatmul.mubr.bf16.gmra.mxu1 %v6993_v63  ;;  %2362 = vmatmul.mubr.bf16.gmra.mxu0 %v5799_v3 }
 0x160   : >> { %5159 = vmatprep.mubr.msk.bf16.mxu1 %vm1365_vm11, %v6997_v22  ;;  %5219 = vmatprep.mubr.msk.bf16.mxu0 %vm1365_vm11, %v5804_v24 }
 0x167   : >> { %1912 = vmatmul.mubr.bf16.gmra.mxu1 %v7015_v47  ;;  %2370 = vmatmul.mubr.bf16.gmra.mxu0 %v5808_v26 }
 0x168   : >> { %5160 = vmatprep.mubr.msk.bf16.mxu1 %vm1365_vm11, %v7019_v0  ;;  %5220 = vmatprep.mubr.msk.bf16.mxu0 %vm1365_vm11, %v5812_v43 }
 0x16f   : >> { %1920 = vmatmul.mubr.bf16.gmra.mxu1 %v5799_v3  ;;  %2378 = vmatmul.mubr.bf16.gmra.mxu0 %v5817_v56 }
 0x170   : >> { %5161 = vmatprep.mubr.msk.bf16.mxu1 %vm1365_vm11, %v5804_v24  ;;  %5221 = vmatprep.mubr.msk.bf16.mxu0 %vm1365_vm11, %v6881_v38 }
 0x177   : >> { %1928 = vmatmul.mubr.bf16.gmra.mxu1 %v5808_v26  ;;  %2386 = vmatmul.mubr.bf16.gmra.mxu0 %v6929_v61 }
 0x178   : >> { %5162 = vmatprep.mubr.msk.bf16.mxu1 %vm1365_vm11, %v5812_v43  ;;  %5222 = vmatprep.mubr.msk.bf16.mxu0 %vm1365_vm11, %v6937_v60 }
 0x17f   : >> { %1936 = vmatmul.mubr.bf16.gmra.mxu1 %v5817_v56  ;;  %2394 = vmatmul.mubr.bf16.gmra.mxu0 %v6951_v5 }
 0x180   : >> { %5163 = vmatprep.mubr.msk.bf16.mxu1 %vm1365_vm11, %v6881_v38  ;;  %5223 = vmatprep.mubr.msk.bf16.mxu0 %vm1365_vm11, %v6959_v57  ;;  %v5827_v38 = vld [vmem:[#allocation2 + $0x110] ss:$8 sps:$4 sm:$0xff]  }
 0x187   : >> { %1944 = vmatmul.mubr.bf16.gmra.mxu1 %v6929_v61  ;;  %2402 = vmatmul.mubr.bf16.gmra.mxu0 %v6973_v2 }
 0x188   : >> { %5164 = vmatprep.mubr.msk.bf16.mxu1 %vm1365_vm11, %v6937_v60  ;;  %5224 = vmatprep.mubr.msk.bf16.mxu0 %vm1365_vm11, %v6977_v34 }
 0x18f   : >> { %1952 = vmatmul.mubr.bf16.gmra.mxu1 %v6951_v5  ;;  %2410 = vmatmul.mubr.bf16.gmra.mxu0 %v6995_v51 }
 0x190   : >> { %5165 = vmatprep.mubr.msk.bf16.mxu1 %vm1365_vm11, %v6959_v57  ;;  %5225 = vmatprep.mubr.msk.bf16.mxu0 %vm1365_vm11, %v6999_v28 }
 0x197   : >> { %1960 = vmatmul.mubr.bf16.gmra.mxu1 %v6973_v2  ;;  %2418 = vmatmul.mubr.bf16.gmra.mxu0 %v7017_v8 }
 0x198   : >> { %5166 = vmatprep.mubr.msk.bf16.mxu1 %vm1365_vm11, %v6977_v34  ;;  %5226 = vmatprep.mubr.msk.bf16.mxu0 %vm1365_vm11, %v7021_v23 }
 0x19f   : >> { %1968 = vmatmul.mubr.bf16.gmra.mxu1 %v6995_v51  ;;  %2426 = vmatmul.mubr.bf16.gmra.mxu0 %v7037_v11 }
 0x1a0   : >> { %5167 = vmatprep.mubr.msk.bf16.mxu1 %vm1365_vm11, %v6999_v28  ;;  %5227 = vmatprep.mubr.msk.bf16.mxu0 %vm1365_vm11, %v7039_v19 }
 0x1a7   : >> { %1976 = vmatmul.mubr.bf16.gmra.mxu1 %v7017_v8  ;;  %2434 = vmatmul.mubr.bf16.gmra.mxu0 %v7053_v14 }
 0x1a8   : >> { %5168 = vmatprep.mubr.msk.bf16.mxu1 %vm1365_vm11, %v7021_v23  ;;  %5228 = vmatprep.mubr.msk.bf16.mxu0 %vm1365_vm11, %v7055_v17 }
 0x1af   : >> { %1984 = vmatmul.mubr.bf16.gmra.mxu1 %v7037_v11  ;;  %2442 = vmatmul.mubr.bf16.gmra.mxu0 %v7061_v33 }
 0x1b0   : >> { %5169 = vmatprep.mubr.msk.bf16.mxu1 %vm1365_vm11, %v7039_v19  ;;  %5229 = vmatprep.mubr.msk.bf16.mxu0 %vm1365_vm11, %v5825_v41 }
 0x1b7   : >> { %1992 = vmatmul.mubr.bf16.gmra.mxu1 %v7053_v14  ;;  %2450 = vmatmul.mubr.bf16.gmra.mxu0 %v5827_v38 }
 0x1bf   : >> { %v7146_v31 = vpop.f32.mrf.mxu0  ;;  %v7148_v59 = vpop.f32.mrf.mxu1 }
 0x1c1   : >> { %v1450_v48 = vpop.f32.mrf.mxu0  ;;  %v1514_v37 = vpop.f32.mrf.mxu1 }
 0x1c3   : >> { %v7150_v61 = vpop.f32.mrf.mxu0  ;;  %v7152_v9 = vpop.f32.mrf.mxu1 }
 0x1c5   : >> { %v1453_v16 = vpop.f32.mrf.mxu0  ;;  %v1517_v18 = vpop.f32.mrf.mxu1 }
 0x1c7   : >> { %v7154_v60 = vpop.f32.mrf.mxu0  ;;  %v7156_v32 = vpop.f32.mrf.mxu1 }
 0x1c9   : >> { %v1458_v7 = vpop.f32.mrf.mxu0  ;;  %v1522_v53 = vpop.f32.mrf.mxu1 }
 0x1cb   : >> { %v7158_v5 = vpop.f32.mrf.mxu0  ;;  %v7160_v58 = vpop.f32.mrf.mxu1 }
 0x1cd   : >> { %v1461_v35 = vpop.f32.mrf.mxu0  ;;  %v1525_v39 = vpop.f32.mrf.mxu1 }
 0x1ce   : >> { %v7218_v35 = vld [vmem:[%s7214_s19] ss:$0 sm:$0xff] }
 0x1cf   : >> { %v7162_v57 = vpop.f32.mrf.mxu0  ;;  %v7164_v36 = vpop.f32.mrf.mxu1 }
 0x1d1   : >> { %v1466_v30 = vpop.f32.mrf.mxu0  ;;  %v1530_v45 = vpop.f32.mrf.mxu1 }
 0x1d3   : >> { %v7166_v2 = vpop.f32.mrf.mxu0  ;;  %v7168_v6 = vpop.f32.mrf.mxu1 }
 0x1d5   : >> { %v1469_v34 = vpop.f32.mrf.mxu0  ;;  %v1533_v4 = vpop.f32.mrf.mxu1 }
 0x1d7   : >> { %v7170_v15 = vpop.f32.mrf.mxu0  ;;  %v7172_v42 = vpop.f32.mrf.mxu1 }
 0x1d9   : >> { %v1474_v46 = vpop.f32.mrf.mxu0  ;;  %v1538_v63 = vpop.f32.mrf.mxu1 }
 0x1db   : >> { %v7174_v51 = vpop.f32.mrf.mxu0  ;;  %v7176_v22 = vpop.f32.mrf.mxu1 }
 0x1dd   : >> { %v1477_v28 = vpop.f32.mrf.mxu0  ;;  %v1541_v49 = vpop.f32.mrf.mxu1 }
 0x1df   : >> { %v7178_v29 = vpop.f32.mrf.mxu0  ;;  %v7180_v10 = vpop.f32.mrf.mxu1 }
 0x1e1   : >> { %v1482_v27 = vpop.f32.mrf.mxu0  ;;  %v1546_v47 = vpop.f32.mrf.mxu1 }
 0x1e3   : >> { %v7182_v8 = vpop.f32.mrf.mxu0  ;;  %v7184_v0 = vpop.f32.mrf.mxu1 }
 0x1e5   : >> { %v1485_v23 = vpop.f32.mrf.mxu0  ;;  %v1549_v55 = vpop.f32.mrf.mxu1 }
 0x1e7   : >> { %v7186_v20 = vpop.f32.mrf.mxu0  ;;  %v7188_v40 = vpop.f32.mrf.mxu1 }
 0x1e9   : >> { %v1490_v50 = vpop.f32.mrf.mxu0  ;;  %v1554_v3 = vpop.f32.mrf.mxu1 }
 0x1eb   : >> { %v7190_v11 = vpop.f32.mrf.mxu0  ;;  %v7192_v24 = vpop.f32.mrf.mxu1 }
 0x1ed   : >> { %v1493_v19 = vpop.f32.mrf.mxu0  ;;  %v1557_v21 = vpop.f32.mrf.mxu1 }
 0x1ef   : >> { %v7194_v62 = vpop.f32.mrf.mxu0  ;;  %v7196_v54 = vpop.f32.mrf.mxu1 }
 0x1f1   : >> { %v1498_v44 = vpop.f32.mrf.mxu0  ;;  %v1562_v26 = vpop.f32.mrf.mxu1 }
 0x1f3   : >> { %v7198_v14 = vpop.f32.mrf.mxu0  ;;  %v7200_v43 = vpop.f32.mrf.mxu1 }
 0x1f5   : >> { %v1501_v17 = vpop.f32.mrf.mxu0  ;;  %v1565_v56 = vpop.f32.mrf.mxu1 }
 0x1f7   : >> { %v7202_v33 = vpop.f32.mrf.mxu0  ;;  %v7204_v12 = vpop.f32.mrf.mxu1 }
 0x1f9   : >> { %v1506_v52 = vpop.f32.mrf.mxu0  ;;  %v1570_v41 = vpop.f32.mrf.mxu1 }
 0x1fb   : >> { %v7206_v38 = vpop.f32.mrf.mxu0  ;;  %v7208_v48 = vpop.f32.mrf.mxu1 }
 0x1fd   : >> { %v1509_v37 = vpop.f32.mrf.mxu0  ;;  %v1573_v16 = vpop.f32.mrf.mxu1 }
 0x1ff   : >> { %v1873_v18 = vpop.f32.mrf.mxu1  ;;  %v2331_v7 = vpop.f32.mrf.mxu0 }
 0x200   : >> { %v1874_v53 = vadd.f32 %v1873_v18, %v7146_v31 }
 0x201   : >> { %v1875_v39 = vpop.f32.mrf.mxu1  ;;  %v2333_v30 = vpop.f32.mrf.mxu0 }
 0x202   : >> { %v2458_v45 = vadd.f32 %v2331_v7, %v1874_v53 }
 0x203   : >> { %v1876_v34 = vpop.f32.mrf.mxu1  ;;  %v2334_v4 = vpop.f32.mrf.mxu0 }
 0x204   : >> { %v2496_v46 = vadd.f32 %v7218_v35, %v2458_v45  ;;  %v1877_v63 = vadd.f32 %v1876_v34, %v7150_v61 }
 0x205   : >> { %v1878_v28 = vpop.f32.mrf.mxu1  ;;  %v2336_v49 = vpop.f32.mrf.mxu0 }
 0x206   : >> { %v2528_v27 = vmax.f32 %v2496_v46, 0.0  ;;  %v2459_v47 = vadd.f32 %v2334_v4, %v1877_v63 }
 0x207   : >> { %v1881_v23 = vpop.f32.mrf.mxu1  ;;  %v2339_v55 = vpop.f32.mrf.mxu0 }
 0x208   : >> { %v2497_v50 = vadd.f32 %v7218_v35, %v2459_v47  ;;  %v1882_v31 = vadd.f32 %v1881_v23, %v7154_v60  ;;  %v5588_v3 = vpack.c.bf16 %v2528_v27, %v2528_v27 }
 0x209   : >> { %v1883_v19 = vpop.f32.mrf.mxu1  ;;  %v2341_v21 = vpop.f32.mrf.mxu0 }
 0x20a   : >> { %v2529_v44 = vmax.f32 %v2497_v50, 0.0  ;;  %v2460_v26 = vadd.f32 %v2339_v55, %v1882_v31  ;;  %2832 = vrot.lane.b32.xlu0 %v5588_v3, %s5992_s20 }
 0x20b   : >> { %v1884_v17 = vpop.f32.mrf.mxu1  ;;  %v2342_v61 = vpop.f32.mrf.mxu0 }
 0x20c   : >> { %v2560_v56 = vpack.c.bf16 %v2529_v44, %v2528_v27  ;;  %v2498_v52 = vadd.f32 %v7218_v35, %v2460_v26  ;;  %v1885_v41 = vadd.f32 %v1884_v17, %v7158_v5  ;;  %v5589_v37 = vpack.c.bf16 %v2529_v44, %v2529_v44 }
 0x20d   : >> { %v1886_v16 = vpop.f32.mrf.mxu1  ;;  %v2344_v18 = vpop.f32.mrf.mxu0 }
 0x20e   : >> { %v2577_v7 = vshrl.u32 %v2560_v56, 16  ;;  %v2530_v60 = vmax.f32 %v2498_v52, 0.0  ;;  %v2461_v53 = vadd.f32 %v2342_v61, %v1885_v41  ;;  %2834 = vrot.lane.b32.xlu0 %v5589_v37, %s5992_s20  ;;  %v2580_v39 = vshll.u32 %v2560_v56, 16 }
 0x20f   : >> { %v1889_v30 = vpop.f32.mrf.mxu1  ;;  %v2347_v45 = vpop.f32.mrf.mxu0 }
 0x210   : >> { %v2579_v34 = vrot.slane %v2577_v7, 7  ;;  %v2499_v4 = vadd.f32 %v7218_v35, %v2461_v53  ;;  %v1890_v46 = vadd.f32 %v1889_v30, %v7162_v57  ;;  %v5590_v63 = vpack.c.bf16 %v2530_v60, %v2530_v60 }
 0x211   : >> { %v1891_v28 = vpop.f32.mrf.mxu1  ;;  %v2349_v49 = vpop.f32.mrf.mxu0 }
 0x212   : >> { %v2582_v5 = vor.u32 %v2580_v39, %v2579_v34  ;;  %v2736_v27 = vsel %vm6208_vm5, %v2579_v34, 0  ;;  %v2531_v47 = vmax.f32 %v2499_v4, 0.0  ;;  %v2462_v23 = vadd.f32 %v2347_v45, %v1890_v46  ;;  %2836 = vrot.lane.b32.xlu1 %v5590_v63, %s5992_s20 }
 0x213   : >> { %v1892_v55 = vpop.f32.mrf.mxu1  ;;  %v2350_v50 = vpop.f32.mrf.mxu0  ;;  %v5295_v26 = vcombine.low %v2736_v27, %v2736_v27 }
 0x214   : >> { %v2720_v31 = vsel %vm6208_vm5, 0, %v2582_v5  ;;  %v2561_v3 = vpack.c.bf16 %v2531_v47, %v2530_v60  ;;  %v2500_v19 = vadd.f32 %v7218_v35, %v2462_v23  ;;  %v1893_v57 = vadd.f32 %v1892_v55, %v7166_v2 }
 0x215   : >> { %v7237_v21 = vcombine.low %v2720_v31, %v2720_v31  ;;  %v7239_v44 = vcombine.high %v2720_v31, %v2720_v31  ;;  %v1894_v17 = vpop.f32.mrf.mxu1  ;;  %v2352_v61 = vpop.f32.mrf.mxu0  ;;  %v5591_v56 = vpack.c.bf16 %v2531_v47, %v2531_v47  ;;  %v3157_v46 = vrot.slane %v5295_v26, 5 }
 0x216   : >> { %v2584_v52 = vshrl.u32 %v2561_v3, 16  ;;  %v2532_v41 = vmax.f32 %v2500_v19, 0.0  ;;  %v2463_v37 = vadd.f32 %v2350_v50, %v1893_v57  ;;  %v2587_v7 = vshll.u32 %v2561_v3, 16 }
 0x217   : >> { %v5311_v16 = vrot.slane %v7237_v21, 9  ;;  %v3154_v18 = vrot.slane %v7239_v44, 5  ;;  %2838 = vrot.lane.b32.xlu1 %v5591_v56, %s5992_s20  ;;  %v1897_v60 = vpop.f32.mrf.mxu1  ;;  %v2355_v2 = vpop.f32.mrf.mxu0 }
 0x218   : >> { %v2586_v53 = vrot.slane %v2584_v52, 7  ;;  %v2501_v39 = vadd.f32 %v7218_v35, %v2463_v37  ;;  %v1898_v30 = vadd.f32 %v1897_v60, %v7170_v15  ;;  %v5592_v45 = vpack.c.bf16 %v2532_v41, %v2532_v41 }
 0x219   : >> { %v3155_v34 = vsel %vm6440_vm9, %v5311_v16, %v3154_v18  ;;  %v3156_v4 = vrot.slane %v3154_v18, 4  ;;  %v1899_v63 = vpop.f32.mrf.mxu1  ;;  %v2357_v28 = vpop.f32.mrf.mxu0 }
 0x21a   : >> { %3296 = vst.msk [vmem:[#allocation2 + $0x14] sm:$0xf] %vm742_vm8, %v3155_v34  ;;  %v2589_v49 = vor.u32 %v2587_v7, %v2586_v53  ;;  %v2737_v5 = vsel %vm6208_vm5, %v2586_v53, 0  ;;  %v2533_v27 = vmax.f32 %v2501_v39, 0.0  ;;  %v2464_v47 = vadd.f32 %v2355_v2, %v1898_v30  ;;  %2840 = vrot.lane.b32.xlu0 %v5592_v45, %s5992_s20 }
 0x21b   : >> { %v3158_v15 = vsel %vm6440_vm9, %v3156_v4, %v3157_v46  ;;  %v1900_v23 = vpop.f32.mrf.mxu1  ;;  %v2358_v55 = vpop.f32.mrf.mxu0  ;;  %v5296_v17 = vcombine.low %v2737_v5, %v2737_v5 }
 0x21c   : >> { %3297 = vst.msk [vmem:[#allocation2 + $0x1c] sm:$0xf] %vm742_vm8, %v3158_v15  ;;  %v2721_v50 = vsel %vm6208_vm5, 0, %v2589_v49  ;;  %v2562_v31 = vpack.c.bf16 %v2533_v27, %v2532_v41  ;;  %v2502_v3 = vadd.f32 %v7218_v35, %v2464_v47  ;;  %v1901_v19 = vadd.f32 %v1900_v23, %v7174_v51 }
 0x21d   : >> { %v7259_v57 = vcombine.low %v2721_v50, %v2721_v50  ;;  %v7261_v26 = vcombine.high %v2721_v50, %v2721_v50  ;;  %v1902_v61 = vpop.f32.mrf.mxu1  ;;  %v2360_v56 = vpop.f32.mrf.mxu0  ;;  %v5593_v52 = vpack.c.bf16 %v2533_v27, %v2533_v27  ;;  %v3164_v46 = vrot.slane %v5296_v17, 5 }
 0x21e   : >> { %v2591_v37 = vshrl.u32 %v2562_v31, 16  ;;  %v2534_v16 = vmax.f32 %v2502_v3, 0.0  ;;  %v2465_v18 = vadd.f32 %v2358_v55, %v1901_v19  ;;  %v2594_v41 = vshll.u32 %v2562_v31, 16 }
 0x21f   : >> { %v5312_v7 = vrot.slane %v7259_v57, 9  ;;  %v3161_v60 = vrot.slane %v7261_v26, 5  ;;  %2842 = vrot.lane.b32.xlu1 %v5593_v52, %s5992_s20  ;;  %v1905_v2 = vpop.f32.mrf.mxu1  ;;  %v2363_v51 = vpop.f32.mrf.mxu0 }
 0x220   : >> { %v2593_v53 = vrot.slane %v2591_v37, 7  ;;  %v2503_v39 = vadd.f32 %v7218_v35, %v2465_v18  ;;  %v1906_v30 = vadd.f32 %v1905_v2, %v7178_v29  ;;  %v5594_v45 = vpack.c.bf16 %v2534_v16, %v2534_v16 }
 0x221   : >> { %v3162_v34 = vsel %vm6440_vm9, %v5312_v7, %v3161_v60  ;;  %v3163_v4 = vrot.slane %v3161_v60, 4  ;;  %v1907_v63 = vpop.f32.mrf.mxu1  ;;  %v2365_v28 = vpop.f32.mrf.mxu0 }
 0x222   : >> { %3298 = vst.msk [vmem:[#allocation2 + $0x24] sm:$0xf] %vm742_vm8, %v3162_v34  ;;  %v2596_v49 = vor.u32 %v2594_v41, %v2593_v53  ;;  %v2738_v5 = vsel %vm6208_vm5, %v2593_v53, 0  ;;  %v2535_v27 = vmax.f32 %v2503_v39, 0.0  ;;  %v2466_v47 = vadd.f32 %v2363_v51, %v1906_v30  ;;  %2844 = vrot.lane.b32.xlu0 %v5594_v45, %s5992_s20 }
 0x223   : >> { %v3165_v29 = vsel %vm6440_vm9, %v3163_v4, %v3164_v46  ;;  %v1908_v15 = vpop.f32.mrf.mxu1  ;;  %v2366_v23 = vpop.f32.mrf.mxu0  ;;  %v5297_v61 = vcombine.low %v2738_v5, %v2738_v5 }
 0x224   : >> { %3299 = vst.msk [vmem:[#allocation2 + $0x2c] sm:$0xf] %vm742_vm8, %v3165_v29  ;;  %v2722_v55 = vsel %vm6208_vm5, 0, %v2596_v49  ;;  %v2563_v50 = vpack.c.bf16 %v2535_v27, %v2534_v16  ;;  %v2504_v31 = vadd.f32 %v7218_v35, %v2466_v47  ;;  %v1909_v3 = vadd.f32 %v1908_v15, %v7182_v8 }
 0x225   : >> { %v7281_v19 = vcombine.low %v2722_v55, %v2722_v55  ;;  %v7283_v17 = vcombine.high %v2722_v55, %v2722_v55  ;;  %v1910_v56 = vpop.f32.mrf.mxu1  ;;  %v2368_v52 = vpop.f32.mrf.mxu0  ;;  %v5595_v37 = vpack.c.bf16 %v2535_v27, %v2535_v27  ;;  %v3171_v46 = vrot.slane %v5297_v61, 5 }
 0x226   : >> { %v2598_v18 = vshrl.u32 %v2563_v50, 16  ;;  %v2536_v7 = vmax.f32 %v2504_v31, 0.0  ;;  %v2467_v60 = vadd.f32 %v2366_v23, %v1909_v3  ;;  %v2601_v16 = vshll.u32 %v2563_v50, 16 }
 0x227   : >> { %v5313_v41 = vrot.slane %v7281_v19, 9  ;;  %v3168_v2 = vrot.slane %v7283_v17, 5  ;;  %2846 = vrot.lane.b32.xlu1 %v5595_v37, %s5992_s20  ;;  %v1913_v51 = vpop.f32.mrf.mxu1  ;;  %v2371_v8 = vpop.f32.mrf.mxu0 }
 0x228   : >> { %v2600_v53 = vrot.slane %v2598_v18, 7  ;;  %v2505_v39 = vadd.f32 %v7218_v35, %v2467_v60  ;;  %v1914_v30 = vadd.f32 %v1913_v51, %v7186_v20  ;;  %v5596_v45 = vpack.c.bf16 %v2536_v7, %v2536_v7 }
 0x229   : >> { %v3169_v34 = vsel %vm6440_vm9, %v5313_v41, %v3168_v2  ;;  %v3170_v4 = vrot.slane %v3168_v2, 4  ;;  %v1915_v63 = vpop.f32.mrf.mxu1  ;;  %v2373_v28 = vpop.f32.mrf.mxu0 }
 0x22a   : >> { %3300 = vst.msk [vmem:[#allocation2 + $0x34] sm:$0xf] %vm742_vm8, %v3169_v34  ;;  %v2603_v49 = vor.u32 %v2601_v16, %v2600_v53  ;;  %v2739_v5 = vsel %vm6208_vm5, %v2600_v53, 0  ;;  %v2537_v27 = vmax.f32 %v2505_v39, 0.0  ;;  %v2468_v47 = vadd.f32 %v2371_v8, %v1914_v30  ;;  %2848 = vrot.lane.b32.xlu0 %v5596_v45, %s5992_s20 }
 0x22b   : >> { %v3172_v20 = vsel %vm6440_vm9, %v3170_v4, %v3171_v46  ;;  %v1916_v29 = vpop.f32.mrf.mxu1  ;;  %v2374_v15 = vpop.f32.mrf.mxu0  ;;  %v5298_v56 = vcombine.low %v2739_v5, %v2739_v5 }
 0x22c   : >> { %3301 = vst.msk [vmem:[#allocation2 + $0x3c] sm:$0xf] %vm742_vm8, %v3172_v20  ;;  %v2723_v23 = vsel %vm6208_vm5, 0, %v2603_v49  ;;  %v2564_v55 = vpack.c.bf16 %v2537_v27, %v2536_v7  ;;  %v2506_v50 = vadd.f32 %v7218_v35, %v2468_v47  ;;  %v1917_v31 = vadd.f32 %v1916_v29, %v7190_v11 }
 0x22d   : >> { %v7303_v3 = vcombine.low %v2723_v23, %v2723_v23  ;;  %v7305_v61 = vcombine.high %v2723_v23, %v2723_v23  ;;  %v1918_v52 = vpop.f32.mrf.mxu1  ;;  %v2376_v37 = vpop.f32.mrf.mxu0  ;;  %v5597_v18 = vpack.c.bf16 %v2537_v27, %v2537_v27  ;;  %v3178_v46 = vrot.slane %v5298_v56, 5 }
 0x22e   : >> { %v2605_v60 = vshrl.u32 %v2564_v55, 16  ;;  %v2538_v41 = vmax.f32 %v2506_v50, 0.0  ;;  %v2469_v2 = vadd.f32 %v2374_v15, %v1917_v31  ;;  %v2608_v7 = vshll.u32 %v2564_v55, 16 }
 0x22f   : >> { %v5314_v16 = vrot.slane %v7303_v3, 9  ;;  %v3175_v51 = vrot.slane %v7305_v61, 5  ;;  %2850 = vrot.lane.b32.xlu1 %v5597_v18, %s5992_s20  ;;  %v1921_v8 = vpop.f32.mrf.mxu1  ;;  %v2379_v11 = vpop.f32.mrf.mxu0 }
 0x230   : >> { %v2607_v53 = vrot.slane %v2605_v60, 7  ;;  %v2507_v39 = vadd.f32 %v7218_v35, %v2469_v2  ;;  %v1922_v30 = vadd.f32 %v1921_v8, %v7194_v62  ;;  %v5598_v45 = vpack.c.bf16 %v2538_v41, %v2538_v41 }
 0x231   : >> { %v3176_v34 = vsel %vm6440_vm9, %v5314_v16, %v3175_v51  ;;  %v3177_v4 = vrot.slane %v3175_v51, 4  ;;  %v1923_v63 = vpop.f32.mrf.mxu1  ;;  %v2381_v28 = vpop.f32.mrf.mxu0 }
 0x232   : >> { %3302 = vst.msk [vmem:[#allocation2 + $0x44] sm:$0xf] %vm742_vm8, %v3176_v34  ;;  %v2610_v49 = vor.u32 %v2608_v7, %v2607_v53  ;;  %v2740_v5 = vsel %vm6208_vm5, %v2607_v53, 0  ;;  %v2539_v27 = vmax.f32 %v2507_v39, 0.0  ;;  %v2470_v47 = vadd.f32 %v2379_v11, %v1922_v30  ;;  %2852 = vrot.lane.b32.xlu0 %v5598_v45, %s5992_s20 }
 0x233   : >> { %v3179_v62 = vsel %vm6440_vm9, %v3177_v4, %v3178_v46  ;;  %v1924_v20 = vpop.f32.mrf.mxu1  ;;  %v2382_v29 = vpop.f32.mrf.mxu0  ;;  %v5299_v52 = vcombine.low %v2740_v5, %v2740_v5 }
 0x234   : >> { %3303 = vst.msk [vmem:[#allocation2 + $0x4c] sm:$0xf] %vm742_vm8, %v3179_v62  ;;  %v2724_v15 = vsel %vm6208_vm5, 0, %v2610_v49  ;;  %v2565_v23 = vpack.c.bf16 %v2539_v27, %v2538_v41  ;;  %v2508_v55 = vadd.f32 %v7218_v35, %v2470_v47  ;;  %v1925_v50 = vadd.f32 %v1924_v20, %v7198_v14 }
 0x235   : >> { %v7325_v31 = vcombine.low %v2724_v15, %v2724_v15  ;;  %v7327_v56 = vcombine.high %v2724_v15, %v2724_v15  ;;  %v1926_v37 = vpop.f32.mrf.mxu1  ;;  %v2384_v18 = vpop.f32.mrf.mxu0  ;;  %v5599_v60 = vpack.c.bf16 %v2539_v27, %v2539_v27  ;;  %v3185_v46 = vrot.slane %v5299_v52, 5 }
 0x236   : >> { %v2612_v2 = vshrl.u32 %v2565_v23, 16  ;;  %v2540_v16 = vmax.f32 %v2508_v55, 0.0  ;;  %v2471_v51 = vadd.f32 %v2382_v29, %v1925_v50  ;;  %v2615_v41 = vshll.u32 %v2565_v23, 16 }
 0x237   : >> { %v5315_v7 = vrot.slane %v7325_v31, 9  ;;  %v3182_v8 = vrot.slane %v7327_v56, 5  ;;  %2854 = vrot.lane.b32.xlu1 %v5599_v60, %s5992_s20  ;;  %v1929_v11 = vpop.f32.mrf.mxu1  ;;  %v2387_v14 = vpop.f32.mrf.mxu0 }
 0x238   : >> { %v2614_v53 = vrot.slane %v2612_v2, 7  ;;  %v2509_v39 = vadd.f32 %v7218_v35, %v2471_v51  ;;  %v1930_v30 = vadd.f32 %v1929_v11, %v7202_v33  ;;  %v5600_v45 = vpack.c.bf16 %v2540_v16, %v2540_v16 }
 0x239   : >> { %v3183_v34 = vsel %vm6440_vm9, %v5315_v7, %v3182_v8  ;;  %v3184_v4 = vrot.slane %v3182_v8, 4  ;;  %v1931_v63 = vpop.f32.mrf.mxu1  ;;  %v2389_v28 = vpop.f32.mrf.mxu0 }
 0x23a   : >> { %3304 = vst.msk [vmem:[#allocation2 + $0x54] sm:$0xf] %vm742_vm8, %v3183_v34  ;;  %v2617_v49 = vor.u32 %v2615_v41, %v2614_v53  ;;  %v2741_v5 = vsel %vm6208_vm5, %v2614_v53, 0  ;;  %v2541_v27 = vmax.f32 %v2509_v39, 0.0  ;;  %v2472_v47 = vadd.f32 %v2387_v14, %v1930_v30  ;;  %2856 = vrot.lane.b32.xlu0 %v5600_v45, %s5992_s20 }
 0x23b   : >> { %v3186_v33 = vsel %vm6440_vm9, %v3184_v4, %v3185_v46  ;;  %v1932_v62 = vpop.f32.mrf.mxu1  ;;  %v2390_v20 = vpop.f32.mrf.mxu0  ;;  %v5300_v37 = vcombine.low %v2741_v5, %v2741_v5 }
 0x23c   : >> { %3305 = vst.msk [vmem:[#allocation2 + $0x5c] sm:$0xf] %vm742_vm8, %v3186_v33  ;;  %v2725_v29 = vsel %vm6208_vm5, 0, %v2617_v49  ;;  %v2566_v15 = vpack.c.bf16 %v2541_v27, %v2540_v16  ;;  %v2510_v23 = vadd.f32 %v7218_v35, %v2472_v47  ;;  %v1933_v55 = vadd.f32 %v1932_v62, %v7206_v38 }
 0x23d   : >> { %v7347_v50 = vcombine.low %v2725_v29, %v2725_v29  ;;  %v7349_v52 = vcombine.high %v2725_v29, %v2725_v29  ;;  %v1934_v18 = vpop.f32.mrf.mxu1  ;;  %v2392_v60 = vpop.f32.mrf.mxu0  ;;  %v5601_v2 = vpack.c.bf16 %v2541_v27, %v2541_v27  ;;  %v3192_v46 = vrot.slane %v5300_v37, 5 }
 0x23e   : >> { %v2619_v51 = vshrl.u32 %v2566_v15, 16  ;;  %v2542_v7 = vmax.f32 %v2510_v23, 0.0  ;;  %v2473_v8 = vadd.f32 %v2390_v20, %v1933_v55  ;;  %v2622_v16 = vshll.u32 %v2566_v15, 16 }
 0x23f   : >> { %v5316_v41 = vrot.slane %v7347_v50, 9  ;;  %v3189_v11 = vrot.slane %v7349_v52, 5  ;;  %2858 = vrot.lane.b32.xlu1 %v5601_v2, %s5992_s20  ;;  %v1937_v14 = vpop.f32.mrf.mxu1  ;;  %v2395_v38 = vpop.f32.mrf.mxu0 }
 0x240   : >> { %v2621_v53 = vrot.slane %v2619_v51, 7  ;;  %v2511_v39 = vadd.f32 %v7218_v35, %v2473_v8  ;;  %v1938_v30 = vadd.f32 %v1937_v14, %v7148_v59  ;;  %v5602_v45 = vpack.c.bf16 %v2542_v7, %v2542_v7 }
 0x241   : >> { %v3190_v34 = vsel %vm6440_vm9, %v5316_v41, %v3189_v11  ;;  %v3191_v4 = vrot.slane %v3189_v11, 4  ;;  %v1939_v63 = vpop.f32.mrf.mxu1  ;;  %v2397_v28 = vpop.f32.mrf.mxu0 }
 0x242   : >> { %3306 = vst.msk [vmem:[#allocation2 + $0x64] sm:$0xf] %vm742_vm8, %v3190_v34  ;;  %v2624_v49 = vor.u32 %v2622_v16, %v2621_v53  ;;  %v2742_v5 = vsel %vm6208_vm5, %v2621_v53, 0  ;;  %v2543_v27 = vmax.f32 %v2511_v39, 0.0  ;;  %v2474_v47 = vadd.f32 %v2395_v38, %v1938_v30  ;;  %2860 = vrot.lane.b32.xlu0 %v5602_v45, %s5992_s20 }
 0x243   : >> { %v3193_v59 = vsel %vm6440_vm9, %v3191_v4, %v3192_v46  ;;  %v1940_v33 = vpop.f32.mrf.mxu1  ;;  %v2398_v62 = vpop.f32.mrf.mxu0  ;;  %v5301_v18 = vcombine.low %v2742_v5, %v2742_v5 }
 0x244   : >> { %3307 = vst.msk [vmem:[#allocation2 + $0x6c] sm:$0xf] %vm742_vm8, %v3193_v59  ;;  %v2726_v20 = vsel %vm6208_vm5, 0, %v2624_v49  ;;  %v2567_v29 = vpack.c.bf16 %v2543_v27, %v2542_v7  ;;  %v2512_v15 = vadd.f32 %v7218_v35, %v2474_v47  ;;  %v1941_v23 = vadd.f32 %v1940_v33, %v7152_v9 }
 0x245   : >> { %v7369_v55 = vcombine.low %v2726_v20, %v2726_v20  ;;  %v7371_v37 = vcombine.high %v2726_v20, %v2726_v20  ;;  %v1942_v60 = vpop.f32.mrf.mxu1  ;;  %v2400_v2 = vpop.f32.mrf.mxu0  ;;  %v5603_v51 = vpack.c.bf16 %v2543_v27, %v2543_v27  ;;  %v3199_v46 = vrot.slane %v5301_v18, 5 }
 0x246   : >> { %v2626_v8 = vshrl.u32 %v2567_v29, 16  ;;  %v2544_v41 = vmax.f32 %v2512_v15, 0.0  ;;  %v2475_v11 = vadd.f32 %v2398_v62, %v1941_v23  ;;  %v2629_v7 = vshll.u32 %v2567_v29, 16 }
 0x247   : >> { %v5317_v16 = vrot.slane %v7369_v55, 9  ;;  %v3196_v14 = vrot.slane %v7371_v37, 5  ;;  %2862 = vrot.lane.b32.xlu1 %v5603_v51, %s5992_s20  ;;  %v1945_v38 = vpop.f32.mrf.mxu1  ;;  %v2403_v9 = vpop.f32.mrf.mxu0 }
 0x248   : >> { %v2628_v53 = vrot.slane %v2626_v8, 7  ;;  %v2513_v39 = vadd.f32 %v7218_v35, %v2475_v11  ;;  %v1946_v30 = vadd.f32 %v1945_v38, %v7156_v32  ;;  %v5604_v45 = vpack.c.bf16 %v2544_v41, %v2544_v41 }
 0x249   : >> { %v3197_v34 = vsel %vm6440_vm9, %v5317_v16, %v3196_v14  ;;  %v3198_v4 = vrot.slane %v3196_v14, 4  ;;  %v1947_v63 = vpop.f32.mrf.mxu1  ;;  %v2405_v28 = vpop.f32.mrf.mxu0 }
 0x24a   : >> { %3308 = vst.msk [vmem:[#allocation2 + $0x74] sm:$0xf] %vm742_vm8, %v3197_v34  ;;  %v2631_v49 = vor.u32 %v2629_v7, %v2628_v53  ;;  %v2743_v5 = vsel %vm6208_vm5, %v2628_v53, 0  ;;  %v2545_v27 = vmax.f32 %v2513_v39, 0.0  ;;  %v2476_v47 = vadd.f32 %v2403_v9, %v1946_v30  ;;  %2864 = vrot.lane.b32.xlu0 %v5604_v45, %s5992_s20 }
 0x24b   : >> { %v3200_v32 = vsel %vm6440_vm9, %v3198_v4, %v3199_v46  ;;  %v1948_v59 = vpop.f32.mrf.mxu1  ;;  %v2406_v33 = vpop.f32.mrf.mxu0  ;;  %v5302_v60 = vcombine.low %v2743_v5, %v2743_v5 }
 0x24c   : >> { %3309 = vst.msk [vmem:[#allocation2 + $0x7c] sm:$0xf] %vm742_vm8, %v3200_v32  ;;  %v2727_v62 = vsel %vm6208_vm5, 0, %v2631_v49  ;;  %v2568_v20 = vpack.c.bf16 %v2545_v27, %v2544_v41  ;;  %v2514_v29 = vadd.f32 %v7218_v35, %v2476_v47  ;;  %v1949_v15 = vadd.f32 %v1948_v59, %v7160_v58 }
 0x24d   : >> { %v7391_v23 = vcombine.low %v2727_v62, %v2727_v62  ;;  %v7393_v18 = vcombine.high %v2727_v62, %v2727_v62  ;;  %v1950_v2 = vpop.f32.mrf.mxu1  ;;  %v2408_v51 = vpop.f32.mrf.mxu0  ;;  %v5605_v8 = vpack.c.bf16 %v2545_v27, %v2545_v27  ;;  %v3206_v46 = vrot.slane %v5302_v60, 5 }
 0x24e   : >> { %v2633_v11 = vshrl.u32 %v2568_v20, 16  ;;  %v2546_v16 = vmax.f32 %v2514_v29, 0.0  ;;  %v2477_v14 = vadd.f32 %v2406_v33, %v1949_v15  ;;  %v2636_v41 = vshll.u32 %v2568_v20, 16 }
 0x24f   : >> { %v5318_v7 = vrot.slane %v7391_v23, 9  ;;  %v3203_v38 = vrot.slane %v7393_v18, 5  ;;  %2866 = vrot.lane.b32.xlu1 %v5605_v8, %s5992_s20  ;;  %v1953_v9 = vpop.f32.mrf.mxu1  ;;  %v2411_v58 = vpop.f32.mrf.mxu0 }
 0x250   : >> { %v2635_v53 = vrot.slane %v2633_v11, 7  ;;  %v2515_v39 = vadd.f32 %v7218_v35, %v2477_v14  ;;  %v1954_v30 = vadd.f32 %v1953_v9, %v7164_v36  ;;  %v5606_v45 = vpack.c.bf16 %v2546_v16, %v2546_v16 }
 0x251   : >> { %v3204_v34 = vsel %vm6440_vm9, %v5318_v7, %v3203_v38  ;;  %v3205_v4 = vrot.slane %v3203_v38, 4  ;;  %v1955_v63 = vpop.f32.mrf.mxu1  ;;  %v2413_v28 = vpop.f32.mrf.mxu0 }
 0x252   : >> { %3310 = vst.msk [vmem:[#allocation2 + $0x84] sm:$0xf] %vm742_vm8, %v3204_v34  ;;  %v2638_v49 = vor.u32 %v2636_v41, %v2635_v53  ;;  %v2744_v5 = vsel %vm6208_vm5, %v2635_v53, 0  ;;  %v2547_v27 = vmax.f32 %v2515_v39, 0.0  ;;  %v2478_v47 = vadd.f32 %v2411_v58, %v1954_v30  ;;  %2868 = vrot.lane.b32.xlu0 %v5606_v45, %s5992_s20 }
 0x253   : >> { %v3207_v36 = vsel %vm6440_vm9, %v3205_v4, %v3206_v46  ;;  %v1956_v32 = vpop.f32.mrf.mxu1  ;;  %v2414_v59 = vpop.f32.mrf.mxu0  ;;  %v5303_v2 = vcombine.low %v2744_v5, %v2744_v5 }
 0x254   : >> { %3311 = vst.msk [vmem:[#allocation2 + $0x8c] sm:$0xf] %vm742_vm8, %v3207_v36  ;;  %v2728_v33 = vsel %vm6208_vm5, 0, %v2638_v49  ;;  %v2569_v62 = vpack.c.bf16 %v2547_v27, %v2546_v16  ;;  %v2516_v20 = vadd.f32 %v7218_v35, %v2478_v47  ;;  %v1957_v29 = vadd.f32 %v1956_v32, %v7168_v6 }
 0x255   : >> { %v7413_v15 = vcombine.low %v2728_v33, %v2728_v33  ;;  %v7415_v60 = vcombine.high %v2728_v33, %v2728_v33  ;;  %v1958_v51 = vpop.f32.mrf.mxu1  ;;  %v2416_v8 = vpop.f32.mrf.mxu0  ;;  %v5607_v11 = vpack.c.bf16 %v2547_v27, %v2547_v27  ;;  %v3213_v46 = vrot.slane %v5303_v2, 5 }
 0x256   : >> { %v2640_v14 = vshrl.u32 %v2569_v62, 16  ;;  %v2548_v7 = vmax.f32 %v2516_v20, 0.0  ;;  %v2479_v38 = vadd.f32 %v2414_v59, %v1957_v29  ;;  %v2643_v16 = vshll.u32 %v2569_v62, 16 }
 0x257   : >> { %v5319_v41 = vrot.slane %v7413_v15, 9  ;;  %v3210_v9 = vrot.slane %v7415_v60, 5  ;;  %2870 = vrot.lane.b32.xlu1 %v5607_v11, %s5992_s20  ;;  %v1961_v58 = vpop.f32.mrf.mxu1  ;;  %v2419_v6 = vpop.f32.mrf.mxu0 }
 0x258   : >> { %v2642_v53 = vrot.slane %v2640_v14, 7  ;;  %v2517_v39 = vadd.f32 %v7218_v35, %v2479_v38  ;;  %v1962_v30 = vadd.f32 %v1961_v58, %v7172_v42  ;;  %v5608_v45 = vpack.c.bf16 %v2548_v7, %v2548_v7 }
 0x259   : >> { %v3211_v34 = vsel %vm6440_vm9, %v5319_v41, %v3210_v9  ;;  %v3212_v4 = vrot.slane %v3210_v9, 4  ;;  %v1963_v63 = vpop.f32.mrf.mxu1  ;;  %v2421_v28 = vpop.f32.mrf.mxu0 }
 0x25a   : >> { %3312 = vst.msk [vmem:[#allocation2 + $0x94] sm:$0xf] %vm742_vm8, %v3211_v34  ;;  %v2645_v49 = vor.u32 %v2643_v16, %v2642_v53  ;;  %v2745_v5 = vsel %vm6208_vm5, %v2642_v53, 0  ;;  %v2549_v27 = vmax.f32 %v2517_v39, 0.0  ;;  %v2480_v47 = vadd.f32 %v2419_v6, %v1962_v30  ;;  %2872 = vrot.lane.b32.xlu0 %v5608_v45, %s5992_s20 }
 0x25b   : >> { %v3214_v42 = vsel %vm6440_vm9, %v3212_v4, %v3213_v46  ;;  %v1964_v36 = vpop.f32.mrf.mxu1  ;;  %v2422_v32 = vpop.f32.mrf.mxu0  ;;  %v5304_v51 = vcombine.low %v2745_v5, %v2745_v5 }
 0x25c   : >> { %3313 = vst.msk [vmem:[#allocation2 + $0x9c] sm:$0xf] %vm742_vm8, %v3214_v42  ;;  %v2729_v59 = vsel %vm6208_vm5, 0, %v2645_v49  ;;  %v2570_v33 = vpack.c.bf16 %v2549_v27, %v2548_v7  ;;  %v2518_v62 = vadd.f32 %v7218_v35, %v2480_v47  ;;  %v1965_v20 = vadd.f32 %v1964_v36, %v7176_v22 }
 0x25d   : >> { %v7435_v29 = vcombine.low %v2729_v59, %v2729_v59  ;;  %v7437_v2 = vcombine.high %v2729_v59, %v2729_v59  ;;  %v1966_v8 = vpop.f32.mrf.mxu1  ;;  %v2424_v11 = vpop.f32.mrf.mxu0  ;;  %v5609_v14 = vpack.c.bf16 %v2549_v27, %v2549_v27  ;;  %v3220_v46 = vrot.slane %v5304_v51, 5 }
 0x25e   : >> { %v2647_v38 = vshrl.u32 %v2570_v33, 16  ;;  %v2550_v41 = vmax.f32 %v2518_v62, 0.0  ;;  %v2481_v9 = vadd.f32 %v2422_v32, %v1965_v20  ;;  %v2650_v7 = vshll.u32 %v2570_v33, 16 }
 0x25f   : >> { %v5320_v16 = vrot.slane %v7435_v29, 9  ;;  %v3217_v58 = vrot.slane %v7437_v2, 5  ;;  %2874 = vrot.lane.b32.xlu1 %v5609_v14, %s5992_s20  ;;  %v1969_v6 = vpop.f32.mrf.mxu1  ;;  %v2427_v22 = vpop.f32.mrf.mxu0 }
 0x260   : >> { %v2649_v53 = vrot.slane %v2647_v38, 7  ;;  %v2519_v39 = vadd.f32 %v7218_v35, %v2481_v9  ;;  %v1970_v30 = vadd.f32 %v1969_v6, %v7180_v10  ;;  %v5610_v45 = vpack.c.bf16 %v2550_v41, %v2550_v41 }
 0x261   : >> { %v3218_v34 = vsel %vm6440_vm9, %v5320_v16, %v3217_v58  ;;  %v3219_v4 = vrot.slane %v3217_v58, 4  ;;  %v1971_v63 = vpop.f32.mrf.mxu1  ;;  %v2429_v28 = vpop.f32.mrf.mxu0 }
 0x262   : >> { %3314 = vst.msk [vmem:[#allocation2 + $0xa4] sm:$0xf] %vm742_vm8, %v3218_v34  ;;  %v2652_v49 = vor.u32 %v2650_v7, %v2649_v53  ;;  %v2746_v5 = vsel %vm6208_vm5, %v2649_v53, 0  ;;  %v2551_v27 = vmax.f32 %v2519_v39, 0.0  ;;  %v2482_v47 = vadd.f32 %v2427_v22, %v1970_v30  ;;  %2876 = vrot.lane.b32.xlu0 %v5610_v45, %s5992_s20 }
 0x263   : >> { %v3221_v10 = vsel %vm6440_vm9, %v3219_v4, %v3220_v46  ;;  %v1972_v42 = vpop.f32.mrf.mxu1  ;;  %v2430_v36 = vpop.f32.mrf.mxu0  ;;  %v5305_v8 = vcombine.low %v2746_v5, %v2746_v5 }
 0x264   : >> { %3315 = vst.msk [vmem:[#allocation2 + $0xac] sm:$0xf] %vm742_vm8, %v3221_v10  ;;  %v2730_v32 = vsel %vm6208_vm5, 0, %v2652_v49  ;;  %v2571_v59 = vpack.c.bf16 %v2551_v27, %v2550_v41  ;;  %v2520_v33 = vadd.f32 %v7218_v35, %v2482_v47  ;;  %v1973_v62 = vadd.f32 %v1972_v42, %v7184_v0 }
 0x265   : >> { %v7457_v20 = vcombine.low %v2730_v32, %v2730_v32  ;;  %v7459_v51 = vcombine.high %v2730_v32, %v2730_v32  ;;  %v1974_v11 = vpop.f32.mrf.mxu1  ;;  %v2432_v14 = vpop.f32.mrf.mxu0  ;;  %v5611_v38 = vpack.c.bf16 %v2551_v27, %v2551_v27  ;;  %v3227_v46 = vrot.slane %v5305_v8, 5 }
 0x266   : >> { %v2654_v9 = vshrl.u32 %v2571_v59, 16  ;;  %v2552_v16 = vmax.f32 %v2520_v33, 0.0  ;;  %v2483_v58 = vadd.f32 %v2430_v36, %v1973_v62  ;;  %v2657_v41 = vshll.u32 %v2571_v59, 16 }
 0x267   : >> { %v5321_v7 = vrot.slane %v7457_v20, 9  ;;  %v3224_v6 = vrot.slane %v7459_v51, 5  ;;  %2878 = vrot.lane.b32.xlu1 %v5611_v38, %s5992_s20  ;;  %v1977_v22 = vpop.f32.mrf.mxu1  ;;  %v2435_v0 = vpop.f32.mrf.mxu0 }
 0x268   : >> { %v2656_v53 = vrot.slane %v2654_v9, 7  ;;  %v2521_v39 = vadd.f32 %v7218_v35, %v2483_v58  ;;  %v1978_v30 = vadd.f32 %v1977_v22, %v7188_v40  ;;  %v5612_v45 = vpack.c.bf16 %v2552_v16, %v2552_v16 }
 0x269   : >> { %v3225_v34 = vsel %vm6440_vm9, %v5321_v7, %v3224_v6  ;;  %v3226_v4 = vrot.slane %v3224_v6, 4  ;;  %v1979_v63 = vpop.f32.mrf.mxu1  ;;  %v2437_v28 = vpop.f32.mrf.mxu0 }
 0x26a   : >> { %3316 = vst.msk [vmem:[#allocation2 + $0xb4] sm:$0xf] %vm742_vm8, %v3225_v34  ;;  %v2659_v49 = vor.u32 %v2657_v41, %v2656_v53  ;;  %v2747_v5 = vsel %vm6208_vm5, %v2656_v53, 0  ;;  %v2553_v27 = vmax.f32 %v2521_v39, 0.0  ;;  %v2484_v47 = vadd.f32 %v2435_v0, %v1978_v30  ;;  %2880 = vrot.lane.b32.xlu0 %v5612_v45, %s5992_s20 }
 0x26b   : >> { %v3228_v40 = vsel %vm6440_vm9, %v3226_v4, %v3227_v46  ;;  %v1980_v10 = vpop.f32.mrf.mxu1  ;;  %v2438_v42 = vpop.f32.mrf.mxu0  ;;  %v5306_v11 = vcombine.low %v2747_v5, %v2747_v5 }
 0x26c   : >> { %3317 = vst.msk [vmem:[#allocation2 + $0xbc] sm:$0xf] %vm742_vm8, %v3228_v40  ;;  %v2731_v36 = vsel %vm6208_vm5, 0, %v2659_v49  ;;  %v2572_v32 = vpack.c.bf16 %v2553_v27, %v2552_v16  ;;  %v2522_v59 = vadd.f32 %v7218_v35, %v2484_v47  ;;  %v1981_v33 = vadd.f32 %v1980_v10, %v7192_v24 }
 0x26d   : >> { %v7479_v62 = vcombine.low %v2731_v36, %v2731_v36  ;;  %v7481_v8 = vcombine.high %v2731_v36, %v2731_v36  ;;  %v1982_v14 = vpop.f32.mrf.mxu1  ;;  %v2440_v38 = vpop.f32.mrf.mxu0  ;;  %v5613_v9 = vpack.c.bf16 %v2553_v27, %v2553_v27  ;;  %v3234_v46 = vrot.slane %v5306_v11, 5 }
 0x26e   : >> { %v2661_v58 = vshrl.u32 %v2572_v32, 16  ;;  %v2554_v7 = vmax.f32 %v2522_v59, 0.0  ;;  %v2485_v6 = vadd.f32 %v2438_v42, %v1981_v33  ;;  %v2664_v16 = vshll.u32 %v2572_v32, 16 }
 0x26f   : >> { %v5322_v41 = vrot.slane %v7479_v62, 9  ;;  %v3231_v22 = vrot.slane %v7481_v8, 5  ;;  %2882 = vrot.lane.b32.xlu1 %v5613_v9, %s5992_s20  ;;  %v1985_v0 = vpop.f32.mrf.mxu1  ;;  %v2443_v24 = vpop.f32.mrf.mxu0 }
 0x270   : >> { %v2663_v53 = vrot.slane %v2661_v58, 7  ;;  %v2523_v39 = vadd.f32 %v7218_v35, %v2485_v6  ;;  %v1986_v30 = vadd.f32 %v1985_v0, %v7196_v54  ;;  %v5614_v45 = vpack.c.bf16 %v2554_v7, %v2554_v7 }
 0x271   : >> { %v3232_v34 = vsel %vm6440_vm9, %v5322_v41, %v3231_v22  ;;  %v3233_v4 = vrot.slane %v3231_v22, 4  ;;  %v1987_v63 = vpop.f32.mrf.mxu1  ;;  %v2445_v28 = vpop.f32.mrf.mxu0 }
 0x272   : >> { %3318 = vst.msk [vmem:[#allocation2 + $0xc4] sm:$0xf] %vm742_vm8, %v3232_v34  ;;  %v2666_v49 = vor.u32 %v2664_v16, %v2663_v53  ;;  %v2748_v5 = vsel %vm6208_vm5, %v2663_v53, 0  ;;  %v2555_v27 = vmax.f32 %v2523_v39, 0.0  ;;  %v2486_v47 = vadd.f32 %v2443_v24, %v1986_v30  ;;  %2884 = vrot.lane.b32.xlu0 %v5614_v45, %s5992_s20  ;;  %v5828_v53 = vld [vmem:[%s7214_s19] ss:$0 sm:$0xff]  ;;  %s8202_s19 = scalar_lea.hbm (%p1004_p11), %s8254_s3, %s5620_s9 }
 0x273   : >> { %v3235_v54 = vsel %vm6440_vm9, %v3233_v4, %v3234_v46  ;;  %v1988_v40 = vpop.f32.mrf.mxu1  ;;  %v2446_v10 = vpop.f32.mrf.mxu0  ;;  %v5307_v14 = vcombine.low %v2748_v5, %v2748_v5 }
 0x274   : >> { %3319 = vst.msk [vmem:[#allocation2 + $0xcc] sm:$0xf] %vm742_vm8, %v3235_v54  ;;  %v2732_v42 = vsel %vm6208_vm5, 0, %v2666_v49  ;;  %v2573_v36 = vpack.c.bf16 %v2555_v27, %v2554_v7  ;;  %v2524_v32 = vadd.f32 %v7218_v35, %v2486_v47  ;;  %v1989_v59 = vadd.f32 %v1988_v40, %v7200_v43 }
 0x275   : >> { %v7501_v33 = vcombine.low %v2732_v42, %v2732_v42  ;;  %v7503_v11 = vcombine.high %v2732_v42, %v2732_v42  ;;  %v1990_v38 = vpop.f32.mrf.mxu1  ;;  %v2448_v9 = vpop.f32.mrf.mxu0  ;;  %v5615_v58 = vpack.c.bf16 %v2555_v27, %v2555_v27  ;;  %v3241_v46 = vrot.slane %v5307_v14, 5 }
 0x276   : >> { %v2668_v6 = vshrl.u32 %v2573_v36, 16  ;;  %v2556_v41 = vmax.f32 %v2524_v32, 0.0  ;;  %v2487_v22 = vadd.f32 %v2446_v10, %v1989_v59  ;;  %v2671_v0 = vshll.u32 %v2573_v36, 16 }
 0x277   : >> { %v5323_v16 = vrot.slane %v7501_v33, 9  ;;  %v3238_v7 = vrot.slane %v7503_v11, 5  ;;  %2886 = vrot.lane.b32.xlu1 %v5615_v58, %s5992_s20  ;;  %v1993_v43 = vpop.f32.mrf.mxu1  ;;  %v2451_v35 = vpop.f32.mrf.mxu0 }
 0x278   : >> { %v2670_v24 = vrot.slane %v2668_v6, 7  ;;  %v2525_v39 = vadd.f32 %v5828_v53, %v2487_v22  ;;  %v1994_v30 = vadd.f32 %v1993_v43, %v7204_v12  ;;  %v5616_v45 = vpack.c.bf16 %v2556_v41, %v2556_v41 }
 0x279   : >> { %v3239_v34 = vsel %vm6440_vm9, %v5323_v16, %v3238_v7  ;;  %v3240_v4 = vrot.slane %v3238_v7, 4  ;;  %v1995_v63 = vpop.f32.mrf.mxu1  ;;  %v2453_v28 = vpop.f32.mrf.mxu0 }
 0x27a   : >> { %3320 = vst.msk [vmem:[#allocation2 + $0xd4] sm:$0xf] %vm742_vm8, %v3239_v34  ;;  %v2673_v49 = vor.u32 %v2671_v0, %v2670_v24  ;;  %v2749_v5 = vsel %vm6208_vm5, %v2670_v24, 0  ;;  %v2557_v27 = vmax.f32 %v2525_v39, 0.0  ;;  %v2488_v47 = vadd.f32 %v2451_v35, %v1994_v30  ;;  %2888 = vrot.lane.b32.xlu0 %v5616_v45, %s5992_s20 }
 0x27b   : >> { %v3242_v12 = vsel %vm6440_vm9, %v3240_v4, %v3241_v46  ;;  %v1996_v54 = vpop.f32.mrf.mxu1  ;;  %v2454_v40 = vpop.f32.mrf.mxu0  ;;  %v5308_v9 = vcombine.low %v2749_v5, %v2749_v5 }
 0x27c   : >> { %3321 = vst.msk [vmem:[#allocation2 + $0xdc] sm:$0xf] %vm742_vm8, %v3242_v12  ;;  %v2733_v10 = vsel %vm6208_vm5, 0, %v2673_v49  ;;  %v2574_v42 = vpack.c.bf16 %v2557_v27, %v2556_v41  ;;  %v2526_v36 = vadd.f32 %v5828_v53, %v2488_v47  ;;  %v1997_v32 = vadd.f32 %v1996_v54, %v7208_v48  ;;  %v2833_v59 = vpop.permute.xlu0 %2832 }
 0x27d   : >> { %v7522_v14 = vcombine.low %v2733_v10, %v2733_v10  ;;  %v7524_v38 = vcombine.high %v2733_v10, %v2733_v10  ;;  %2928 = vst.msk [vmem:[#allocation2 + $0x10] sm:$0xf] %vm597_vm10, %v2833_v59  ;;  %v1998_v58 = vpop.f32.mrf.mxu1  ;;  %v2456_v6 = vpop.f32.mrf.mxu0  ;;  %v5617_v22 = vpack.c.bf16 %v2557_v27, %v2557_v27  ;;  %v3248_v4 = vrot.slane %v5308_v9, 5 }
 0x27e   : >> { %v2675_v16 = vshrl.u32 %v2574_v42, 16  ;;  %v2558_v7 = vmax.f32 %v2526_v36, 0.0  ;;  %v2489_v0 = vadd.f32 %v2454_v40, %v1997_v32  ;;  %3072 = vst.msk [vmem:[#allocation2 + $0x10] sm:$0xf] %vm742_vm8, %v7237_v21  ;;  %v2678_v35 = vshll.u32 %v2574_v42, 16 }
 0x27f   : >> { %v5324_v41 = vrot.slane %v7522_v14, 9  ;;  %v3245_v48 = vrot.slane %v7524_v38, 5  ;;  %2890 = vrot.lane.b32.xlu1 %v5617_v22, %s5992_s20 }
 0x280   : >> { %v2677_v43 = vrot.slane %v2675_v16, 7  ;;  %v2527_v24 = vadd.f32 %v5828_v53, %v2489_v0  ;;  %v2835_v39 = vpop.permute.xlu0 %2834  ;;  %v5618_v30 = vpack.c.bf16 %v2558_v7, %v2558_v7 }
 0x281   : >> { %v3246_v45 = vsel %vm6440_vm9, %v5324_v41, %v3245_v48  ;;  %v3247_v34 = vrot.slane %v3245_v48, 4  ;;  %2929 = vst.msk [vmem:[#allocation2 + $0x18] sm:$0xf] %vm597_vm10, %v2835_v39 }
 0x282   : >> { %3322 = vst.msk [vmem:[#allocation2 + $0xe4] sm:$0xf] %vm742_vm8, %v3246_v45  ;;  %v2680_v21 = vor.u32 %v2678_v35, %v2677_v43  ;;  %v2750_v46 = vsel %vm6208_vm5, %v2677_v43, 0  ;;  %v2559_v63 = vmax.f32 %v2527_v24, 0.0  ;;  %3073 = vst.msk [vmem:[#allocation2 + $0x18] sm:$0xf] %vm742_vm8, %v7239_v44  ;;  %2892 = vrot.lane.b32.xlu0 %v5618_v30, %s5992_s20 }
 0x283   : >> { %v3249_v53 = vsel %vm6440_vm9, %v3247_v34, %v3248_v4  ;;  %v5309_v54 = vcombine.low %v2750_v46, %v2750_v46  ;;  %v5830_v46 = vld [vmem:[%s8252_s1 + $0x15f0] sm:$0xff] (%p1004_p11)  }
 0x284   : >> { %3323 = vst.msk [vmem:[#allocation2 + $0xec] sm:$0xf] %vm742_vm8, %v3249_v53  ;;  %v2734_v28 = vsel %vm6208_vm5, 0, %v2680_v21  ;;  %v2575_v49 = vpack.c.bf16 %v2559_v63, %v2558_v7  ;;  %v2837_v5 = vpop.permute.xlu1 %2836  ;;  %v5619_v27 = vpack.c.bf16 %v2559_v63, %v2559_v63  ;;  %v7688_v63 = vld [vmem:[#allocation2 + $0x14] ss:$8 sps:$4 sm:$0xff] (%p1004_p11)  }
 0x285   : >> { %v7546_v47 = vcombine.low %v2734_v28, %v2734_v28  ;;  %v7548_v12 = vcombine.high %v2734_v28, %v2734_v28  ;;  %2930 = vst.msk [vmem:[#allocation2 + $0x20] sm:$0xf] %vm597_vm10, %v2837_v5  ;;  %v3255_v9 = vrot.slane %v5309_v54, 5  ;;  %v5833_v53 = vld [vmem:[%s8252_s1 + $0x15d8] sm:$0xff] (%p1004_p11)   ;;  %5444 = vmatprep.mubr.msk.bf16.mxu0 (%p1004_p11), %vm1365_vm11, %v7688_v63  ;;  %v5835_v5 = vld [vmem:[%s8252_s1 + $0x15c8] sm:$0xff] (%p1004_p11)  }
 0x286   : >> { %v2682_v44 = vshrl.u32 %v2575_v49, 16  ;;  %3074 = vst.msk [vmem:[#allocation2 + $0x20] sm:$0xf] %vm742_vm8, %v7259_v57  ;;  %2894 = vrot.lane.b32.xlu1 %v5619_v27, %s5992_s20  ;;  %v2685_v36 = vshll.u32 %v2575_v49, 16  ;;  %v7693_v28 = vld [vmem:[#allocation2 + $0x94] ss:$8 sps:$4 sm:$0xff] (%p1004_p11)  }
 0x287   : >> { %v5325_v40 = vrot.slane %v7546_v47, 9  ;;  %v3252_v10 = vrot.slane %v7548_v12, 5  ;;  %5452 = vmatprep.mubr.msk.bf16.mxu1 (%p1004_p11), %vm1365_vm11, %v7693_v28  ;;  %v5834_v49 = vld [vmem:[%s8252_s1 + $0x15d0] sm:$0xff] (%p1004_p11)   ;;  %v5836_v27 = vld [vmem:[%s8252_s1 + $0x15c0] sm:$0xff] (%p1004_p11)   ;;  %v5839_v54 = vld [vmem:[%s8252_s1 + $0x1608] sm:$0xff] (%p1004_p11)   ;;  %s5919_s20 = scalar_lea.vmem (%p1004_p11), %s8204_s10, 4096 }
 0x288   : >> { %v2684_v42 = vrot.slane %v2682_v44, 7  ;;  %v5840_v44 = vld [vmem:[%s8252_s1 + $0x1600] sm:$0xff] (%p1004_p11)   ;;  %p5920_p12 = scmp.ne.s32.totalorder (%p1004_p11), %s8204_s10, %s5919_s20  ;;  %p5927_p2 = scmp.lt.s32.totalorder (%p1004_p11), %s5925_s26, %s5919_s20 }
 0x289   : >> { %v3253_v32 = vsel %vm6440_vm9, %v5325_v40, %v3252_v10  ;;  %v3254_v59 = vrot.slane %v3252_v10, 4  ;;  %v2839_v58 = vpop.permute.xlu1 %2838  ;;  %v7736_v40 = vld [vmem:[#allocation2 + $0x10] ss:$8 sps:$4 sm:$0xff] (%p1004_p11)  }
 0x28a   : >> { %3324 = vst.msk [vmem:[#allocation2 + $0xf4] sm:$0xf] %vm742_vm8, %v3253_v32  ;;  %v2687_v6 = vor.u32 %v2685_v36, %v2684_v42  ;;  %v2751_v57 = vsel %vm6208_vm5, %v2684_v42, 0  ;;  %v5847_v42 = vld [vmem:[%s8252_s1 + $0x1598] sm:$0xff] (%p1004_p11)   ;;  %v7748_v32 = vld [vmem:[#allocation2 + $0x24] ss:$8 sps:$4 sm:$0xff] (%p1004_p11)   ;;  %p5921_p13 = pnand (%p1004_p11), %p5920_p12, %p6054_p5  ;;  %p5928_p3 = por (%p1004_p11), %p5927_p2, %p5926_p1 }
 0x28b   : >> { %2931 = vst.msk [vmem:[#allocation2 + $0x28] sm:$0xf] %vm597_vm10, %v2839_v58  ;;  %v3256_v22 = vsel %vm6440_vm9, %v3254_v59, %v3255_v9  ;;  %v5310_v48 = vcombine.low %v2751_v57, %v2751_v57  ;;  %v5848_v36 = vld [vmem:[%s8252_s1 + $0x1658] sm:$0xff] (%p1004_p11)   ;;  %v7750_v59 = vld [vmem:[#allocation2 + $0xa4] ss:$8 sps:$4 sm:$0xff] (%p1004_p11)   ;;  %v5853_v9 = vld [vmem:[%s8252_s1 + $0x1590] sm:$0xff] (%p1004_p11)  }
 0x28c   : >> { %3075 = vst.msk [vmem:[#allocation2 + $0x28] sm:$0xf] %vm742_vm8, %v7261_v26  ;;  %3325 = vst.msk [vmem:[#allocation2 + $0xfc] sm:$0xf] %vm742_vm8, %v3256_v22  ;;  %v2735_v16 = vsel %vm6208_vm5, 0, %v2687_v6  ;;  %v2841_v7 = vpop.permute.xlu0 %2840  ;;  %v5856_v58 = vld [vmem:[%s8252_s1 + $0x1650] sm:$0xff] (%p1004_p11)   ;;  %p5922_p0 = pneg (%p1004_p11), %p5921_p13 }
 0x28d   : >> { %v7569_v0 = vcombine.low %v2735_v16, %v2735_v16  ;;  %v7571_v41 = vcombine.high %v2735_v16, %v2735_v16  ;;  %2932 = vst.msk [vmem:[#allocation2 + $0x30] sm:$0xf] %vm597_vm10, %v2841_v7  ;;  %v3262_v39 = vrot.slane %v5310_v48, 5  ;;  %v5857_v22 = vld [vmem:[%s8252_s1 + $0x1588] sm:$0xff] (%p1004_p11)   ;;  %v7776_v7 = vld [vmem:[#allocation2 + $0x34] ss:$8 sps:$4 sm:$0xff] (%p1004_p11)  }
 0x28e   : >> { %3076 = vst.msk [vmem:[#allocation2 + $0x30] sm:$0xf] %vm742_vm8, %v7281_v19  ;;  %v5858_v16 = vld [vmem:[%s8252_s1 + $0x1648] sm:$0xff] (%p1004_p11)   ;;  %v5866_v48 = vld [vmem:[%s8252_s1 + $0x1640] sm:$0xff] (%p1004_p11)   ;;  %p5929_p4 = pnand (%p1004_p11), %p5928_p3, %p5922_p0 }
 0x28f   : >> { %v5326_v43 = vrot.slane %v7569_v0, 9  ;;  %v3259_v26 = vrot.slane %v7571_v41, 5 }
 0x291   : >> { %v3260_v35 = vsel %vm6440_vm9, %v5326_v43, %v3259_v26  ;;  %v3261_v24 = vrot.slane %v3259_v26, 4  ;;  %v2843_v30 = vpop.permute.xlu1 %2842 }
 0x292   : >> { %3326 = vst.msk [vmem:[#allocation2 + $0x104] sm:$0xf] %vm742_vm8, %v3260_v35  ;;  %v7800_v35 = vld [vmem:[#allocation2 + $0x44] ss:$8 sps:$4 sm:$0xff] (%p1004_p11)  }
 0x293   : >> { %2933 = vst.msk [vmem:[#allocation2 + $0x38] sm:$0xf] %vm597_vm10, %v2843_v30  ;;  %v3263_v45 = vsel %vm6440_vm9, %v3261_v24, %v3262_v39  ;;  %v7763_v6 = vld [vmem:[#allocation2 + $0x20] ss:$8 sps:$4 sm:$0xff] (%p1004_p11)   ;;  %v7802_v24 = vld [vmem:[#allocation2 + $0xc4] ss:$8 sps:$4 sm:$0xff] (%p1004_p11)  }
 0x294   : >> { %3077 = vst.msk [vmem:[#allocation2 + $0x38] sm:$0xf] %vm742_vm8, %v7283_v17  ;;  %3327 = vst.msk [vmem:[#allocation2 + $0x10c] sm:$0xf] %vm742_vm8, %v3263_v45  ;;  %v2845_v19 = vpop.permute.xlu0 %2844  ;;  %v5871_v39 = vld [vmem:[%s8252_s1 + $0x1578] sm:$0xff] (%p1004_p11)   ;;  %v5875_v45 = vld [vmem:[%s8252_s1 + $0x1570] sm:$0xff] (%p1004_p11)  }
 0x295   : >> { %2934 = vst.msk [vmem:[#allocation2 + $0x40] sm:$0xf] %vm597_vm10, %v2845_v19  ;;  %v5874_v30 = vld [vmem:[%s8252_s1 + $0x1638] sm:$0xff] (%p1004_p11)   ;;  %v5876_v19 = vld [vmem:[%s8252_s1 + $0x1630] sm:$0xff] (%p1004_p11)  }
 0x296   : >> { %3078 = vst.msk [vmem:[#allocation2 + $0x40] sm:$0xf] %vm742_vm8, %v7303_v3 }
 0x299   : >> { %v2847_v34 = vpop.permute.xlu1 %2846 }
 0x29a   : >> { %2935 = vst.msk [vmem:[#allocation2 + $0x48] sm:$0xf] %vm597_vm10, %v2847_v34 }
 0x29b   : >> { %3079 = vst.msk [vmem:[#allocation2 + $0x48] sm:$0xf] %vm742_vm8, %v7305_v61  ;;  %v7796_v43 = vld [vmem:[#allocation2 + $0x30] ss:$8 sps:$4 sm:$0xff] (%p1004_p11)  }
 0x29c   : >> { %v2849_v4 = vpop.permute.xlu0 %2848 }
 0x29d   : >> { %2936 = vst.msk [vmem:[#allocation2 + $0x50] sm:$0xf] %vm597_vm10, %v2849_v4 }
 0x29e   : >> { %3080 = vst.msk [vmem:[#allocation2 + $0x50] sm:$0xf] %vm742_vm8, %v7325_v31 }
 0x2a1   : >> { %v2851_v17 = vpop.permute.xlu1 %2850 }
 0x2a2   : >> { %2937 = vst.msk [vmem:[#allocation2 + $0x58] sm:$0xf] %vm597_vm10, %v2851_v17  ;;  %v7826_v34 = vld [vmem:[#allocation2 + $0x40] ss:$8 sps:$4 sm:$0xff] (%p1004_p11)   ;;  %v7830_v17 = vld [vmem:[#allocation2 + $0x54] ss:$8 sps:$4 sm:$0xff] (%p1004_p11)  }
 0x2a3   : >> { %3081 = vst.msk [vmem:[#allocation2 + $0x58] sm:$0xf] %vm742_vm8, %v7327_v56 }
 0x2a4   : >> { %v2853_v21 = vpop.permute.xlu0 %2852 }
 0x2a5   : >> { %2938 = vst.msk [vmem:[#allocation2 + $0x60] sm:$0xf] %vm597_vm10, %v2853_v21  ;;  %v7832_v21 = vld [vmem:[#allocation2 + $0xd4] ss:$8 sps:$4 sm:$0xff] (%p1004_p11)  }
 0x2a6   : >> { %3082 = vst.msk [vmem:[#allocation2 + $0x60] sm:$0xf] %vm742_vm8, %v7347_v50 }
 0x2a9   : >> { %v2855_v3 = vpop.permute.xlu1 %2854 }
 0x2aa   : >> { %2939 = vst.msk [vmem:[#allocation2 + $0x68] sm:$0xf] %vm597_vm10, %v2855_v3  ;;  %v5883_v3 = vld [vmem:[%s8252_s1 + $0x1568] sm:$0xff] (%p1004_p11)  }
 0x2ab   : >> { %3083 = vst.msk [vmem:[#allocation2 + $0x68] sm:$0xf] %vm742_vm8, %v7349_v52 }
 0x2ac   : >> { %v2857_v61 = vpop.permute.xlu0 %2856 }
 0x2ad   : >> { %2940 = vst.msk [vmem:[#allocation2 + $0x70] sm:$0xf] %vm597_vm10, %v2857_v61  ;;  %v5884_v61 = vld [vmem:[%s8252_s1 + $0x1628] sm:$0xff] (%p1004_p11)  }
 0x2ae   : >> { %3084 = vst.msk [vmem:[#allocation2 + $0x70] sm:$0xf] %vm742_vm8, %v7369_v55 }
 0x2b1   : >> { %v2859_v31 = vpop.permute.xlu1 %2858 }
 0x2b2   : >> { %2941 = vst.msk [vmem:[#allocation2 + $0x78] sm:$0xf] %vm597_vm10, %v2859_v31  ;;  %v5889_v31 = vld [vmem:[%s8252_s1 + $0x1560] sm:$0xff] (%p1004_p11)  }
 0x2b3   : >> { %3085 = vst.msk [vmem:[#allocation2 + $0x78] sm:$0xf] %vm742_vm8, %v7371_v37 }
 0x2b4   : >> { %v2861_v56 = vpop.permute.xlu0 %2860 }
 0x2b5   : >> { %2942 = vst.msk [vmem:[#allocation2 + $0x80] sm:$0xf] %vm597_vm10, %v2861_v56  ;;  %v5892_v56 = vld [vmem:[%s8252_s1 + $0x1620] sm:$0xff] (%p1004_p11)  }
 0x2b6   : >> { %3086 = vst.msk [vmem:[#allocation2 + $0x80] sm:$0xf] %vm742_vm8, %v7391_v23 }
 0x2b9   : >> { %v2863_v50 = vpop.permute.xlu1 %2862 }
 0x2ba   : >> { %2943 = vst.msk [vmem:[#allocation2 + $0x88] sm:$0xf] %vm597_vm10, %v2863_v50  ;;  %v7856_v50 = vld [vmem:[#allocation2 + $0x50] ss:$8 sps:$4 sm:$0xff] (%p1004_p11)  }
 0x2bb   : >> { %3087 = vst.msk [vmem:[#allocation2 + $0x88] sm:$0xf] %vm742_vm8, %v7393_v18 }
 0x2bc   : >> { %v2865_v52 = vpop.permute.xlu0 %2864 }
 0x2bd   : >> { %2944 = vst.msk [vmem:[#allocation2 + $0x90] sm:$0xf] %vm597_vm10, %v2865_v52 }
 0x2be   : >> { %3088 = vst.msk [vmem:[#allocation2 + $0x90] sm:$0xf] %vm742_vm8, %v7413_v15 }
 0x2c1   : >> { %v2867_v55 = vpop.permute.xlu1 %2866 }
 0x2c2   : >> { %2945 = vst.msk [vmem:[#allocation2 + $0x98] sm:$0xf] %vm597_vm10, %v2867_v55  ;;  %v7860_v55 = vld [vmem:[#allocation2 + $0x64] ss:$8 sps:$4 sm:$0xff] (%p1004_p11)  }
 0x2c3   : >> { %3089 = vst.msk [vmem:[#allocation2 + $0x98] sm:$0xf] %vm742_vm8, %v7415_v60 }
 0x2c4   : >> { %v2869_v37 = vpop.permute.xlu0 %2868 }
 0x2c5   : >> { %2946 = vst.msk [vmem:[#allocation2 + $0xa0] sm:$0xf] %vm597_vm10, %v2869_v37  ;;  %v7862_v37 = vld [vmem:[#allocation2 + $0xe4] ss:$8 sps:$4 sm:$0xff] (%p1004_p11)  }
 0x2c6   : >> { %3090 = vst.msk [vmem:[#allocation2 + $0xa0] sm:$0xf] %vm742_vm8, %v7435_v29 }
 0x2c9   : >> { %v2871_v23 = vpop.permute.xlu1 %2870 }
 0x2ca   : >> { %2947 = vst.msk [vmem:[#allocation2 + $0xa8] sm:$0xf] %vm597_vm10, %v2871_v23  ;;  %v7738_v10 = vld [vmem:[#allocation2 + $0x90] ss:$8 sps:$4 sm:$0xff] (%p1004_p11)  }
 0x2cb   : >> { %3091 = vst.msk [vmem:[#allocation2 + $0xa8] sm:$0xf] %vm742_vm8, %v7437_v2  ;;  %v5893_v23 = vld [vmem:[%s8252_s1 + $0x15b8] sm:$0xff] (%p1004_p11)  }
 0x2cc   : >> { %v2873_v18 = vpop.permute.xlu0 %2872 }
 0x2cd   : >> { %2948 = vst.msk [vmem:[#allocation2 + $0xb0] sm:$0xf] %vm597_vm10, %v2873_v18  ;;  %v5894_v18 = vld [vmem:[%s8252_s1 + $0x1678] sm:$0xff] (%p1004_p11)  }
 0x2ce   : >> { %3092 = vst.msk [vmem:[#allocation2 + $0xb0] sm:$0xf] %vm742_vm8, %v7457_v20 }
 0x2d1   : >> { %v2875_v15 = vpop.permute.xlu1 %2874 }
 0x2d2   : >> { %2949 = vst.msk [vmem:[#allocation2 + $0xb8] sm:$0xf] %vm597_vm10, %v2875_v15  ;;  %v7767_v57 = vld [vmem:[#allocation2 + $0xa0] ss:$8 sps:$4 sm:$0xff] (%p1004_p11)   ;;  %v5901_v15 = vld [vmem:[%s8252_s1 + $0x15b0] sm:$0xff] (%p1004_p11)  }
 0x2d3   : >> { %3093 = vst.msk [vmem:[#allocation2 + $0xb8] sm:$0xf] %vm742_vm8, %v7459_v51 }
 0x2d4   : >> { %v2877_v60 = vpop.permute.xlu0 %2876 }
 0x2d5   : >> { %2950 = vst.msk [vmem:[#allocation2 + $0xc0] sm:$0xf] %vm597_vm10, %v2877_v60  ;;  %v5902_v60 = vld [vmem:[%s8252_s1 + $0x1670] sm:$0xff] (%p1004_p11)  }
 0x2d6   : >> { %3094 = vst.msk [vmem:[#allocation2 + $0xc0] sm:$0xf] %vm742_vm8, %v7479_v62 }
 0x2d9   : >> { %v2879_v29 = vpop.permute.xlu1 %2878 }
 0x2da   : >> { %2951 = vst.msk [vmem:[#allocation2 + $0xc8] sm:$0xf] %vm597_vm10, %v2879_v29  ;;  %v7798_v26 = vld [vmem:[#allocation2 + $0xb0] ss:$8 sps:$4 sm:$0xff] (%p1004_p11)   ;;  %v5890_v29 = vld [vmem:[#allocation2 + $0x60] ss:$8 sps:$4 sm:$0xff] (%p1004_p11)  }
 0x2db   : >> { %3095 = vst.msk [vmem:[#allocation2 + $0xc8] sm:$0xf] %vm742_vm8, %v7481_v8 }
 0x2dc   : >> { %v2881_v2 = vpop.permute.xlu0 %2880 }
 0x2dd   : >> { %2952 = vst.msk [vmem:[#allocation2 + $0xd0] sm:$0xf] %vm597_vm10, %v2881_v2 }
 0x2de   : >> { %3096 = vst.msk [vmem:[#allocation2 + $0xd0] sm:$0xf] %vm742_vm8, %v7501_v33 }
 0x2e1   : >> { %v2883_v20 = vpop.permute.xlu1 %2882 }
 0x2e2   : >> { %2953 = vst.msk [vmem:[#allocation2 + $0xd8] sm:$0xf] %vm597_vm10, %v2883_v20  ;;  %v7828_v4 = vld [vmem:[#allocation2 + $0xc0] ss:$8 sps:$4 sm:$0xff] (%p1004_p11)   ;;  %v5895_v20 = vld [vmem:[#allocation2 + $0x74] ss:$8 sps:$4 sm:$0xff] (%p1004_p11)  }
 0x2e3   : >> { %3097 = vst.msk [vmem:[#allocation2 + $0xd8] sm:$0xf] %vm742_vm8, %v7503_v11 }
 0x2e4   : >> { %v2885_v51 = vpop.permute.xlu0 %2884 }
 0x2e5   : >> { %2954 = vst.msk [vmem:[#allocation2 + $0xe0] sm:$0xf] %vm597_vm10, %v2885_v51  ;;  %v7888_v51 = vld [vmem:[#allocation2 + $0xf4] ss:$8 sps:$4 sm:$0xff] (%p1004_p11)  }
 0x2e6   : >> { %3098 = vst.msk [vmem:[#allocation2 + $0xe0] sm:$0xf] %vm742_vm8, %v7522_v14 }
 0x2e9   : >> { %v2887_v62 = vpop.permute.xlu1 %2886 }
 0x2ea   : >> { %2955 = vst.msk [vmem:[#allocation2 + $0xe8] sm:$0xf] %vm597_vm10, %v2887_v62  ;;  %v7858_v52 = vld [vmem:[#allocation2 + $0xd0] ss:$8 sps:$4 sm:$0xff] (%p1004_p11)   ;;  %v5907_v62 = vld [vmem:[%s8252_s1 + $0x15a8] sm:$0xff] (%p1004_p11)  }
 0x2eb   : >> { %3099 = vst.msk [vmem:[#allocation2 + $0xe8] sm:$0xf] %vm742_vm8, %v7524_v38  ;;  %v5829_v38 = vld [vmem:[%s8252_s1 + $0x15f8] sm:$0xff] (%p1004_p11)  }
 0x2ec   : >> { %v2889_v8 = vpop.permute.xlu0 %2888  ;;  %3733 = vmatpush1.bf16.msra.mxu0 (%p1004_p11), %v5829_v38  ;;  %5657 = vmatpush1.bf16.msra.mxu1 (%p1004_p11), %v5829_v38 }
 0x2ed   : >> { %2956 = vst.msk [vmem:[#allocation2 + $0xf0] sm:$0xf] %vm597_vm10, %v2889_v8  ;;  %3734 = vmatprep.subr.bf16.mxu0 (%p1004_p11), %v5989_v1  ;;  %5646 = vmatprep.subr.bf16.mxu1 (%p1004_p11), %v5989_v1  ;;  %v5910_v8 = vld [vmem:[%s8252_s1 + $0x1668] sm:$0xff] (%p1004_p11)  }
 0x2ee   : >> { %3100 = vst.msk [vmem:[#allocation2 + $0xf0] sm:$0xf] %vm742_vm8, %v7546_v47  ;;  %v5837_v47 = vld [vmem:[%s8252_s1 + $0x1618] sm:$0xff] (%p1004_p11)  }
 0x2f0   : > { %3735 = vmatpush1.bf16.msra.mxu0 (%p1004_p11), %v5830_v46  ;;  %5658 = vmatpush1.bf16.msra.mxu1 (%p1004_p11), %v5830_v46  ;;  %v5903_v46 = vld [vmem:[#allocation2 + $0x84] ss:$8 sps:$4 sm:$0xff] (%p1004_p11)  }
 0x2f1   : >> { %v2891_v33 = vpop.permute.xlu1 %2890  ;;  %3736 = vmatprep.subr.bf16.mxu0 (%p1004_p11), %v5989_v1  ;;  %5647 = vmatprep.subr.bf16.mxu1 (%p1004_p11), %v5989_v1 }
 0x2f2   : >> { %2957 = vst.msk [vmem:[#allocation2 + $0xf8] sm:$0xf] %vm597_vm10, %v2891_v33  ;;  %v7886_v2 = vld [vmem:[#allocation2 + $0xe0] ss:$8 sps:$4 sm:$0xff] (%p1004_p11)  }
 0x2f3   : >> { %3101 = vst.msk [vmem:[#allocation2 + $0xf8] sm:$0xf] %vm742_vm8, %v7548_v12  ;;  %v5838_v12 = vld [vmem:[%s8252_s1 + $0x1610] sm:$0xff] (%p1004_p11)   ;;  %v5911_v33 = vld [vmem:[%s8252_s1 + $0x15a0] sm:$0xff] (%p1004_p11)  }
 0x2f4   : >> { %v2893_v11 = vpop.permute.xlu0 %2892  ;;  %3737 = vmatpush1.bf16.msra.mxu0 (%p1004_p11), %v5831_v25  ;;  %5659 = vmatpush1.bf16.msra.mxu1 (%p1004_p11), %v5831_v25  ;;  %v7912_v25 = vld [vmem:[#allocation2 + $0x104] ss:$8 sps:$4 sm:$0xff] (%p1004_p11)  }
 0x2f5   : >> { %2958 = vst.msk [vmem:[#allocation2 + $0x100] sm:$0xf] %vm597_vm10, %v2893_v11  ;;  %3738 = vmatprep.subr.bf16.mxu0 (%p1004_p11), %v5989_v1  ;;  %5648 = vmatprep.subr.bf16.mxu1 (%p1004_p11), %v5989_v1  ;;  %v5912_v11 = vld [vmem:[%s8252_s1 + $0x1660] sm:$0xff] (%p1004_p11)  }
 0x2f6   : >> { %3102 = vst.msk [vmem:[#allocation2 + $0x100] sm:$0xf] %vm742_vm8, %v7569_v0  ;;  %1006 = sbr.rel (!%p1004_p11) target bundleno = 204 (0xcc), region = 81  ;;  %v7780_v0 = vld [vmem:[#allocation2 + $0xb4] ss:$8 sps:$4 sm:$0xff] (%p1004_p11)  }
 0x2f8   : >> { %v2895_v14 = vpop.permute.xlu1 %2894  ;;  %3739 = vmatpush1.bf16.msra.mxu0 (%p1004_p11), %v5832_v13  ;;  %5660 = vmatpush1.bf16.msra.mxu1 (%p1004_p11), %v5832_v13  ;;  %v5908_v13 = vld [vmem:[#allocation2 + $0x80] ss:$8 sps:$4 sm:$0xff] (%p1004_p11)  }
 0x2f9   : >> { %2959 = vst.msk [vmem:[#allocation2 + $0x108] sm:$0xf] %vm597_vm10, %v2895_v14  ;;  %3740 = vmatprep.subr.bf16.mxu0 (%p1004_p11), %v5989_v1  ;;  %5649 = vmatprep.subr.bf16.mxu1 (%p1004_p11), %v5989_v1  ;;  %v5899_v14 = vld [vmem:[#allocation2 + $0x70] ss:$8 sps:$4 sm:$0xff] (%p1004_p11)  }
 0x2fa   : >> { %3103 = vst.msk [vmem:[#allocation2 + $0x108] sm:$0xf] %vm742_vm8, %v7571_v41  ;;  %v5865_v41 = vld [vmem:[%s8252_s1 + $0x1580] sm:$0xff] (%p1004_p11)   ;;  %v7910_v38 = vld [vmem:[#allocation2 + $0xf0] ss:$8 sps:$4 sm:$0xff] (%p1004_p11)  }
 0x2fc   : > { %3741 = vmatpush1.bf16.msra.mxu0 %v5833_v53  ;;  %5661 = vmatpush1.bf16.msra.mxu1 %v5833_v53 }
 0x2fd   : > { %3742 = vmatprep.subr.bf16.mxu0 %v5989_v1  ;;  %5650 = vmatprep.subr.bf16.mxu1 %v5989_v1 }
 0x300   : > { %3743 = vmatpush1.bf16.msra.mxu0 %v5834_v49  ;;  %5662 = vmatpush1.bf16.msra.mxu1 %v5834_v49  ;;  %v5913_v49 = vld [vmem:[#allocation2] ss:$8 sps:$4 sm:$0xff]  }
 0x301   : > { %3744 = vmatprep.subr.bf16.mxu0 %v5989_v1  ;;  %5651 = vmatprep.subr.bf16.mxu1 %v5989_v1  ;;  %v7918_v53 = vld [vmem:[#allocation2 + $0x100] ss:$8 sps:$4 sm:$0xff]  }
 0x304   : > { %3745 = vmatpush1.bf16.msra.mxu0 %v5835_v5  ;;  %5663 = vmatpush1.bf16.msra.mxu1 %v5835_v5 }
 0x305   : > { %3746 = vmatprep.subr.bf16.mxu0 %v5989_v1  ;;  %5652 = vmatprep.subr.bf16.mxu1 %v5989_v1 }
 0x308   : > { %3747 = vmatpush1.bf16.msra.mxu0 %v5836_v27  ;;  %5664 = vmatpush1.bf16.msra.mxu1 %v5836_v27 }
 0x309   : > { %3756 = vmatprep.subr.bf16.mxu0 %v5989_v1  ;;  %5653 = vmatprep.subr.bf16.mxu1 %v5989_v1 }
 0x30c   : > { %3757 = vmatpush2.bf16.msra.mxu0 %v5837_v47  ;;  %5665 = vmatpush2.bf16.msra.mxu1 %v5837_v47 }
 0x30d   : > { %3758 = vmatprep.subr.bf16.mxu0 %v5989_v1  ;;  %5654 = vmatprep.subr.bf16.mxu1 %v5989_v1 }
 0x310   : > { %3759 = vmatpush2.bf16.msra.mxu0 %v5838_v12  ;;  %5666 = vmatpush2.bf16.msra.mxu1 %v5838_v12 }
 0x311   : > { %3760 = vmatprep.subr.bf16.mxu0 %v5989_v1  ;;  %5655 = vmatprep.subr.bf16.mxu1 %v5989_v1 }
 0x314   : > { %3761 = vmatpush2.bf16.msra.mxu0 %v5839_v54  ;;  %5667 = vmatpush2.bf16.msra.mxu1 %v5839_v54 }
 0x315   : > { %3762 = vmatprep.subr.bf16.mxu0 %v5989_v1  ;;  %5656 = vmatprep.subr.bf16.mxu1 %v5989_v1 }
 0x318   : > { %3763 = vmatpush2.bf16.msra.mxu0 %v5840_v44  ;;  %5668 = vmatpush2.bf16.msra.mxu1 %v5840_v44 }
 0x319   : > { %4157 = vmatprep.subr.bf16.mxu1 %v5989_v1  ;;  %4615 = vmatprep.subr.bf16.mxu0 %v5989_v1 }
 0x31b   : > { %3765 = vmatmul.mubr.bf16.vlgmr.msra.gmra.mxu0 %v7736_v40  ;;  %3829 = vmatmul.mubr.bf16.vlgmr.msra.gmra.mxu1 %v7738_v10 }
 0x31c   : > { %4158 = vmatpush1.bf16.msra.mxu1 %v5847_v42  ;;  %4616 = vmatpush1.bf16.msra.mxu0 %v5848_v36 }
 0x31d   : > { %4159 = vmatprep.subr.bf16.mxu1 %v5989_v1  ;;  %5445 = vmatprep.mubr.msk.bf16.mxu0 %vm1365_vm11, %v7748_v32 }
 0x31e   : > { %5453 = vmatprep.mubr.msk.bf16.mxu1 %vm1365_vm11, %v7750_v59  ;;  %4617 = vmatprep.subr.bf16.mxu0 %v5989_v1 }
 0x320   : > { %4160 = vmatpush1.bf16.msra.mxu1 %v5853_v9  ;;  %4618 = vmatpush1.bf16.msra.mxu0 %v5856_v58 }
 0x321   : > { %4161 = vmatprep.subr.bf16.mxu1 %v5989_v1  ;;  %4619 = vmatprep.subr.bf16.mxu0 %v5989_v1 }
 0x323   : > { %3773 = vmatmul.mubr.bf16.gmra.mxu0 %v7763_v6  ;;  %3837 = vmatmul.mubr.bf16.gmra.mxu1 %v7767_v57 }
 0x324   : > { %4162 = vmatpush1.bf16.msra.mxu1 %v5857_v22  ;;  %4620 = vmatpush1.bf16.msra.mxu0 %v5858_v16 }
 0x325   : > { %5446 = vmatprep.mubr.msk.bf16.mxu0 %vm1365_vm11, %v7776_v7  ;;  %5454 = vmatprep.mubr.msk.bf16.mxu1 %vm1365_vm11, %v7780_v0 }
 0x326   : > { %4163 = vmatprep.subr.bf16.mxu1 %v5989_v1  ;;  %4621 = vmatprep.subr.bf16.mxu0 %v5989_v1 }
 0x328   : > { %4164 = vmatpush1.bf16.msra.mxu1 %v5865_v41  ;;  %4622 = vmatpush1.bf16.msra.mxu0 %v5866_v48 }
 0x329   : > { %4165 = vmatprep.subr.bf16.mxu1 %v5989_v1  ;;  %4623 = vmatprep.subr.bf16.mxu0 %v5989_v1 }
 0x32b   : > { %3781 = vmatmul.mubr.bf16.gmra.mxu0 %v7796_v43  ;;  %3845 = vmatmul.mubr.bf16.gmra.mxu1 %v7798_v26 }
 0x32c   : > { %5447 = vmatprep.mubr.msk.bf16.mxu0 %vm1365_vm11, %v7800_v35  ;;  %5455 = vmatprep.mubr.msk.bf16.mxu1 %vm1365_vm11, %v7802_v24 }
 0x32d   : > { %4166 = vmatpush1.bf16.msra.mxu1 %v5871_v39  ;;  %4624 = vmatpush1.bf16.msra.mxu0 %v5874_v30 }
 0x32e   : > { %4167 = vmatprep.subr.bf16.mxu1 %v5989_v1  ;;  %4625 = vmatprep.subr.bf16.mxu0 %v5989_v1 }
 0x331   : > { %4168 = vmatpush1.bf16.msra.mxu1 %v5875_v45  ;;  %4626 = vmatpush1.bf16.msra.mxu0 %v5876_v19 }
 0x332   : > { %4169 = vmatprep.subr.bf16.mxu1 %v5989_v1  ;;  %4627 = vmatprep.subr.bf16.mxu0 %v5989_v1 }
 0x333   : > { %3789 = vmatmul.mubr.bf16.gmra.mxu0 %v7826_v34  ;;  %3853 = vmatmul.mubr.bf16.gmra.mxu1 %v7828_v4 }
 0x334   : > { %5448 = vmatprep.mubr.msk.bf16.mxu0 %vm1365_vm11, %v7830_v17  ;;  %5456 = vmatprep.mubr.msk.bf16.mxu1 %vm1365_vm11, %v7832_v21 }
 0x335   : > { %4170 = vmatpush1.bf16.msra.mxu1 %v5883_v3  ;;  %4628 = vmatpush1.bf16.msra.mxu0 %v5884_v61 }
 0x336   : > { %4171 = vmatprep.subr.bf16.mxu1 %v5989_v1  ;;  %4629 = vmatprep.subr.bf16.mxu0 %v5989_v1 }
 0x339   : > { %4172 = vmatpush1.bf16.msra.mxu1 %v5889_v31  ;;  %4630 = vmatpush1.bf16.msra.mxu0 %v5892_v56 }
 0x33a   : > { %4181 = vmatprep.subr.bf16.mxu1 %v5989_v1  ;;  %4639 = vmatprep.subr.bf16.mxu0 %v5989_v1 }
 0x33b   : > { %3797 = vmatmul.mubr.bf16.gmra.mxu0 %v7856_v50  ;;  %3861 = vmatmul.mubr.bf16.gmra.mxu1 %v7858_v52 }
 0x33c   : > { %5449 = vmatprep.mubr.msk.bf16.mxu0 %vm1365_vm11, %v7860_v55  ;;  %5457 = vmatprep.mubr.msk.bf16.mxu1 %vm1365_vm11, %v7862_v37 }
 0x33d   : > { %4182 = vmatpush2.bf16.msra.mxu1 %v5893_v23  ;;  %4640 = vmatpush2.bf16.msra.mxu0 %v5894_v18 }
 0x33e   : > { %4183 = vmatprep.subr.bf16.mxu1 %v5989_v1  ;;  %4641 = vmatprep.subr.bf16.mxu0 %v5989_v1 }
 0x341   : > { %4184 = vmatpush2.bf16.msra.mxu1 %v5901_v15  ;;  %4642 = vmatpush2.bf16.msra.mxu0 %v5902_v60 }
 0x342   : > { %4185 = vmatprep.subr.bf16.mxu1 %v5989_v1  ;;  %4643 = vmatprep.subr.bf16.mxu0 %v5989_v1 }
 0x343   : > { %3805 = vmatmul.mubr.bf16.gmra.mxu0 %v5890_v29  ;;  %3869 = vmatmul.mubr.bf16.gmra.mxu1 %v7886_v2 }
 0x344   : > { %5450 = vmatprep.mubr.msk.bf16.mxu0 %vm1365_vm11, %v5895_v20  ;;  %5458 = vmatprep.mubr.msk.bf16.mxu1 %vm1365_vm11, %v7888_v51 }
 0x345   : > { %4186 = vmatpush2.bf16.msra.mxu1 %v5907_v62  ;;  %4644 = vmatpush2.bf16.msra.mxu0 %v5910_v8 }
 0x346   : > { %4187 = vmatprep.subr.bf16.mxu1 %v5989_v1  ;;  %4645 = vmatprep.subr.bf16.mxu0 %v5989_v1  ;;  %v5915_v1 = vld [vmem:[#allocation2 + $0x4] ss:$8 sps:$4 sm:$0xff]  }
 0x349   : > { %4188 = vmatpush2.bf16.msra.mxu1 %v5911_v33  ;;  %4646 = vmatpush2.bf16.msra.mxu0 %v5912_v11 }
 0x34b   : > { %3813 = vmatmul.mubr.bf16.gmra.mxu0 %v5899_v14  ;;  %3877 = vmatmul.mubr.bf16.gmra.mxu1 %v7910_v38 }
 0x34c   : > { %5451 = vmatprep.mubr.msk.bf16.mxu0 %vm1365_vm11, %v5903_v46  ;;  %5459 = vmatprep.mubr.msk.bf16.mxu1 %vm1365_vm11, %v7912_v25 }
 0x353   : > { %3821 = vmatmul.mubr.bf16.gmra.mxu0 %v5908_v13  ;;  %3885 = vmatmul.mubr.bf16.gmra.mxu1 %v7918_v53 }
 0x354   : > { %5504 = vmatprep.mubr.msk.bf16.mxu1 %vm1365_vm11, %v5915_v1  ;;  %5564 = vmatprep.mubr.msk.bf16.mxu0 %vm1365_vm11, %v7748_v32 }
 0x35b   : > { %4190 = vmatmul.mubr.bf16.vlgmr.msra.gmra.mxu1 %v5913_v49  ;;  %4648 = vmatmul.mubr.bf16.vlgmr.msra.gmra.mxu0 %v7763_v6 }
 0x35c   : > { %5505 = vmatprep.mubr.msk.bf16.mxu1 %vm1365_vm11, %v7688_v63  ;;  %5565 = vmatprep.mubr.msk.bf16.mxu0 %vm1365_vm11, %v7776_v7  ;;  %v5916_v63 = vld [vmem:[#allocation2 + $0x114] ss:$8 sps:$4 sm:$0xff]  }
 0x363   : > { %4198 = vmatmul.mubr.bf16.gmra.mxu1 %v7736_v40  ;;  %4656 = vmatmul.mubr.bf16.gmra.mxu0 %v7796_v43 }
 0x364   : > { %5506 = vmatprep.mubr.msk.bf16.mxu1 %vm1365_vm11, %v7748_v32  ;;  %5566 = vmatprep.mubr.msk.bf16.mxu0 %vm1365_vm11, %v7800_v35 }
 0x36b   : > { %4206 = vmatmul.mubr.bf16.gmra.mxu1 %v7763_v6  ;;  %4664 = vmatmul.mubr.bf16.gmra.mxu0 %v7826_v34 }
 0x36c   : > { %5507 = vmatprep.mubr.msk.bf16.mxu1 %vm1365_vm11, %v7776_v7  ;;  %5567 = vmatprep.mubr.msk.bf16.mxu0 %vm1365_vm11, %v7830_v17 }
 0x373   : > { %4214 = vmatmul.mubr.bf16.gmra.mxu1 %v7796_v43  ;;  %4672 = vmatmul.mubr.bf16.gmra.mxu0 %v7856_v50 }
 0x374   : > { %5508 = vmatprep.mubr.msk.bf16.mxu1 %vm1365_vm11, %v7800_v35  ;;  %5568 = vmatprep.mubr.msk.bf16.mxu0 %vm1365_vm11, %v7860_v55 }
 0x37b   : > { %4222 = vmatmul.mubr.bf16.gmra.mxu1 %v7826_v34  ;;  %4680 = vmatmul.mubr.bf16.gmra.mxu0 %v5890_v29 }
 0x37c   : > { %5509 = vmatprep.mubr.msk.bf16.mxu1 %vm1365_vm11, %v7830_v17  ;;  %5569 = vmatprep.mubr.msk.bf16.mxu0 %vm1365_vm11, %v5895_v20 }
 0x383   : > { %4230 = vmatmul.mubr.bf16.gmra.mxu1 %v7856_v50  ;;  %4688 = vmatmul.mubr.bf16.gmra.mxu0 %v5899_v14 }
 0x384   : > { %5510 = vmatprep.mubr.msk.bf16.mxu1 %vm1365_vm11, %v7860_v55  ;;  %5570 = vmatprep.mubr.msk.bf16.mxu0 %vm1365_vm11, %v5903_v46 }
 0x38b   : > { %4238 = vmatmul.mubr.bf16.gmra.mxu1 %v5890_v29  ;;  %4696 = vmatmul.mubr.bf16.gmra.mxu0 %v5908_v13 }
 0x38c   : > { %5511 = vmatprep.mubr.msk.bf16.mxu1 %vm1365_vm11, %v5895_v20  ;;  %5571 = vmatprep.mubr.msk.bf16.mxu0 %vm1365_vm11, %v7693_v28 }
 0x393   : > { %4246 = vmatmul.mubr.bf16.gmra.mxu1 %v5899_v14  ;;  %4704 = vmatmul.mubr.bf16.gmra.mxu0 %v7738_v10 }
 0x394   : > { %5512 = vmatprep.mubr.msk.bf16.mxu1 %vm1365_vm11, %v5903_v46  ;;  %5572 = vmatprep.mubr.msk.bf16.mxu0 %vm1365_vm11, %v7750_v59 }
 0x39b   : > { %4254 = vmatmul.mubr.bf16.gmra.mxu1 %v5908_v13  ;;  %4712 = vmatmul.mubr.bf16.gmra.mxu0 %v7767_v57 }
 0x39c   : > { %5513 = vmatprep.mubr.msk.bf16.mxu1 %vm1365_vm11, %v7693_v28  ;;  %5573 = vmatprep.mubr.msk.bf16.mxu0 %vm1365_vm11, %v7780_v0  ;;  %v5918_v28 = vld [vmem:[#allocation2 + $0x110] ss:$8 sps:$4 sm:$0xff]  }
 0x3a3   : > { %4262 = vmatmul.mubr.bf16.gmra.mxu1 %v7738_v10  ;;  %4720 = vmatmul.mubr.bf16.gmra.mxu0 %v7798_v26 }
 0x3a4   : > { %5514 = vmatprep.mubr.msk.bf16.mxu1 %vm1365_vm11, %v7750_v59  ;;  %5574 = vmatprep.mubr.msk.bf16.mxu0 %vm1365_vm11, %v7802_v24 }
 0x3ab   : > { %4270 = vmatmul.mubr.bf16.gmra.mxu1 %v7767_v57  ;;  %4728 = vmatmul.mubr.bf16.gmra.mxu0 %v7828_v4 }
 0x3ac   : > { %5515 = vmatprep.mubr.msk.bf16.mxu1 %vm1365_vm11, %v7780_v0  ;;  %5575 = vmatprep.mubr.msk.bf16.mxu0 %vm1365_vm11, %v7832_v21 }
 0x3b3   : > { %4278 = vmatmul.mubr.bf16.gmra.mxu1 %v7798_v26  ;;  %4736 = vmatmul.mubr.bf16.gmra.mxu0 %v7858_v52 }
 0x3b4   : > { %5516 = vmatprep.mubr.msk.bf16.mxu1 %vm1365_vm11, %v7802_v24  ;;  %5576 = vmatprep.mubr.msk.bf16.mxu0 %vm1365_vm11, %v7862_v37 }
 0x3bb   : > { %4286 = vmatmul.mubr.bf16.gmra.mxu1 %v7828_v4  ;;  %4744 = vmatmul.mubr.bf16.gmra.mxu0 %v7886_v2 }
 0x3bc   : > { %5517 = vmatprep.mubr.msk.bf16.mxu1 %vm1365_vm11, %v7832_v21  ;;  %5577 = vmatprep.mubr.msk.bf16.mxu0 %vm1365_vm11, %v7888_v51 }
 0x3c3   : > { %4294 = vmatmul.mubr.bf16.gmra.mxu1 %v7858_v52  ;;  %4752 = vmatmul.mubr.bf16.gmra.mxu0 %v7910_v38 }
 0x3c4   : > { %5518 = vmatprep.mubr.msk.bf16.mxu1 %vm1365_vm11, %v7862_v37  ;;  %5578 = vmatprep.mubr.msk.bf16.mxu0 %vm1365_vm11, %v7912_v25 }
 0x3cb   : > { %4302 = vmatmul.mubr.bf16.gmra.mxu1 %v7886_v2  ;;  %4760 = vmatmul.mubr.bf16.gmra.mxu0 %v7918_v53 }
 0x3cc   : > { %5519 = vmatprep.mubr.msk.bf16.mxu1 %vm1365_vm11, %v7888_v51  ;;  %5579 = vmatprep.mubr.msk.bf16.mxu0 %vm1365_vm11, %v5916_v63 }
 0x3d3   : > { %4310 = vmatmul.mubr.bf16.gmra.mxu1 %v7910_v38  ;;  %4768 = vmatmul.mubr.bf16.gmra.mxu0 %v5918_v28 }
 0x3db   : > { %v8003_v5 = vpop.f32.mrf.mxu0  ;;  %v8005_v27 = vpop.f32.mrf.mxu1 }
 0x3dd   : > { %v3768_v47 = vpop.f32.mrf.mxu0  ;;  %v3832_v12 = vpop.f32.mrf.mxu1 }
 0x3df   : > { %v8007_v54 = vpop.f32.mrf.mxu0  ;;  %v8009_v44 = vpop.f32.mrf.mxu1 }
 0x3e1   : > { %v3771_v40 = vpop.f32.mrf.mxu0  ;;  %v3835_v10 = vpop.f32.mrf.mxu1 }
 0x3e2   : > { %v8071_v10 = vld [vmem:[%s8253_s2 + $0x13] ss:$0 sm:$0xff] }
 0x3e3   : > { %v8011_v42 = vpop.f32.mrf.mxu0  ;;  %v8013_v36 = vpop.f32.mrf.mxu1 }
 0x3e5   : > { %v3776_v32 = vpop.f32.mrf.mxu0  ;;  %v3840_v59 = vpop.f32.mrf.mxu1 }
 0x3e7   : > { %v8015_v9 = vpop.f32.mrf.mxu0  ;;  %v8017_v58 = vpop.f32.mrf.mxu1 }
 0x3e9   : > { %v3779_v6 = vpop.f32.mrf.mxu0  ;;  %v3843_v57 = vpop.f32.mrf.mxu1 }
 0x3eb   : > { %v8019_v22 = vpop.f32.mrf.mxu0  ;;  %v8021_v16 = vpop.f32.mrf.mxu1 }
 0x3ed   : > { %v3784_v7 = vpop.f32.mrf.mxu0  ;;  %v3848_v0 = vpop.f32.mrf.mxu1 }
 0x3ef   : > { %v8023_v41 = vpop.f32.mrf.mxu0  ;;  %v8025_v48 = vpop.f32.mrf.mxu1 }
 0x3f1   : > { %v3787_v43 = vpop.f32.mrf.mxu0  ;;  %v3851_v26 = vpop.f32.mrf.mxu1 }
 0x3f3   : > { %v8027_v35 = vpop.f32.mrf.mxu0  ;;  %v8029_v24 = vpop.f32.mrf.mxu1 }
 0x3f5   : > { %v3792_v39 = vpop.f32.mrf.mxu0  ;;  %v3856_v30 = vpop.f32.mrf.mxu1 }
 0x3f7   : > { %v8031_v45 = vpop.f32.mrf.mxu0  ;;  %v8033_v19 = vpop.f32.mrf.mxu1 }
 0x3f9   : > { %v3795_v34 = vpop.f32.mrf.mxu0  ;;  %v3859_v4 = vpop.f32.mrf.mxu1 }
 0x3fb   : > { %v8035_v17 = vpop.f32.mrf.mxu0  ;;  %v8037_v21 = vpop.f32.mrf.mxu1 }
 0x3fd   : > { %v3800_v3 = vpop.f32.mrf.mxu0  ;;  %v3864_v61 = vpop.f32.mrf.mxu1 }
 0x3ff   : > { %v8039_v31 = vpop.f32.mrf.mxu0  ;;  %v8041_v56 = vpop.f32.mrf.mxu1 }
 0x401   : > { %v3803_v50 = vpop.f32.mrf.mxu0  ;;  %v3867_v52 = vpop.f32.mrf.mxu1 }
 0x403   : > { %v8043_v55 = vpop.f32.mrf.mxu0  ;;  %v8045_v37 = vpop.f32.mrf.mxu1 }
 0x405   : > { %v3808_v23 = vpop.f32.mrf.mxu0  ;;  %v3872_v18 = vpop.f32.mrf.mxu1 }
 0x407   : > { %v8047_v15 = vpop.f32.mrf.mxu0  ;;  %v8049_v60 = vpop.f32.mrf.mxu1 }
 0x409   : > { %v3811_v29 = vpop.f32.mrf.mxu0  ;;  %v3875_v2 = vpop.f32.mrf.mxu1 }
 0x40b   : > { %v8051_v20 = vpop.f32.mrf.mxu0  ;;  %v8053_v51 = vpop.f32.mrf.mxu1 }
 0x40d   : > { %v3816_v62 = vpop.f32.mrf.mxu0  ;;  %v3880_v8 = vpop.f32.mrf.mxu1 }
 0x40f   : > { %v8055_v33 = vpop.f32.mrf.mxu0  ;;  %v8057_v11 = vpop.f32.mrf.mxu1 }
 0x411   : > { %v3819_v14 = vpop.f32.mrf.mxu0  ;;  %v3883_v38 = vpop.f32.mrf.mxu1 }
 0x413   : > { %v8059_v46 = vpop.f32.mrf.mxu0  ;;  %v8061_v25 = vpop.f32.mrf.mxu1 }
 0x415   : > { %v3824_v13 = vpop.f32.mrf.mxu0  ;;  %v3888_v53 = vpop.f32.mrf.mxu1 }
 0x417   : > { %v8063_v1 = vpop.f32.mrf.mxu0  ;;  %v8065_v49 = vpop.f32.mrf.mxu1 }
 0x419   : > { %v3827_v63 = vpop.f32.mrf.mxu0  ;;  %v3891_v28 = vpop.f32.mrf.mxu1 }
 0x41b   : > { %v4191_v47 = vpop.f32.mrf.mxu1  ;;  %v4649_v12 = vpop.f32.mrf.mxu0 }
 0x41c   : > { %v4192_v40 = vadd.f32 %v4191_v47, %v8003_v5 }
 0x41d   : > { %v4193_v32 = vpop.f32.mrf.mxu1  ;;  %v4651_v59 = vpop.f32.mrf.mxu0 }
 0x41e   : > { %v4776_v6 = vadd.f32 %v4649_v12, %v4192_v40 }
 0x41f   : > { %v4194_v57 = vpop.f32.mrf.mxu1  ;;  %v4652_v7 = vpop.f32.mrf.mxu0 }
 0x420   : > { %v4814_v0 = vadd.f32 %v8071_v10, %v4776_v6  ;;  %v4195_v43 = vadd.f32 %v4194_v57, %v8007_v54 }
 0x421   : > { %v4196_v26 = vpop.f32.mrf.mxu1  ;;  %v4654_v39 = vpop.f32.mrf.mxu0 }
 0x422   : > { %4846 = vst.msk [vmem:[%s6870_s5] sm:$0xff] %vm1365_vm11, %v4814_v0  ;;  %v4777_v5 = vadd.f32 %v4652_v7, %v4195_v43 }
 0x423   : > { %v4199_v30 = vpop.f32.mrf.mxu1  ;;  %v4657_v34 = vpop.f32.mrf.mxu0 }
 0x424   : > { %v4815_v4 = vadd.f32 %v8071_v10, %v4777_v5  ;;  %v4200_v3 = vadd.f32 %v4199_v30, %v8011_v42 }
 0x425   : > { %v4201_v61 = vpop.f32.mrf.mxu1  ;;  %v4659_v50 = vpop.f32.mrf.mxu0 }
 0x426   : > { %4847 = vst.msk [vmem:[%s6870_s5 + $0x8] sm:$0xff] %vm1365_vm11, %v4815_v4  ;;  %v4778_v52 = vadd.f32 %v4657_v34, %v4200_v3 }
 0x427   : > { %v4202_v23 = vpop.f32.mrf.mxu1  ;;  %v4660_v54 = vpop.f32.mrf.mxu0 }
 0x428   : > { %v4816_v18 = vadd.f32 %v8071_v10, %v4778_v52  ;;  %v4203_v29 = vadd.f32 %v4202_v23, %v8015_v9 }
 0x429   : > { %v4204_v2 = vpop.f32.mrf.mxu1  ;;  %v4662_v62 = vpop.f32.mrf.mxu0 }
 0x42a   : > { %4848 = vst.msk [vmem:[%s6870_s5 + $0x10] sm:$0xff] %vm1365_vm11, %v4816_v18  ;;  %v4779_v8 = vadd.f32 %v4660_v54, %v4203_v29 }
 0x42b   : > { %v4207_v14 = vpop.f32.mrf.mxu1  ;;  %v4665_v42 = vpop.f32.mrf.mxu0 }
 0x42c   : > { %v4817_v38 = vadd.f32 %v8071_v10, %v4779_v8  ;;  %v4208_v13 = vadd.f32 %v4207_v14, %v8019_v22 }
 0x42d   : > { %v4209_v53 = vpop.f32.mrf.mxu1  ;;  %v4667_v63 = vpop.f32.mrf.mxu0 }
 0x42e   : > { %4849 = vst.msk [vmem:[%s6870_s5 + $0x18] sm:$0xff] %vm1365_vm11, %v4817_v38  ;;  %v4780_v28 = vadd.f32 %v4665_v42, %v4208_v13 }
 0x42f   : > { %v4210_v47 = vpop.f32.mrf.mxu1  ;;  %v4668_v9 = vpop.f32.mrf.mxu0 }
 0x430   : > { %v4818_v12 = vadd.f32 %v8071_v10, %v4780_v28  ;;  %v4211_v40 = vadd.f32 %v4210_v47, %v8023_v41 }
 0x431   : > { %v4212_v32 = vpop.f32.mrf.mxu1  ;;  %v4670_v59 = vpop.f32.mrf.mxu0 }
 0x432   : > { %4850 = vst.msk [vmem:[%s6870_s5 + $0x20] sm:$0xff] %vm1365_vm11, %v4818_v12  ;;  %v4781_v6 = vadd.f32 %v4668_v9, %v4211_v40 }
 0x433   : > { %v4215_v57 = vpop.f32.mrf.mxu1  ;;  %v4673_v22 = vpop.f32.mrf.mxu0 }
 0x434   : > { %v4819_v7 = vadd.f32 %v8071_v10, %v4781_v6  ;;  %v4216_v0 = vadd.f32 %v4215_v57, %v8027_v35 }
 0x435   : > { %v4217_v43 = vpop.f32.mrf.mxu1  ;;  %v4675_v26 = vpop.f32.mrf.mxu0 }
 0x436   : > { %4851 = vst.msk [vmem:[%s6870_s5 + $0x28] sm:$0xff] %vm1365_vm11, %v4819_v7  ;;  %v4782_v39 = vadd.f32 %v4673_v22, %v4216_v0 }
 0x437   : > { %v4218_v5 = vpop.f32.mrf.mxu1  ;;  %v4676_v41 = vpop.f32.mrf.mxu0 }
 0x438   : > { %v4820_v30 = vadd.f32 %v8071_v10, %v4782_v39  ;;  %v4219_v34 = vadd.f32 %v4218_v5, %v8031_v45 }
 0x439   : > { %v4220_v4 = vpop.f32.mrf.mxu1  ;;  %v4678_v3 = vpop.f32.mrf.mxu0 }
 0x43a   : > { %4852 = vst.msk [vmem:[%s6870_s5 + $0x30] sm:$0xff] %vm1365_vm11, %v4820_v30  ;;  %v4783_v61 = vadd.f32 %v4676_v41, %v4219_v34 }
 0x43b   : > { %v4223_v50 = vpop.f32.mrf.mxu1  ;;  %v4681_v35 = vpop.f32.mrf.mxu0 }
 0x43c   : > { %v4821_v52 = vadd.f32 %v8071_v10, %v4783_v61  ;;  %v4224_v23 = vadd.f32 %v4223_v50, %v8035_v17 }
 0x43d   : > { %v4225_v54 = vpop.f32.mrf.mxu1  ;;  %v4683_v18 = vpop.f32.mrf.mxu0 }
 0x43e   : > { %4853 = vst.msk [vmem:[%s6870_s5 + $0x38] sm:$0xff] %vm1365_vm11, %v4821_v52  ;;  %v4784_v29 = vadd.f32 %v4681_v35, %v4224_v23 }
 0x43f   : > { %v4226_v2 = vpop.f32.mrf.mxu1  ;;  %v4684_v45 = vpop.f32.mrf.mxu0 }
 0x440   : > { %v4822_v62 = vadd.f32 %v8071_v10, %v4784_v29  ;;  %v4227_v8 = vadd.f32 %v4226_v2, %v8039_v31 }
 0x441   : > { %v4228_v14 = vpop.f32.mrf.mxu1  ;;  %v4686_v42 = vpop.f32.mrf.mxu0 }
 0x442   : > { %4854 = vst.msk [vmem:[%s6870_s5 + $0x40] sm:$0xff] %vm1365_vm11, %v4822_v62  ;;  %v4785_v38 = vadd.f32 %v4684_v45, %v4227_v8 }
 0x443   : > { %v4231_v13 = vpop.f32.mrf.mxu1  ;;  %v4689_v17 = vpop.f32.mrf.mxu0 }
 0x444   : > { %v4823_v53 = vadd.f32 %v8071_v10, %v4785_v38  ;;  %v4232_v63 = vadd.f32 %v4231_v13, %v8043_v55 }
 0x445   : > { %v4233_v28 = vpop.f32.mrf.mxu1  ;;  %v4691_v47 = vpop.f32.mrf.mxu0 }
 0x446   : > { %4855 = vst.msk [vmem:[%s6870_s5 + $0x48] sm:$0xff] %vm1365_vm11, %v4823_v53  ;;  %v4786_v9 = vadd.f32 %v4689_v17, %v4232_v63 }
 0x447   : > { %v4234_v12 = vpop.f32.mrf.mxu1  ;;  %v4692_v31 = vpop.f32.mrf.mxu0 }
 0x448   : > { %v4824_v40 = vadd.f32 %v8071_v10, %v4786_v9  ;;  %v4235_v32 = vadd.f32 %v4234_v12, %v8047_v15 }
 0x449   : > { %v4236_v59 = vpop.f32.mrf.mxu1  ;;  %v4694_v6 = vpop.f32.mrf.mxu0 }
 0x44a   : > { %4856 = vst.msk [vmem:[%s6870_s5 + $0x50] sm:$0xff] %vm1365_vm11, %v4824_v40  ;;  %v4787_v57 = vadd.f32 %v4692_v31, %v4235_v32 }
 0x44b   : > { %v4239_v22 = vpop.f32.mrf.mxu1  ;;  %v4697_v55 = vpop.f32.mrf.mxu0 }
 0x44c   : > { %v4825_v7 = vadd.f32 %v8071_v10, %v4787_v57  ;;  %v4240_v0 = vadd.f32 %v4239_v22, %v8051_v20 }
 0x44d   : > { %v4241_v43 = vpop.f32.mrf.mxu1  ;;  %v4699_v26 = vpop.f32.mrf.mxu0 }
 0x44e   : > { %4857 = vst.msk [vmem:[%s6870_s5 + $0x58] sm:$0xff] %vm1365_vm11, %v4825_v7  ;;  %v4788_v39 = vadd.f32 %v4697_v55, %v4240_v0 }
 0x44f   : > { %v4242_v5 = vpop.f32.mrf.mxu1  ;;  %v4700_v15 = vpop.f32.mrf.mxu0 }
 0x450   : > { %v4826_v41 = vadd.f32 %v8071_v10, %v4788_v39  ;;  %v4243_v30 = vadd.f32 %v4242_v5, %v8055_v33 }
 0x451   : > { %v4244_v34 = vpop.f32.mrf.mxu1  ;;  %v4702_v4 = vpop.f32.mrf.mxu0 }
 0x452   : > { %4858 = vst.msk [vmem:[%s6870_s5 + $0x60] sm:$0xff] %vm1365_vm11, %v4826_v41  ;;  %v4789_v3 = vadd.f32 %v4700_v15, %v4243_v30 }
 0x453   : > { %v4247_v61 = vpop.f32.mrf.mxu1  ;;  %v4705_v20 = vpop.f32.mrf.mxu0 }
 0x454   : > { %v4827_v50 = vadd.f32 %v8071_v10, %v4789_v3  ;;  %v4248_v35 = vadd.f32 %v4247_v61, %v8059_v46 }
 0x455   : > { %v4249_v52 = vpop.f32.mrf.mxu1  ;;  %v4707_v23 = vpop.f32.mrf.mxu0 }
 0x456   : > { %4859 = vst.msk [vmem:[%s6870_s5 + $0x68] sm:$0xff] %vm1365_vm11, %v4827_v50  ;;  %v4790_v54 = vadd.f32 %v4705_v20, %v4248_v35 }
 0x457   : > { %v4250_v18 = vpop.f32.mrf.mxu1  ;;  %v4708_v33 = vpop.f32.mrf.mxu0 }
 0x458   : > { %v4828_v29 = vadd.f32 %v8071_v10, %v4790_v54  ;;  %v4251_v2 = vadd.f32 %v4250_v18, %v8063_v1 }
 0x459   : > { %v4252_v45 = vpop.f32.mrf.mxu1  ;;  %v4710_v62 = vpop.f32.mrf.mxu0 }
 0x45a   : > { %4860 = vst.msk [vmem:[%s6870_s5 + $0x70] sm:$0xff] %vm1365_vm11, %v4828_v29  ;;  %v4791_v8 = vadd.f32 %v4708_v33, %v4251_v2 }
 0x45b   : > { %v4255_v14 = vpop.f32.mrf.mxu1  ;;  %v4713_v46 = vpop.f32.mrf.mxu0 }
 0x45c   : > { %v4829_v42 = vadd.f32 %v8071_v10, %v4791_v8  ;;  %v4256_v38 = vadd.f32 %v4255_v14, %v8005_v27 }
 0x45d   : > { %v4257_v13 = vpop.f32.mrf.mxu1  ;;  %v4715_v17 = vpop.f32.mrf.mxu0 }
 0x45e   : > { %4861 = vst.msk [vmem:[%s6870_s5 + $0x78] sm:$0xff] %vm1365_vm11, %v4829_v42  ;;  %v4792_v53 = vadd.f32 %v4713_v46, %v4256_v38 }
 0x45f   : > { %v4258_v63 = vpop.f32.mrf.mxu1  ;;  %v4716_v1 = vpop.f32.mrf.mxu0 }
 0x460   : > { %v4830_v28 = vadd.f32 %v8071_v10, %v4792_v53  ;;  %v4259_v47 = vadd.f32 %v4258_v63, %v8009_v44 }
 0x461   : > { %v4260_v9 = vpop.f32.mrf.mxu1  ;;  %v4718_v12 = vpop.f32.mrf.mxu0 }
 0x462   : > { %4862 = vst.msk [vmem:[%s6870_s5 + $0x80] sm:$0xff] %vm1365_vm11, %v4830_v28  ;;  %v4793_v31 = vadd.f32 %v4716_v1, %v4259_v47 }
 0x463   : > { %v4263_v40 = vpop.f32.mrf.mxu1  ;;  %v4721_v27 = vpop.f32.mrf.mxu0 }
 0x464   : > { %v4831_v32 = vadd.f32 %v8071_v10, %v4793_v31  ;;  %v4264_v59 = vadd.f32 %v4263_v40, %v8013_v36 }
 0x465   : > { %v4265_v6 = vpop.f32.mrf.mxu1  ;;  %v4723_v57 = vpop.f32.mrf.mxu0 }
 0x466   : > { %4863 = vst.msk [vmem:[%s6870_s5 + $0x88] sm:$0xff] %vm1365_vm11, %v4831_v32  ;;  %v4794_v22 = vadd.f32 %v4721_v27, %v4264_v59 }
 0x467   : > { %v4266_v55 = vpop.f32.mrf.mxu1  ;;  %v4724_v44 = vpop.f32.mrf.mxu0 }
 0x468   : > { %v4832_v7 = vadd.f32 %v8071_v10, %v4794_v22  ;;  %v4267_v0 = vadd.f32 %v4266_v55, %v8017_v58 }
 0x469   : > { %v4268_v43 = vpop.f32.mrf.mxu1  ;;  %v4726_v26 = vpop.f32.mrf.mxu0 }
 0x46a   : > { %4864 = vst.msk [vmem:[%s6870_s5 + $0x90] sm:$0xff] %vm1365_vm11, %v4832_v7  ;;  %v4795_v39 = vadd.f32 %v4724_v44, %v4267_v0 }
 0x46b   : > { %v4271_v5 = vpop.f32.mrf.mxu1  ;;  %v4729_v36 = vpop.f32.mrf.mxu0 }
 0x46c   : > { %v4833_v15 = vadd.f32 %v8071_v10, %v4795_v39  ;;  %v4272_v41 = vadd.f32 %v4271_v5, %v8021_v16 }
 0x46d   : > { %v4273_v30 = vpop.f32.mrf.mxu1  ;;  %v4731_v34 = vpop.f32.mrf.mxu0 }
 0x46e   : > { %4865 = vst.msk [vmem:[%s6870_s5 + $0x98] sm:$0xff] %vm1365_vm11, %v4833_v15  ;;  %v4796_v4 = vadd.f32 %v4729_v36, %v4272_v41 }
 0x46f   : > { %v4274_v3 = vpop.f32.mrf.mxu1  ;;  %v4732_v58 = vpop.f32.mrf.mxu0 }
 0x470   : > { %v4834_v61 = vadd.f32 %v8071_v10, %v4796_v4  ;;  %v4275_v20 = vadd.f32 %v4274_v3, %v8025_v48 }
 0x471   : > { %v4276_v50 = vpop.f32.mrf.mxu1  ;;  %v4734_v35 = vpop.f32.mrf.mxu0 }
 0x472   : > { %4866 = vst.msk [vmem:[%s6870_s5 + $0xa0] sm:$0xff] %vm1365_vm11, %v4834_v61  ;;  %v4797_v52 = vadd.f32 %v4732_v58, %v4275_v20 }
 0x473   : > { %v4279_v23 = vpop.f32.mrf.mxu1  ;;  %v4737_v16 = vpop.f32.mrf.mxu0 }
 0x474   : > { %v4835_v54 = vadd.f32 %v8071_v10, %v4797_v52  ;;  %v4280_v18 = vadd.f32 %v4279_v23, %v8029_v24 }
 0x475   : > { %v4281_v33 = vpop.f32.mrf.mxu1  ;;  %v4739_v29 = vpop.f32.mrf.mxu0 }
 0x476   : > { %4867 = vst.msk [vmem:[%s6870_s5 + $0xa8] sm:$0xff] %vm1365_vm11, %v4835_v54  ;;  %v4798_v2 = vadd.f32 %v4737_v16, %v4280_v18 }
 0x477   : > { %v4282_v45 = vpop.f32.mrf.mxu1  ;;  %v4740_v48 = vpop.f32.mrf.mxu0 }
 0x478   : > { %v4836_v62 = vadd.f32 %v8071_v10, %v4798_v2  ;;  %v4283_v8 = vadd.f32 %v4282_v45, %v8033_v19 }
 0x479   : > { %v4284_v14 = vpop.f32.mrf.mxu1  ;;  %v4742_v46 = vpop.f32.mrf.mxu0 }
 0x47a   : > { %4868 = vst.msk [vmem:[%s6870_s5 + $0xb0] sm:$0xff] %vm1365_vm11, %v4836_v62  ;;  %v4799_v42 = vadd.f32 %v4740_v48, %v4283_v8 }
 0x47b   : > { %v4287_v38 = vpop.f32.mrf.mxu1  ;;  %v4745_v24 = vpop.f32.mrf.mxu0 }
 0x47c   : > { %v4837_v13 = vadd.f32 %v8071_v10, %v4799_v42  ;;  %v4288_v17 = vadd.f32 %v4287_v38, %v8037_v21 }
 0x47d   : > { %v4289_v53 = vpop.f32.mrf.mxu1  ;;  %v4747_v63 = vpop.f32.mrf.mxu0 }
 0x47e   : > { %4869 = vst.msk [vmem:[%s6870_s5 + $0xb8] sm:$0xff] %vm1365_vm11, %v4837_v13  ;;  %v4800_v1 = vadd.f32 %v4745_v24, %v4288_v17 }
 0x47f   : > { %v4290_v28 = vpop.f32.mrf.mxu1  ;;  %v4748_v19 = vpop.f32.mrf.mxu0 }
 0x480   : > { %v4838_v47 = vadd.f32 %v8071_v10, %v4800_v1  ;;  %v4291_v9 = vadd.f32 %v4290_v28, %v8041_v56 }
 0x481   : > { %v4292_v12 = vpop.f32.mrf.mxu1  ;;  %v4750_v31 = vpop.f32.mrf.mxu0 }
 0x482   : > { %4870 = vst.msk [vmem:[%s6870_s5 + $0xc0] sm:$0xff] %vm1365_vm11, %v4838_v47  ;;  %v4801_v40 = vadd.f32 %v4748_v19, %v4291_v9 }
 0x483   : > { %v4295_v27 = vpop.f32.mrf.mxu1  ;;  %v4753_v21 = vpop.f32.mrf.mxu0 }
 0x484   : > { %v4839_v32 = vadd.f32 %v8071_v10, %v4801_v40  ;;  %v4296_v59 = vadd.f32 %v4295_v27, %v8045_v37 }
 0x485   : > { %v4297_v6 = vpop.f32.mrf.mxu1  ;;  %v4755_v57 = vpop.f32.mrf.mxu0 }
 0x486   : > { %4871 = vst.msk [vmem:[%s6870_s5 + $0xc8] sm:$0xff] %vm1365_vm11, %v4839_v32  ;;  %v4802_v22 = vadd.f32 %v4753_v21, %v4296_v59 }
 0x487   : > { %v4298_v55 = vpop.f32.mrf.mxu1  ;;  %v4756_v56 = vpop.f32.mrf.mxu0 }
 0x488   : > { %v4840_v44 = vadd.f32 %v8071_v10, %v4802_v22  ;;  %v4299_v7 = vadd.f32 %v4298_v55, %v8049_v60 }
 0x489   : > { %v4300_v0 = vpop.f32.mrf.mxu1  ;;  %v4758_v43 = vpop.f32.mrf.mxu0 }
 0x48a   : > { %4872 = vst.msk [vmem:[%s6870_s5 + $0xd0] sm:$0xff] %vm1365_vm11, %v4840_v44  ;;  %v4803_v26 = vadd.f32 %v4756_v56, %v4299_v7 }
 0x48b   : > { %v4303_v39 = vpop.f32.mrf.mxu1  ;;  %v4761_v37 = vpop.f32.mrf.mxu0 }
 0x48c   : > { %v4841_v5 = vadd.f32 %v8071_v10, %v4803_v26  ;;  %v4304_v36 = vadd.f32 %v4303_v39, %v8053_v51 }
 0x48d   : > { %v4305_v15 = vpop.f32.mrf.mxu1  ;;  %v4763_v41 = vpop.f32.mrf.mxu0 }
 0x48e   : > { %4873 = vst.msk [vmem:[%s6870_s5 + $0xd8] sm:$0xff] %vm1365_vm11, %v4841_v5  ;;  %v4804_v30 = vadd.f32 %v4761_v37, %v4304_v36 }
 0x48f   : > { %v4306_v34 = vpop.f32.mrf.mxu1  ;;  %v4764_v60 = vpop.f32.mrf.mxu0 }
 0x490   : > { %v4842_v4 = vadd.f32 %v8071_v10, %v4804_v30  ;;  %v4307_v3 = vadd.f32 %v4306_v34, %v8057_v11 }
 0x491   : > { %v4308_v58 = vpop.f32.mrf.mxu1  ;;  %v4766_v61 = vpop.f32.mrf.mxu0 }
 0x492   : > { %4874 = vst.msk [vmem:[%s6870_s5 + $0xe0] sm:$0xff] %vm1365_vm11, %v4842_v4  ;;  %v4805_v20 = vadd.f32 %v4764_v60, %v4307_v3 }
 0x493   : > { %v4311_v51 = vpop.f32.mrf.mxu1  ;;  %v4769_v50 = vpop.f32.mrf.mxu0 }
 0x494   : > { %v4843_v35 = vadd.f32 %v8071_v10, %v4805_v20  ;;  %v4312_v52 = vadd.f32 %v4311_v51, %v8061_v25 }
 0x495   : > { %v4313_v23 = vpop.f32.mrf.mxu1  ;;  %v4771_v16 = vpop.f32.mrf.mxu0 }
 0x496   : > { %4875 = vst.msk [vmem:[%s6870_s5 + $0xe8] sm:$0xff] %vm1365_vm11, %v4843_v35  ;;  %v4806_v11 = vadd.f32 %v4769_v50, %v4312_v52 }
 0x497   : > { %v4314_v54 = vpop.f32.mrf.mxu1  ;;  %v4772_v18 = vpop.f32.mrf.mxu0 }
 0x498   : > { %v4844_v33 = vadd.f32 %v8071_v10, %v4806_v11  ;;  %v4315_v29 = vadd.f32 %v4314_v54, %v8065_v49 }
 0x499   : > { %v4316_v2 = vpop.f32.mrf.mxu1  ;;  %v4774_v45 = vpop.f32.mrf.mxu0 }
 0x49a   : > { %4876 = vst.msk [vmem:[%s6870_s5 + $0xf0] sm:$0xff] %vm1365_vm11, %v4844_v33  ;;  %v4807_v25 = vadd.f32 %v4772_v18, %v4315_v29 }
 0x49c   : > { %v4845_v48 = vadd.f32 %v8071_v10, %v4807_v25 }
 0x49e   : > { %4877 = vst.msk [vmem:[%s6870_s5 + $0xf8] sm:$0xff] %vm1365_vm11, %v4845_v48 }
 0x49f   : > { %5932 = shalt.err (!%p5929_p4)
}
 0x4a0   : > { %s5933_s30 = scalar_lea.hbm %s8202_s19, 4096  ;;  %s5937_s28 = scalar_lea.hbm %s8254_s3, 8192 }
 0x4a1   : > { %p5934_p7 = scmp.ne.s32.totalorder %s8202_s19, %s5933_s30  ;;  %p5938_p10 = scmp.lt.s32.totalorder %s8202_s19, %s8254_s3 }
 0x4a2   : > { %p5939_p11 = scmp.lt.s32.totalorder %s5937_s28, %s5933_s30 }
 0x4a3   : > { %p5935_p8 = pnand %p5934_p7, %p6054_p5 }
 0x4a4   : > { %p5940_p12 = por %p5939_p11, %p5938_p10 }
 0x4a5   : > { %p5936_p9 = pneg %p5935_p8 }
 0x4a7   : > { %p5941_p13 = pnand %p5940_p12, %p5936_p9 }
 0x4a9   : > { %5944 = shalt.err (!%p5941_p13)
}
 0x4aa   : > { %s5994_s6 = smov 128   ;;  %s5995_s7 = smov 8  }
 0x4ab   : > { %5669 = dma.vmem_to_hbm [thread:$0]  (%p6054_p5), %s8204_s10, 4096, %s8202_s19, %s8211_s16, %s5994_s6, %s5994_s6, %s5995_s7  }
 0x4ac PF: > { %p5675_p0 = scmp.ge.s32.totalorder %s5983_s15, 2  ;;  %s4907_s8 = sand.u32 1, %s5971_s12  }
 0x4ad   : > { %s4908_s9 = scalar_lea.sflag [#allocation4], %s4907_s8 }
 0x4ae   : > { %p5672_p1 = pnand %p5675_p0, %p6058_p6 }
 0x4b0   : > { %p5673_p2 = pneg %p5672_p1 }
 0x4b2   : > { %5966 = dma.done.wait (%p5673_p2), %s4908_s9, 4096  }
 0x4b3   : > { %5968 = vsyncadd (%p5673_p2), %s4908_s9, 4294963200  ;;  %p13_p3 = scmp.ge.s32.totalorder %s6041_s18, 4   ;;  %s8263_s12 = smov %s5975_s13 }
 0x4b4   : > { %s8264_s13 = smov %s5979_s14  ;;  %s8265_s14 = smov %s6052_s21 }
 0x4b5   : > { %s8266_s15 = smov %s6041_s18  ;;  %15 = sbr.rel (!%p13_p3) target bundleno = 3 (0x3), region = 92 }
 0x4ba   :  { %4913 = vsyncpa [#allocation4], 1 }
 0x4bb   :  { %4915 = vsyncpa [#allocation4 + $0x1], 1 }

</bundles_post_ra>
